<compile_context>
chip_gen: v7x
topology: tpu7x:2x2x1
jax: 0.10.0
libtpu: 0.0.40
codegen_flags: <defaults>
</compile_context>

<pallas_src>
import numpy as np
import jax
import jax.numpy as jnp
from jax import lax
from jax.experimental import pallas as pl
from jax.experimental.pallas import tpu as pltpu


# ----------------------------------------------------------------------------
# Static geometry
# ----------------------------------------------------------------------------
def _round_up(x, m):
    return ((x + m - 1) // m) * m


def _geometry(H, W):
    H1, W1 = H - 2, W - 2                     # conv1 (3x3, valid)
    Hp, Wp = -(-H1 // 2), -(-W1 // 2)         # maxpool 2x2, ceil_mode
    H2, W2 = Hp - 2, Wp - 2                   # conv2
    H3, W3 = H2 - 2, W2 - 2                   # conv3
    R3c = _round_up(H3 * Wp, 8)               # rows computed by conv3 / heads
    R2c = _round_up(2 * Wp + 2 + R3c, 8)      # rows computed by conv2
    Rpc = _round_up(2 * Wp + 2 + R2c, 8)      # rows of compact pooled map
    Lp = _round_up(2 * W * (Hp - 1) + 2 * (Wp - 1) + 1, 8)   # pool-max length
    R1c = _round_up(W + 1 + Lp, 8)            # rows computed by conv1
    Rin = _round_up(2 * W + 2 + R1c, 8)       # zero-padded input rows
    return dict(H1=H1, W1=W1, Hp=Hp, Wp=Wp, H2=H2, W2=W2, H3=H3, W3=W3,
                R3c=R3c, R2c=R2c, Rpc=Rpc, Lp=Lp, R1c=R1c, Rin=Rin)


# ----------------------------------------------------------------------------
# Tiny host-side constants (numpy, built at trace time)
# ----------------------------------------------------------------------------
def _pool_decimation(geo, W):
    """(Rpc, Lp) one-hot: pooled row p=(i,j) picks conv1 flat row 2*i*W + 2*j."""
    Hp, Wp, Rpc, Lp = geo['Hp'], geo['Wp'], geo['Rpc'], geo['Lp']
    d = np.zeros((Rpc, Lp), np.float32)
    for p in range(Rpc):
        if p < Hp * Wp:
            i, j = divmod(p, Wp)
            d[p, 2 * i * W + 2 * j] = 1.0
        else:
            d[p, 0] = 1.0                      # dummy padding rows
    return d


def _conv1_valid_mask(geo, W):
    """(R1c, 1) additive mask: 0 on valid conv1 rows, -1e30 on garbage rows/cols
    (keeps the ceil-mode pooling max exact; avoids inf arithmetic)."""
    H1, W1, R1c = geo['H1'], geo['W1'], geo['R1c']
    m = np.full((R1c, 1), -1e30, np.float32)
    for r in range(R1c):
        h, w = divmod(r, W)
        if h < H1 and w < W1:
            m[r, 0] = 0.0
    return m


# ----------------------------------------------------------------------------
# Pallas kernel factory (B_blk images per grid step)
# ----------------------------------------------------------------------------
def _make_kernel(B_blk, W, geo):
    Wp, R1c, R2c, R3c, Lp = (geo['Wp'], geo['R1c'], geo['R2c'], geo['R3c'],
                             geo['Lp'])
    taps1 = [kh * W + kw for kh in range(3) for kw in range(3)]
    taps23 = [kh * Wp + kw for kh in range(3) for kw in range(3)]
    pool_shifts = [0, 1, W, W + 1]
    f32 = jnp.float32

    def kernel(x_ref, pmask_ref, dsel_ref,
               w1_ref, b1_ref, a1_ref,
               w2_ref, b2_ref, a2_ref,
               w3_ref, b3_ref, a3_ref,
               wh_ref, bh_ref, out_ref):
        pmask = pmask_ref[...]
        dsel = dsel_ref[...]
        wh, bh = wh_ref[...], bh_ref[...]
        w1 = [w1_ref[t] for t in range(9)]
        w2 = [w2_ref[t] for t in range(9)]
        w3 = [w3_ref[t] for t in range(9)]
        b1, a1 = b1_ref[...], a1_ref[...]
        b2, a2 = b2_ref[...], a2_ref[...]
        b3, a3 = b3_ref[...], a3_ref[...]

        lane = lax.broadcasted_iota(jnp.int32, (R3c, 8), 1)
        is_cls = lane < 2
        is_live = lane < 6

        def conv_prelu(inp, taps, ws, b, a, rows):
            acc = jnp.zeros((rows, ws[0].shape[1]), f32) + b
            for t, d in enumerate(taps):          # 9 static-slice taps
                acc = acc + jnp.dot(inp[d:d + rows, :], ws[t],
                                    preferred_element_type=f32)
            return jnp.where(acc >= 0, acc, acc * a)

        for bi in range(B_blk):
            x = x_ref[bi]                                          # (Rin, 3)
            # conv1 + PReLU over the full row stride W; mask invalid positions.
            y1 = conv_prelu(x, taps1, w1, b1, a1, R1c) + pmask     # (R1c, 10)
            # maxpool 2x2 (ceil): VPU max over 4 shifted views, then one small
            # one-hot matmul that decimates / compacts rows to (Hp*Wp, 10).
            pf = y1[0:Lp, :]
            for s in pool_shifts[1:]:
                pf = jnp.maximum(pf, y1[s:s + Lp, :])
            pooled = jnp.dot(dsel, pf, preferred_element_type=f32)  # (Rpc,10)
            y2 = conv_prelu(pooled, taps23, w2, b2, a2, R2c)        # (R2c,16)
            y3 = conv_prelu(y2, taps23, w3, b3, a3, R3c)            # (R3c,32)
            # TODO(synk): PyTorch casts the pre_layer output to float64; TPU has
            # no native f64, so the heads run in float32.
            z = jnp.dot(y3, wh, preferred_element_type=f32) + bh    # (R3c, 8)
            lmax = jnp.max(z[:, 0:2], axis=-1, keepdims=True)
            den = jnp.sum(jnp.exp(z[:, 0:2] - lmax), axis=-1, keepdims=True)
            soft = jnp.exp(z - lmax) / den
            out = jnp.where(is_cls, soft, z)       # lanes 0:2 softmax, 2:6 bbox
            out_ref[bi] = jnp.where(is_live, out, 0.0)

    return kernel


# ----------------------------------------------------------------------------
# Wrapper
# ----------------------------------------------------------------------------
def _pick_block(N):
    for b in (8, 4, 2):
        if N % b == 0 and N // b >= 2:   # keep grid >= 2 for the 2 v7x TCs
            return b
    return 1


def pnet_forward(x_nchw, p):
    N, C, H, W = x_nchw.shape
    assert C == 3 and H >= 12 and W >= 12
    geo = _geometry(H, W)
    Rin, R3c = geo['Rin'], geo['R3c']
    H3, W3, Wp = geo['H3'], geo['W3'], geo['Wp']

    x_flat = jnp.transpose(x_nchw, (0, 2, 3, 1)).reshape(N, H * W, C)
    x_pad = jnp.pad(x_flat, ((0, 0), (0, Rin - H * W), (0, 0)))

    pmask = jnp.asarray(_conv1_valid_mask(geo, W))
    dsel = jnp.asarray(_pool_decimation(geo, W))
    whead = jnp.concatenate(
        [p['w41'], p['w42'], jnp.zeros((32, 2), jnp.float32)], axis=1)  # (32,8)
    bhead = jnp.concatenate(
        [p['b41'], p['b42'], jnp.zeros((1, 2), jnp.float32)], axis=1)   # (1,8)

    consts = [pmask, dsel,
              p['w1'], p['b1'], p['a1'],
              p['w2'], p['b2'], p['a2'],
              p['w3'], p['b3'], p['a3'],
              whead, bhead]

    B_blk = _pick_block(N)

    def const_spec(a):
        return pl.BlockSpec(a.shape, lambda n, nd=a.ndim: (0,) * nd)

    in_specs = [pl.BlockSpec((B_blk, Rin, C), lambda n: (n, 0, 0))]
    in_specs += [const_spec(a) for a in consts]
    out_specs = pl.BlockSpec((B_blk, R3c, 8), lambda n: (n, 0, 0))

    out = pl.pallas_call(
        _make_kernel(B_blk, W, geo),
        out_shape=jax.ShapeDtypeStruct((N, R3c, 8), jnp.float32),
        grid=(N // B_blk,),
        in_specs=in_specs,
        out_specs=out_specs,
        compiler_params=pltpu.CompilerParams(
            dimension_semantics=("parallel",)),
    )(x_pad, *consts)

    # Extract the valid (H3, W3) window and split the fused head.
    out = out[:, :H3 * Wp, :].reshape(N, H3, Wp, 8)[:, :, :W3, :]
    cls = jnp.transpose(out[..., 0:2], (0, 3, 1, 2))   # (N, 2, H3, W3)
    bb = jnp.transpose(out[..., 2:6], (0, 3, 1, 2))    # (N, 4, H3, W3)
    return bb, cls


# ----------------------------------------------------------------------------
# Deterministic parameter init (xavier_uniform weights, bias=0.1, PReLU=0.25)
# ----------------------------------------------------------------------------
def init_params(key):
    def xavier(k, kh, kw, cin, cout):
        fan_in, fan_out = cin * kh * kw, cout * kh * kw
        bound = float(np.sqrt(6.0 / (fan_in + fan_out)))
        return jax.random.uniform(k, (kh * kw, cin, cout), jnp.float32,
                                  -bound, bound)

    k1, k2, k3, k4, k5 = jax.random.split(key, 5)
    return {
        'w1': xavier(k1, 3, 3, 3, 10),
        'b1': jnp.full((1, 10), 0.1, jnp.float32),
        'a1': jnp.full((1, 10), 0.25, jnp.float32),
        'w2': xavier(k2, 3, 3, 10, 16),
        'b2': jnp.full((1, 16), 0.1, jnp.float32),
        'a2': jnp.full((1, 16), 0.25, jnp.float32),
        'w3': xavier(k3, 3, 3, 16, 32),
        'b3': jnp.full((1, 32), 0.1, jnp.float32),
        'a3': jnp.full((1, 32), 0.25, jnp.float32),
        'w41': xavier(k4, 1, 1, 32, 2)[0],
        'b41': jnp.full((1, 2), 0.1, jnp.float32),
        'w42': xavier(k5, 1, 1, 32, 4)[0],
        'b42': jnp.full((1, 4), 0.1, jnp.float32),
    }


# ----------------------------------------------------------------------------
# Pure-JAX reference (for correctness check only)
# ----------------------------------------------------------------------------
def pnet_reference(x_nchw, p):
    def conv(x_nhwc, w_taps, b, k):
        w = w_taps.reshape(k, k, w_taps.shape[-2], w_taps.shape[-1])
        y = lax.conv_general_dilated(
            x_nhwc, w, (1, 1), 'VALID',
            dimension_numbers=('NHWC', 'HWIO', 'NHWC'),
            precision=lax.Precision.HIGHEST)
        return y + b.reshape(1, 1, 1, -1)

    def prelu(x, a):
        return jnp.where(x >= 0, x, x * a.reshape(1, 1, 1, -1))

    x = jnp.transpose(x_nchw, (0, 2, 3, 1))
    y = prelu(conv(x, p['w1'], p['b1'], 3), p['a1'])
    _, H1, W1, _ = y.shape
    ph, pw = (-H1) % 2, (-W1) % 2
    y = jnp.pad(y, ((0, 0), (0, ph), (0, pw), (0, 0)),
                constant_values=-jnp.inf)
    y = lax.reduce_window(y, -jnp.inf, lax.max, (1, 2, 2, 1), (1, 2, 2, 1),
                          'VALID')
    y = prelu(conv(y, p['w2'], p['b2'], 3), p['a2'])
    y = prelu(conv(y, p['w3'], p['b3'], 3), p['a3'])
    logits = jnp.einsum('nhwc,cd->nhwd', y, p['w41'],
                        precision=lax.Precision.HIGHEST) + p['b41'].reshape(1, 1, 1, -1)
    cls = jax.nn.softmax(logits, axis=-1)
    bb = jnp.einsum('nhwc,cd->nhwd', y, p['w42'],
                    precision=lax.Precision.HIGHEST) + p['b42'].reshape(1, 1, 1, -1)
    return jnp.transpose(bb, (0, 3, 1, 2)), jnp.transpose(cls, (0, 3, 1, 2))


if __name__ == "__main__":
    key = jax.random.PRNGKey(0)
    kx, kp = jax.random.split(key)
    x = jax.random.normal(kx, (2, 3, 16, 16), jnp.float32)   # NCHW like PyTorch
    params = init_params(kp)

    bb, cls = pnet_forward(x, params)
    jax.block_until_ready((bb, cls))

    assert bb.shape == (2, 4, 3, 3) and cls.shape == (2, 2, 3, 3)
    bb_r, cls_r = pnet_reference(x, params)
    assert jnp.allclose(bb, bb_r, atol=1e-3, rtol=1e-3), "bb_regress mismatch"
    assert jnp.allclose(cls, cls_r, atol=1e-3, rtol=1e-3), "face_classify mismatch"

    print("KERNEL_OK")
</pallas_src>

<mosaic_0001>
module attributes {stable_mosaic.version = 11 : i64} {
  func.func @kernel(%arg0: i32, %arg1: memref<1x272x3xf32, #tpu.memory_space<vmem>>, %arg2: memref<232x1xf32, #tpu.memory_space<vmem>>, %arg3: memref<56x208xf32, #tpu.memory_space<vmem>>, %arg4: memref<9x3x10xf32, #tpu.memory_space<vmem>>, %arg5: memref<1x10xf32, #tpu.memory_space<vmem>>, %arg6: memref<1x10xf32, #tpu.memory_space<vmem>>, %arg7: memref<9x10x16xf32, #tpu.memory_space<vmem>>, %arg8: memref<1x16xf32, #tpu.memory_space<vmem>>, %arg9: memref<1x16xf32, #tpu.memory_space<vmem>>, %arg10: memref<9x16x32xf32, #tpu.memory_space<vmem>>, %arg11: memref<1x32xf32, #tpu.memory_space<vmem>>, %arg12: memref<1x32xf32, #tpu.memory_space<vmem>>, %arg13: memref<32x8xf32, #tpu.memory_space<vmem>>, %arg14: memref<1x8xf32, #tpu.memory_space<vmem>>, %arg15: memref<1x24x8xf32, #tpu.memory_space<vmem>>) attributes {dimension_semantics = [#tpu.dimension_semantics<parallel>], iteration_bounds = array<i64: 2>, scalar_prefetch = 0 : i64, scratch_operands = 0 : i64, tpu.core_type = #tpu.core_type<tc>, window_params = [{transform_indices = @transform_0, window_bounds = array<i64: 1, 272, 3>}, {pipeline_mode = #tpu.pipeline_mode<synchronous>, transform_indices = @transform_1, window_bounds = array<i64: 232, 1>}, {pipeline_mode = #tpu.pipeline_mode<synchronous>, transform_indices = @transform_2, window_bounds = array<i64: 56, 208>}, {pipeline_mode = #tpu.pipeline_mode<synchronous>, transform_indices = @transform_3, window_bounds = array<i64: 9, 3, 10>}, {pipeline_mode = #tpu.pipeline_mode<synchronous>, transform_indices = @transform_4, window_bounds = array<i64: 1, 10>}, {pipeline_mode = #tpu.pipeline_mode<synchronous>, transform_indices = @transform_5, window_bounds = array<i64: 1, 10>}, {pipeline_mode = #tpu.pipeline_mode<synchronous>, transform_indices = @transform_6, window_bounds = array<i64: 9, 10, 16>}, {pipeline_mode = #tpu.pipeline_mode<synchronous>, transform_indices = @transform_7, window_bounds = array<i64: 1, 16>}, {pipeline_mode = #tpu.pipeline_mode<synchronous>, transform_indices = @transform_8, window_bounds = array<i64: 1, 16>}, {pipeline_mode = #tpu.pipeline_mode<synchronous>, transform_indices = @transform_9, window_bounds = array<i64: 9, 16, 32>}, {pipeline_mode = #tpu.pipeline_mode<synchronous>, transform_indices = @transform_10, window_bounds = array<i64: 1, 32>}, {pipeline_mode = #tpu.pipeline_mode<synchronous>, transform_indices = @transform_11, window_bounds = array<i64: 1, 32>}, {pipeline_mode = #tpu.pipeline_mode<synchronous>, transform_indices = @transform_12, window_bounds = array<i64: 32, 8>}, {pipeline_mode = #tpu.pipeline_mode<synchronous>, transform_indices = @transform_13, window_bounds = array<i64: 1, 8>}, {transform_indices = @transform_14, window_bounds = array<i64: 1, 24, 8>}]} {
    %c0 = arith.constant 0 : index
    %c0_0 = arith.constant 0 : index
    %0 = vector.load %arg2[%c0, %c0_0] : memref<232x1xf32, #tpu.memory_space<vmem>>, vector<232x1xf32>
    %c0_1 = arith.constant 0 : index
    %c0_2 = arith.constant 0 : index
    %1 = vector.load %arg3[%c0_1, %c0_2] : memref<56x208xf32, #tpu.memory_space<vmem>>, vector<56x208xf32>
    %c0_3 = arith.constant 0 : index
    %c0_4 = arith.constant 0 : index
    %2 = vector.load %arg13[%c0_3, %c0_4] : memref<32x8xf32, #tpu.memory_space<vmem>>, vector<32x8xf32>
    %c0_5 = arith.constant 0 : index
    %c0_6 = arith.constant 0 : index
    %3 = vector.load %arg14[%c0_5, %c0_6] : memref<1x8xf32, #tpu.memory_space<vmem>>, vector<1x8xf32>
    %c0_7 = arith.constant 0 : index
    %c0_8 = arith.constant 0 : index
    %c0_9 = arith.constant 0 : index
    %4 = vector.load %arg4[%c0_7, %c0_8, %c0_9] : memref<9x3x10xf32, #tpu.memory_space<vmem>>, vector<1x3x10xf32>
    %5 = vector.shape_cast %4 : vector<1x3x10xf32> to vector<3x10xf32>
    %c1 = arith.constant 1 : index
    %c0_10 = arith.constant 0 : index
    %c0_11 = arith.constant 0 : index
    %6 = vector.load %arg4[%c1, %c0_10, %c0_11] : memref<9x3x10xf32, #tpu.memory_space<vmem>>, vector<1x3x10xf32>
    %7 = vector.shape_cast %6 : vector<1x3x10xf32> to vector<3x10xf32>
    %c2 = arith.constant 2 : index
    %c0_12 = arith.constant 0 : index
    %c0_13 = arith.constant 0 : index
    %8 = vector.load %arg4[%c2, %c0_12, %c0_13] : memref<9x3x10xf32, #tpu.memory_space<vmem>>, vector<1x3x10xf32>
    %9 = vector.shape_cast %8 : vector<1x3x10xf32> to vector<3x10xf32>
    %c3 = arith.constant 3 : index
    %c0_14 = arith.constant 0 : index
    %c0_15 = arith.constant 0 : index
    %10 = vector.load %arg4[%c3, %c0_14, %c0_15] : memref<9x3x10xf32, #tpu.memory_space<vmem>>, vector<1x3x10xf32>
    %11 = vector.shape_cast %10 : vector<1x3x10xf32> to vector<3x10xf32>
    %c4 = arith.constant 4 : index
    %c0_16 = arith.constant 0 : index
    %c0_17 = arith.constant 0 : index
    %12 = vector.load %arg4[%c4, %c0_16, %c0_17] : memref<9x3x10xf32, #tpu.memory_space<vmem>>, vector<1x3x10xf32>
    %13 = vector.shape_cast %12 : vector<1x3x10xf32> to vector<3x10xf32>
    %c5 = arith.constant 5 : index
    %c0_18 = arith.constant 0 : index
    %c0_19 = arith.constant 0 : index
    %14 = vector.load %arg4[%c5, %c0_18, %c0_19] : memref<9x3x10xf32, #tpu.memory_space<vmem>>, vector<1x3x10xf32>
    %15 = vector.shape_cast %14 : vector<1x3x10xf32> to vector<3x10xf32>
    %c6 = arith.constant 6 : index
    %c0_20 = arith.constant 0 : index
    %c0_21 = arith.constant 0 : index
    %16 = vector.load %arg4[%c6, %c0_20, %c0_21] : memref<9x3x10xf32, #tpu.memory_space<vmem>>, vector<1x3x10xf32>
    %17 = vector.shape_cast %16 : vector<1x3x10xf32> to vector<3x10xf32>
    %c7 = arith.constant 7 : index
    %c0_22 = arith.constant 0 : index
    %c0_23 = arith.constant 0 : index
    %18 = vector.load %arg4[%c7, %c0_22, %c0_23] : memref<9x3x10xf32, #tpu.memory_space<vmem>>, vector<1x3x10xf32>
    %19 = vector.shape_cast %18 : vector<1x3x10xf32> to vector<3x10xf32>
    %c8 = arith.constant 8 : index
    %c0_24 = arith.constant 0 : index
    %c0_25 = arith.constant 0 : index
    %20 = vector.load %arg4[%c8, %c0_24, %c0_25] : memref<9x3x10xf32, #tpu.memory_space<vmem>>, vector<1x3x10xf32>
    %21 = vector.shape_cast %20 : vector<1x3x10xf32> to vector<3x10xf32>
    %c0_26 = arith.constant 0 : index
    %c0_27 = arith.constant 0 : index
    %c0_28 = arith.constant 0 : index
    %22 = vector.load %arg7[%c0_26, %c0_27, %c0_28] : memref<9x10x16xf32, #tpu.memory_space<vmem>>, vector<1x10x16xf32>
    %23 = vector.shape_cast %22 : vector<1x10x16xf32> to vector<10x16xf32>
    %c1_29 = arith.constant 1 : index
    %c0_30 = arith.constant 0 : index
    %c0_31 = arith.constant 0 : index
    %24 = vector.load %arg7[%c1_29, %c0_30, %c0_31] : memref<9x10x16xf32, #tpu.memory_space<vmem>>, vector<1x10x16xf32>
    %25 = vector.shape_cast %24 : vector<1x10x16xf32> to vector<10x16xf32>
    %c2_32 = arith.constant 2 : index
    %c0_33 = arith.constant 0 : index
    %c0_34 = arith.constant 0 : index
    %26 = vector.load %arg7[%c2_32, %c0_33, %c0_34] : memref<9x10x16xf32, #tpu.memory_space<vmem>>, vector<1x10x16xf32>
    %27 = vector.shape_cast %26 : vector<1x10x16xf32> to vector<10x16xf32>
    %c3_35 = arith.constant 3 : index
    %c0_36 = arith.constant 0 : index
    %c0_37 = arith.constant 0 : index
    %28 = vector.load %arg7[%c3_35, %c0_36, %c0_37] : memref<9x10x16xf32, #tpu.memory_space<vmem>>, vector<1x10x16xf32>
    %29 = vector.shape_cast %28 : vector<1x10x16xf32> to vector<10x16xf32>
    %c4_38 = arith.constant 4 : index
    %c0_39 = arith.constant 0 : index
    %c0_40 = arith.constant 0 : index
    %30 = vector.load %arg7[%c4_38, %c0_39, %c0_40] : memref<9x10x16xf32, #tpu.memory_space<vmem>>, vector<1x10x16xf32>
    %31 = vector.shape_cast %30 : vector<1x10x16xf32> to vector<10x16xf32>
    %c5_41 = arith.constant 5 : index
    %c0_42 = arith.constant 0 : index
    %c0_43 = arith.constant 0 : index
    %32 = vector.load %arg7[%c5_41, %c0_42, %c0_43] : memref<9x10x16xf32, #tpu.memory_space<vmem>>, vector<1x10x16xf32>
    %33 = vector.shape_cast %32 : vector<1x10x16xf32> to vector<10x16xf32>
    %c6_44 = arith.constant 6 : index
    %c0_45 = arith.constant 0 : index
    %c0_46 = arith.constant 0 : index
    %34 = vector.load %arg7[%c6_44, %c0_45, %c0_46] : memref<9x10x16xf32, #tpu.memory_space<vmem>>, vector<1x10x16xf32>
    %35 = vector.shape_cast %34 : vector<1x10x16xf32> to vector<10x16xf32>
    %c7_47 = arith.constant 7 : index
    %c0_48 = arith.constant 0 : index
    %c0_49 = arith.constant 0 : index
    %36 = vector.load %arg7[%c7_47, %c0_48, %c0_49] : memref<9x10x16xf32, #tpu.memory_space<vmem>>, vector<1x10x16xf32>
    %37 = vector.shape_cast %36 : vector<1x10x16xf32> to vector<10x16xf32>
    %c8_50 = arith.constant 8 : index
    %c0_51 = arith.constant 0 : index
    %c0_52 = arith.constant 0 : index
    %38 = vector.load %arg7[%c8_50, %c0_51, %c0_52] : memref<9x10x16xf32, #tpu.memory_space<vmem>>, vector<1x10x16xf32>
    %39 = vector.shape_cast %38 : vector<1x10x16xf32> to vector<10x16xf32>
    %c0_53 = arith.constant 0 : index
    %c0_54 = arith.constant 0 : index
    %c0_55 = arith.constant 0 : index
    %40 = vector.load %arg10[%c0_53, %c0_54, %c0_55] : memref<9x16x32xf32, #tpu.memory_space<vmem>>, vector<1x16x32xf32>
    %41 = vector.shape_cast %40 : vector<1x16x32xf32> to vector<16x32xf32>
    %c1_56 = arith.constant 1 : index
    %c0_57 = arith.constant 0 : index
    %c0_58 = arith.constant 0 : index
    %42 = vector.load %arg10[%c1_56, %c0_57, %c0_58] : memref<9x16x32xf32, #tpu.memory_space<vmem>>, vector<1x16x32xf32>
    %43 = vector.shape_cast %42 : vector<1x16x32xf32> to vector<16x32xf32>
    %c2_59 = arith.constant 2 : index
    %c0_60 = arith.constant 0 : index
    %c0_61 = arith.constant 0 : index
    %44 = vector.load %arg10[%c2_59, %c0_60, %c0_61] : memref<9x16x32xf32, #tpu.memory_space<vmem>>, vector<1x16x32xf32>
    %45 = vector.shape_cast %44 : vector<1x16x32xf32> to vector<16x32xf32>
    %c3_62 = arith.constant 3 : index
    %c0_63 = arith.constant 0 : index
    %c0_64 = arith.constant 0 : index
    %46 = vector.load %arg10[%c3_62, %c0_63, %c0_64] : memref<9x16x32xf32, #tpu.memory_space<vmem>>, vector<1x16x32xf32>
    %47 = vector.shape_cast %46 : vector<1x16x32xf32> to vector<16x32xf32>
    %c4_65 = arith.constant 4 : index
    %c0_66 = arith.constant 0 : index
    %c0_67 = arith.constant 0 : index
    %48 = vector.load %arg10[%c4_65, %c0_66, %c0_67] : memref<9x16x32xf32, #tpu.memory_space<vmem>>, vector<1x16x32xf32>
    %49 = vector.shape_cast %48 : vector<1x16x32xf32> to vector<16x32xf32>
    %c5_68 = arith.constant 5 : index
    %c0_69 = arith.constant 0 : index
    %c0_70 = arith.constant 0 : index
    %50 = vector.load %arg10[%c5_68, %c0_69, %c0_70] : memref<9x16x32xf32, #tpu.memory_space<vmem>>, vector<1x16x32xf32>
    %51 = vector.shape_cast %50 : vector<1x16x32xf32> to vector<16x32xf32>
    %c6_71 = arith.constant 6 : index
    %c0_72 = arith.constant 0 : index
    %c0_73 = arith.constant 0 : index
    %52 = vector.load %arg10[%c6_71, %c0_72, %c0_73] : memref<9x16x32xf32, #tpu.memory_space<vmem>>, vector<1x16x32xf32>
    %53 = vector.shape_cast %52 : vector<1x16x32xf32> to vector<16x32xf32>
    %c7_74 = arith.constant 7 : index
    %c0_75 = arith.constant 0 : index
    %c0_76 = arith.constant 0 : index
    %54 = vector.load %arg10[%c7_74, %c0_75, %c0_76] : memref<9x16x32xf32, #tpu.memory_space<vmem>>, vector<1x16x32xf32>
    %55 = vector.shape_cast %54 : vector<1x16x32xf32> to vector<16x32xf32>
    %c8_77 = arith.constant 8 : index
    %c0_78 = arith.constant 0 : index
    %c0_79 = arith.constant 0 : index
    %56 = vector.load %arg10[%c8_77, %c0_78, %c0_79] : memref<9x16x32xf32, #tpu.memory_space<vmem>>, vector<1x16x32xf32>
    %57 = vector.shape_cast %56 : vector<1x16x32xf32> to vector<16x32xf32>
    %c0_80 = arith.constant 0 : index
    %c0_81 = arith.constant 0 : index
    %58 = vector.load %arg5[%c0_80, %c0_81] : memref<1x10xf32, #tpu.memory_space<vmem>>, vector<1x10xf32>
    %c0_82 = arith.constant 0 : index
    %c0_83 = arith.constant 0 : index
    %59 = vector.load %arg6[%c0_82, %c0_83] : memref<1x10xf32, #tpu.memory_space<vmem>>, vector<1x10xf32>
    %c0_84 = arith.constant 0 : index
    %c0_85 = arith.constant 0 : index
    %60 = vector.load %arg8[%c0_84, %c0_85] : memref<1x16xf32, #tpu.memory_space<vmem>>, vector<1x16xf32>
    %c0_86 = arith.constant 0 : index
    %c0_87 = arith.constant 0 : index
    %61 = vector.load %arg9[%c0_86, %c0_87] : memref<1x16xf32, #tpu.memory_space<vmem>>, vector<1x16xf32>
    %c0_88 = arith.constant 0 : index
    %c0_89 = arith.constant 0 : index
    %62 = vector.load %arg11[%c0_88, %c0_89] : memref<1x32xf32, #tpu.memory_space<vmem>>, vector<1x32xf32>
    %c0_90 = arith.constant 0 : index
    %c0_91 = arith.constant 0 : index
    %63 = vector.load %arg12[%c0_90, %c0_91] : memref<1x32xf32, #tpu.memory_space<vmem>>, vector<1x32xf32>
    %64 = tpu.iota {dimensions = array<i32: 1>} : vector<24x8xi32>
    %c2_i32 = arith.constant 2 : i32
    %65 = vector.broadcast %c2_i32 : i32 to vector<24x8xi32>
    %66 = arith.cmpi slt, %64, %65 : vector<24x8xi32>
    %c6_i32 = arith.constant 6 : i32
    %67 = vector.broadcast %c6_i32 : i32 to vector<24x8xi32>
    %68 = arith.cmpi slt, %64, %67 : vector<24x8xi32>
    %c0_92 = arith.constant 0 : index
    %c0_93 = arith.constant 0 : index
    %c0_94 = arith.constant 0 : index
    %69 = vector.load %arg1[%c0_92, %c0_93, %c0_94] : memref<1x272x3xf32, #tpu.memory_space<vmem>>, vector<1x272x3xf32>
    %70 = vector.shape_cast %69 : vector<1x272x3xf32> to vector<272x3xf32>
    %cst = arith.constant 0.000000e+00 : f32
    %71 = vector.broadcast %cst : f32 to vector<232x10xf32>
    %72 = vector.broadcast %58 : vector<1x10xf32> to vector<232x10xf32>
    %73 = arith.addf %71, %72 : vector<232x10xf32>
    %74 = vector.extract_strided_slice %70 {offsets = [0, 0], sizes = [232, 3], strides = [1, 1]} : vector<272x3xf32> to vector<232x3xf32>
    %cst_95 = arith.constant dense<0.000000e+00> : vector<232x10xf32>
    %75 = tpu.matmul %74, %5, %cst_95 {dimension_numbers = #tpu.dot_dimension_numbers<[1], [0], [0], [1], [0, 0, 1, 1], [], []>} : vector<232x3xf32>, vector<3x10xf32>, vector<232x10xf32> -> vector<232x10xf32>
    %76 = arith.addf %73, %75 : vector<232x10xf32>
    %77 = vector.extract_strided_slice %70 {offsets = [1, 0], sizes = [232, 3], strides = [1, 1]} : vector<272x3xf32> to vector<232x3xf32>
    %cst_96 = arith.constant dense<0.000000e+00> : vector<232x10xf32>
    %78 = tpu.matmul %77, %7, %cst_96 {dimension_numbers = #tpu.dot_dimension_numbers<[1], [0], [0], [1], [0, 0, 1, 1], [], []>} : vector<232x3xf32>, vector<3x10xf32>, vector<232x10xf32> -> vector<232x10xf32>
    %79 = arith.addf %76, %78 : vector<232x10xf32>
    %80 = vector.extract_strided_slice %70 {offsets = [2, 0], sizes = [232, 3], strides = [1, 1]} : vector<272x3xf32> to vector<232x3xf32>
    %cst_97 = arith.constant dense<0.000000e+00> : vector<232x10xf32>
    %81 = tpu.matmul %80, %9, %cst_97 {dimension_numbers = #tpu.dot_dimension_numbers<[1], [0], [0], [1], [0, 0, 1, 1], [], []>} : vector<232x3xf32>, vector<3x10xf32>, vector<232x10xf32> -> vector<232x10xf32>
    %82 = arith.addf %79, %81 : vector<232x10xf32>
    %83 = vector.extract_strided_slice %70 {offsets = [16, 0], sizes = [232, 3], strides = [1, 1]} : vector<272x3xf32> to vector<232x3xf32>
    %cst_98 = arith.constant dense<0.000000e+00> : vector<232x10xf32>
    %84 = tpu.matmul %83, %11, %cst_98 {dimension_numbers = #tpu.dot_dimension_numbers<[1], [0], [0], [1], [0, 0, 1, 1], [], []>} : vector<232x3xf32>, vector<3x10xf32>, vector<232x10xf32> -> vector<232x10xf32>
    %85 = arith.addf %82, %84 : vector<232x10xf32>
    %86 = vector.extract_strided_slice %70 {offsets = [17, 0], sizes = [232, 3], strides = [1, 1]} : vector<272x3xf32> to vector<232x3xf32>
    %cst_99 = arith.constant dense<0.000000e+00> : vector<232x10xf32>
    %87 = tpu.matmul %86, %13, %cst_99 {dimension_numbers = #tpu.dot_dimension_numbers<[1], [0], [0], [1], [0, 0, 1, 1], [], []>} : vector<232x3xf32>, vector<3x10xf32>, vector<232x10xf32> -> vector<232x10xf32>
    %88 = arith.addf %85, %87 : vector<232x10xf32>
    %89 = vector.extract_strided_slice %70 {offsets = [18, 0], sizes = [232, 3], strides = [1, 1]} : vector<272x3xf32> to vector<232x3xf32>
    %cst_100 = arith.constant dense<0.000000e+00> : vector<232x10xf32>
    %90 = tpu.matmul %89, %15, %cst_100 {dimension_numbers = #tpu.dot_dimension_numbers<[1], [0], [0], [1], [0, 0, 1, 1], [], []>} : vector<232x3xf32>, vector<3x10xf32>, vector<232x10xf32> -> vector<232x10xf32>
    %91 = arith.addf %88, %90 : vector<232x10xf32>
    %92 = vector.extract_strided_slice %70 {offsets = [32, 0], sizes = [232, 3], strides = [1, 1]} : vector<272x3xf32> to vector<232x3xf32>
    %cst_101 = arith.constant dense<0.000000e+00> : vector<232x10xf32>
    %93 = tpu.matmul %92, %17, %cst_101 {dimension_numbers = #tpu.dot_dimension_numbers<[1], [0], [0], [1], [0, 0, 1, 1], [], []>} : vector<232x3xf32>, vector<3x10xf32>, vector<232x10xf32> -> vector<232x10xf32>
    %94 = arith.addf %91, %93 : vector<232x10xf32>
    %95 = vector.extract_strided_slice %70 {offsets = [33, 0], sizes = [232, 3], strides = [1, 1]} : vector<272x3xf32> to vector<232x3xf32>
    %cst_102 = arith.constant dense<0.000000e+00> : vector<232x10xf32>
    %96 = tpu.matmul %95, %19, %cst_102 {dimension_numbers = #tpu.dot_dimension_numbers<[1], [0], [0], [1], [0, 0, 1, 1], [], []>} : vector<232x3xf32>, vector<3x10xf32>, vector<232x10xf32> -> vector<232x10xf32>
    %97 = arith.addf %94, %96 : vector<232x10xf32>
    %98 = vector.extract_strided_slice %70 {offsets = [34, 0], sizes = [232, 3], strides = [1, 1]} : vector<272x3xf32> to vector<232x3xf32>
    %cst_103 = arith.constant dense<0.000000e+00> : vector<232x10xf32>
    %99 = tpu.matmul %98, %21, %cst_103 {dimension_numbers = #tpu.dot_dimension_numbers<[1], [0], [0], [1], [0, 0, 1, 1], [], []>} : vector<232x3xf32>, vector<3x10xf32>, vector<232x10xf32> -> vector<232x10xf32>
    %100 = arith.addf %97, %99 : vector<232x10xf32>
    %cst_104 = arith.constant 0.000000e+00 : f32
    %101 = vector.broadcast %cst_104 : f32 to vector<232x10xf32>
    %102 = arith.cmpf oge, %100, %101 : vector<232x10xf32>
    %103 = vector.broadcast %59 : vector<1x10xf32> to vector<232x10xf32>
    %104 = arith.mulf %100, %103 : vector<232x10xf32>
    %105 = arith.select %102, %100, %104 : vector<232x10xi1>, vector<232x10xf32>
    %106 = vector.broadcast %0 : vector<232x1xf32> to vector<232x10xf32>
    %107 = arith.addf %105, %106 : vector<232x10xf32>
    %108 = vector.extract_strided_slice %107 {offsets = [0, 0], sizes = [208, 10], strides = [1, 1]} : vector<232x10xf32> to vector<208x10xf32>
    %109 = vector.extract_strided_slice %107 {offsets = [1, 0], sizes = [208, 10], strides = [1, 1]} : vector<232x10xf32> to vector<208x10xf32>
    %110 = arith.maximumf %108, %109 : vector<208x10xf32>
    %111 = vector.extract_strided_slice %107 {offsets = [16, 0], sizes = [208, 10], strides = [1, 1]} : vector<232x10xf32> to vector<208x10xf32>
    %112 = arith.maximumf %110, %111 : vector<208x10xf32>
    %113 = vector.extract_strided_slice %107 {offsets = [17, 0], sizes = [208, 10], strides = [1, 1]} : vector<232x10xf32> to vector<208x10xf32>
    %114 = arith.maximumf %112, %113 : vector<208x10xf32>
    %cst_105 = arith.constant dense<0.000000e+00> : vector<56x10xf32>
    %115 = tpu.matmul %1, %114, %cst_105 {dimension_numbers = #tpu.dot_dimension_numbers<[1], [0], [0], [1], [0, 0, 1, 1], [], []>} : vector<56x208xf32>, vector<208x10xf32>, vector<56x10xf32> -> vector<56x10xf32>
    %cst_106 = arith.constant 0.000000e+00 : f32
    %116 = vector.broadcast %cst_106 : f32 to vector<40x16xf32>
    %117 = vector.broadcast %60 : vector<1x16xf32> to vector<40x16xf32>
    %118 = arith.addf %116, %117 : vector<40x16xf32>
    %119 = vector.extract_strided_slice %115 {offsets = [0, 0], sizes = [40, 10], strides = [1, 1]} : vector<56x10xf32> to vector<40x10xf32>
    %cst_107 = arith.constant dense<0.000000e+00> : vector<40x16xf32>
    %120 = tpu.matmul %119, %23, %cst_107 {dimension_numbers = #tpu.dot_dimension_numbers<[1], [0], [0], [1], [0, 0, 1, 1], [], []>} : vector<40x10xf32>, vector<10x16xf32>, vector<40x16xf32> -> vector<40x16xf32>
    %121 = arith.addf %118, %120 : vector<40x16xf32>
    %122 = vector.extract_strided_slice %115 {offsets = [1, 0], sizes = [40, 10], strides = [1, 1]} : vector<56x10xf32> to vector<40x10xf32>
    %cst_108 = arith.constant dense<0.000000e+00> : vector<40x16xf32>
    %123 = tpu.matmul %122, %25, %cst_108 {dimension_numbers = #tpu.dot_dimension_numbers<[1], [0], [0], [1], [0, 0, 1, 1], [], []>} : vector<40x10xf32>, vector<10x16xf32>, vector<40x16xf32> -> vector<40x16xf32>
    %124 = arith.addf %121, %123 : vector<40x16xf32>
    %125 = vector.extract_strided_slice %115 {offsets = [2, 0], sizes = [40, 10], strides = [1, 1]} : vector<56x10xf32> to vector<40x10xf32>
    %cst_109 = arith.constant dense<0.000000e+00> : vector<40x16xf32>
    %126 = tpu.matmul %125, %27, %cst_109 {dimension_numbers = #tpu.dot_dimension_numbers<[1], [0], [0], [1], [0, 0, 1, 1], [], []>} : vector<40x10xf32>, vector<10x16xf32>, vector<40x16xf32> -> vector<40x16xf32>
    %127 = arith.addf %124, %126 : vector<40x16xf32>
    %128 = vector.extract_strided_slice %115 {offsets = [7, 0], sizes = [40, 10], strides = [1, 1]} : vector<56x10xf32> to vector<40x10xf32>
    %cst_110 = arith.constant dense<0.000000e+00> : vector<40x16xf32>
    %129 = tpu.matmul %128, %29, %cst_110 {dimension_numbers = #tpu.dot_dimension_numbers<[1], [0], [0], [1], [0, 0, 1, 1], [], []>} : vector<40x10xf32>, vector<10x16xf32>, vector<40x16xf32> -> vector<40x16xf32>
    %130 = arith.addf %127, %129 : vector<40x16xf32>
    %131 = vector.extract_strided_slice %115 {offsets = [8, 0], sizes = [40, 10], strides = [1, 1]} : vector<56x10xf32> to vector<40x10xf32>
    %cst_111 = arith.constant dense<0.000000e+00> : vector<40x16xf32>
    %132 = tpu.matmul %131, %31, %cst_111 {dimension_numbers = #tpu.dot_dimension_numbers<[1], [0], [0], [1], [0, 0, 1, 1], [], []>} : vector<40x10xf32>, vector<10x16xf32>, vector<40x16xf32> -> vector<40x16xf32>
    %133 = arith.addf %130, %132 : vector<40x16xf32>
    %134 = vector.extract_strided_slice %115 {offsets = [9, 0], sizes = [40, 10], strides = [1, 1]} : vector<56x10xf32> to vector<40x10xf32>
    %cst_112 = arith.constant dense<0.000000e+00> : vector<40x16xf32>
    %135 = tpu.matmul %134, %33, %cst_112 {dimension_numbers = #tpu.dot_dimension_numbers<[1], [0], [0], [1], [0, 0, 1, 1], [], []>} : vector<40x10xf32>, vector<10x16xf32>, vector<40x16xf32> -> vector<40x16xf32>
    %136 = arith.addf %133, %135 : vector<40x16xf32>
    %137 = vector.extract_strided_slice %115 {offsets = [14, 0], sizes = [40, 10], strides = [1, 1]} : vector<56x10xf32> to vector<40x10xf32>
    %cst_113 = arith.constant dense<0.000000e+00> : vector<40x16xf32>
    %138 = tpu.matmul %137, %35, %cst_113 {dimension_numbers = #tpu.dot_dimension_numbers<[1], [0], [0], [1], [0, 0, 1, 1], [], []>} : vector<40x10xf32>, vector<10x16xf32>, vector<40x16xf32> -> vector<40x16xf32>
    %139 = arith.addf %136, %138 : vector<40x16xf32>
    %140 = vector.extract_strided_slice %115 {offsets = [15, 0], sizes = [40, 10], strides = [1, 1]} : vector<56x10xf32> to vector<40x10xf32>
    %cst_114 = arith.constant dense<0.000000e+00> : vector<40x16xf32>
    %141 = tpu.matmul %140, %37, %cst_114 {dimension_numbers = #tpu.dot_dimension_numbers<[1], [0], [0], [1], [0, 0, 1, 1], [], []>} : vector<40x10xf32>, vector<10x16xf32>, vector<40x16xf32> -> vector<40x16xf32>
    %142 = arith.addf %139, %141 : vector<40x16xf32>
    %143 = vector.extract_strided_slice %115 {offsets = [16, 0], sizes = [40, 10], strides = [1, 1]} : vector<56x10xf32> to vector<40x10xf32>
    %cst_115 = arith.constant dense<0.000000e+00> : vector<40x16xf32>
    %144 = tpu.matmul %143, %39, %cst_115 {dimension_numbers = #tpu.dot_dimension_numbers<[1], [0], [0], [1], [0, 0, 1, 1], [], []>} : vector<40x10xf32>, vector<10x16xf32>, vector<40x16xf32> -> vector<40x16xf32>
    %145 = arith.addf %142, %144 : vector<40x16xf32>
    %cst_116 = arith.constant 0.000000e+00 : f32
    %146 = vector.broadcast %cst_116 : f32 to vector<40x16xf32>
    %147 = arith.cmpf oge, %145, %146 : vector<40x16xf32>
    %148 = vector.broadcast %61 : vector<1x16xf32> to vector<40x16xf32>
    %149 = arith.mulf %145, %148 : vector<40x16xf32>
    %150 = arith.select %147, %145, %149 : vector<40x16xi1>, vector<40x16xf32>
    %cst_117 = arith.constant 0.000000e+00 : f32
    %151 = vector.broadcast %cst_117 : f32 to vector<24x32xf32>
    %152 = vector.broadcast %62 : vector<1x32xf32> to vector<24x32xf32>
    %153 = arith.addf %151, %152 : vector<24x32xf32>
    %154 = vector.extract_strided_slice %150 {offsets = [0, 0], sizes = [24, 16], strides = [1, 1]} : vector<40x16xf32> to vector<24x16xf32>
    %cst_118 = arith.constant dense<0.000000e+00> : vector<24x32xf32>
    %155 = tpu.matmul %154, %41, %cst_118 {dimension_numbers = #tpu.dot_dimension_numbers<[1], [0], [0], [1], [0, 0, 1, 1], [], []>} : vector<24x16xf32>, vector<16x32xf32>, vector<24x32xf32> -> vector<24x32xf32>
    %156 = arith.addf %153, %155 : vector<24x32xf32>
    %157 = vector.extract_strided_slice %150 {offsets = [1, 0], sizes = [24, 16], strides = [1, 1]} : vector<40x16xf32> to vector<24x16xf32>
    %cst_119 = arith.constant dense<0.000000e+00> : vector<24x32xf32>
    %158 = tpu.matmul %157, %43, %cst_119 {dimension_numbers = #tpu.dot_dimension_numbers<[1], [0], [0], [1], [0, 0, 1, 1], [], []>} : vector<24x16xf32>, vector<16x32xf32>, vector<24x32xf32> -> vector<24x32xf32>
    %159 = arith.addf %156, %158 : vector<24x32xf32>
    %160 = vector.extract_strided_slice %150 {offsets = [2, 0], sizes = [24, 16], strides = [1, 1]} : vector<40x16xf32> to vector<24x16xf32>
    %cst_120 = arith.constant dense<0.000000e+00> : vector<24x32xf32>
    %161 = tpu.matmul %160, %45, %cst_120 {dimension_numbers = #tpu.dot_dimension_numbers<[1], [0], [0], [1], [0, 0, 1, 1], [], []>} : vector<24x16xf32>, vector<16x32xf32>, vector<24x32xf32> -> vector<24x32xf32>
    %162 = arith.addf %159, %161 : vector<24x32xf32>
    %163 = vector.extract_strided_slice %150 {offsets = [7, 0], sizes = [24, 16], strides = [1, 1]} : vector<40x16xf32> to vector<24x16xf32>
    %cst_121 = arith.constant dense<0.000000e+00> : vector<24x32xf32>
    %164 = tpu.matmul %163, %47, %cst_121 {dimension_numbers = #tpu.dot_dimension_numbers<[1], [0], [0], [1], [0, 0, 1, 1], [], []>} : vector<24x16xf32>, vector<16x32xf32>, vector<24x32xf32> -> vector<24x32xf32>
    %165 = arith.addf %162, %164 : vector<24x32xf32>
    %166 = vector.extract_strided_slice %150 {offsets = [8, 0], sizes = [24, 16], strides = [1, 1]} : vector<40x16xf32> to vector<24x16xf32>
    %cst_122 = arith.constant dense<0.000000e+00> : vector<24x32xf32>
    %167 = tpu.matmul %166, %49, %cst_122 {dimension_numbers = #tpu.dot_dimension_numbers<[1], [0], [0], [1], [0, 0, 1, 1], [], []>} : vector<24x16xf32>, vector<16x32xf32>, vector<24x32xf32> -> vector<24x32xf32>
    %168 = arith.addf %165, %167 : vector<24x32xf32>
    %169 = vector.extract_strided_slice %150 {offsets = [9, 0], sizes = [24, 16], strides = [1, 1]} : vector<40x16xf32> to vector<24x16xf32>
    %cst_123 = arith.constant dense<0.000000e+00> : vector<24x32xf32>
    %170 = tpu.matmul %169, %51, %cst_123 {dimension_numbers = #tpu.dot_dimension_numbers<[1], [0], [0], [1], [0, 0, 1, 1], [], []>} : vector<24x16xf32>, vector<16x32xf32>, vector<24x32xf32> -> vector<24x32xf32>
    %171 = arith.addf %168, %170 : vector<24x32xf32>
    %172 = vector.extract_strided_slice %150 {offsets = [14, 0], sizes = [24, 16], strides = [1, 1]} : vector<40x16xf32> to vector<24x16xf32>
    %cst_124 = arith.constant dense<0.000000e+00> : vector<24x32xf32>
    %173 = tpu.matmul %172, %53, %cst_124 {dimension_numbers = #tpu.dot_dimension_numbers<[1], [0], [0], [1], [0, 0, 1, 1], [], []>} : vector<24x16xf32>, vector<16x32xf32>, vector<24x32xf32> -> vector<24x32xf32>
    %174 = arith.addf %171, %173 : vector<24x32xf32>
    %175 = vector.extract_strided_slice %150 {offsets = [15, 0], sizes = [24, 16], strides = [1, 1]} : vector<40x16xf32> to vector<24x16xf32>
    %cst_125 = arith.constant dense<0.000000e+00> : vector<24x32xf32>
    %176 = tpu.matmul %175, %55, %cst_125 {dimension_numbers = #tpu.dot_dimension_numbers<[1], [0], [0], [1], [0, 0, 1, 1], [], []>} : vector<24x16xf32>, vector<16x32xf32>, vector<24x32xf32> -> vector<24x32xf32>
    %177 = arith.addf %174, %176 : vector<24x32xf32>
    %178 = vector.extract_strided_slice %150 {offsets = [16, 0], sizes = [24, 16], strides = [1, 1]} : vector<40x16xf32> to vector<24x16xf32>
    %cst_126 = arith.constant dense<0.000000e+00> : vector<24x32xf32>
    %179 = tpu.matmul %178, %57, %cst_126 {dimension_numbers = #tpu.dot_dimension_numbers<[1], [0], [0], [1], [0, 0, 1, 1], [], []>} : vector<24x16xf32>, vector<16x32xf32>, vector<24x32xf32> -> vector<24x32xf32>
    %180 = arith.addf %177, %179 : vector<24x32xf32>
    %cst_127 = arith.constant 0.000000e+00 : f32
    %181 = vector.broadcast %cst_127 : f32 to vector<24x32xf32>
    %182 = arith.cmpf oge, %180, %181 : vector<24x32xf32>
    %183 = vector.broadcast %63 : vector<1x32xf32> to vector<24x32xf32>
    %184 = arith.mulf %180, %183 : vector<24x32xf32>
    %185 = arith.select %182, %180, %184 : vector<24x32xi1>, vector<24x32xf32>
    %cst_128 = arith.constant dense<0.000000e+00> : vector<24x8xf32>
    %186 = tpu.matmul %185, %2, %cst_128 {dimension_numbers = #tpu.dot_dimension_numbers<[1], [0], [0], [1], [0, 0, 1, 1], [], []>} : vector<24x32xf32>, vector<32x8xf32>, vector<24x8xf32> -> vector<24x8xf32>
    %187 = vector.broadcast %3 : vector<1x8xf32> to vector<24x8xf32>
    %188 = arith.addf %186, %187 : vector<24x8xf32>
    %189 = vector.extract_strided_slice %188 {offsets = [0, 0], sizes = [24, 2], strides = [1, 1]} : vector<24x8xf32> to vector<24x2xf32>
    %cst_129 = arith.constant dense<0xFF800000> : vector<24xf32>
    %190 = vector.multi_reduction <maximumf>, %189, %cst_129 [1] : vector<24x2xf32> to vector<24xf32>
    %191 = vector.shape_cast %190 : vector<24xf32> to vector<24x1xf32>
    %192 = vector.extract_strided_slice %188 {offsets = [0, 0], sizes = [24, 2], strides = [1, 1]} : vector<24x8xf32> to vector<24x2xf32>
    %193 = vector.broadcast %191 : vector<24x1xf32> to vector<24x2xf32>
    %194 = arith.subf %192, %193 : vector<24x2xf32>
    %195 = math.exp %194 : vector<24x2xf32>
    %cst_130 = arith.constant dense<0.000000e+00> : vector<24xf32>
    %196 = vector.multi_reduction <add>, %195, %cst_130 [1] : vector<24x2xf32> to vector<24xf32>
    %197 = vector.shape_cast %196 : vector<24xf32> to vector<24x1xf32>
    %198 = vector.broadcast %191 : vector<24x1xf32> to vector<24x8xf32>
    %199 = arith.subf %188, %198 : vector<24x8xf32>
    %200 = math.exp %199 : vector<24x8xf32>
    %201 = vector.broadcast %197 : vector<24x1xf32> to vector<24x8xf32>
    %202 = arith.divf %200, %201 : vector<24x8xf32>
    %203 = arith.select %66, %202, %188 : vector<24x8xi1>, vector<24x8xf32>
    %cst_131 = arith.constant 0.000000e+00 : f32
    %204 = vector.broadcast %cst_131 : f32 to vector<24x8xf32>
    %205 = arith.select %68, %203, %204 : vector<24x8xi1>, vector<24x8xf32>
    %c0_132 = arith.constant 0 : index
    %c0_133 = arith.constant 0 : index
    %c0_134 = arith.constant 0 : index
    %206 = vector.load %arg15[%c0_132, %c0_133, %c0_134] : memref<1x24x8xf32, #tpu.memory_space<vmem>>, vector<1x24x8xf32>
    %207 = vector.shape_cast %206 : vector<1x24x8xf32> to vector<24x8xf32>
    %208 = vector.shape_cast %205 : vector<24x8xf32> to vector<1x24x8xf32>
    tpu.vector_store %arg15[%c0_132, %c0_133, %c0_134], %208 {strides = array<i32>} : memref<1x24x8xf32, #tpu.memory_space<vmem>>, vector<1x24x8xf32>,
    return
  }
  func.func @transform_0(%arg0: i32) -> (i32, i32, i32) {
    %c0_i32 = arith.constant 0 : i32
    %c0_i32_0 = arith.constant 0 : i32
    %c0_i32_1 = arith.constant 0 : i32
    return %arg0, %c0_i32, %c0_i32_0 : i32, i32, i32
  }
  func.func @transform_1(%arg0: i32) -> (i32, i32) {
    %c0_i32 = arith.constant 0 : i32
    %c0_i32_0 = arith.constant 0 : i32
    %c0_i32_1 = arith.constant 0 : i32
    return %c0_i32, %c0_i32_0 : i32, i32
  }
  func.func @transform_2(%arg0: i32) -> (i32, i32) {
    %c0_i32 = arith.constant 0 : i32
    %c0_i32_0 = arith.constant 0 : i32
    %c0_i32_1 = arith.constant 0 : i32
    return %c0_i32, %c0_i32_0 : i32, i32
  }
  func.func @transform_3(%arg0: i32) -> (i32, i32, i32) {
    %c0_i32 = arith.constant 0 : i32
    %c0_i32_0 = arith.constant 0 : i32
    %c0_i32_1 = arith.constant 0 : i32
    %c0_i32_2 = arith.constant 0 : i32
    return %c0_i32, %c0_i32_0, %c0_i32_1 : i32, i32, i32
  }
  func.func @transform_4(%arg0: i32) -> (i32, i32) {
    %c0_i32 = arith.constant 0 : i32
    %c0_i32_0 = arith.constant 0 : i32
    %c0_i32_1 = arith.constant 0 : i32
    return %c0_i32, %c0_i32_0 : i32, i32
  }
  func.func @transform_5(%arg0: i32) -> (i32, i32) {
    %c0_i32 = arith.constant 0 : i32
    %c0_i32_0 = arith.constant 0 : i32
    %c0_i32_1 = arith.constant 0 : i32
    return %c0_i32, %c0_i32_0 : i32, i32
  }
  func.func @transform_6(%arg0: i32) -> (i32, i32, i32) {
    %c0_i32 = arith.constant 0 : i32
    %c0_i32_0 = arith.constant 0 : i32
    %c0_i32_1 = arith.constant 0 : i32
    %c0_i32_2 = arith.constant 0 : i32
    return %c0_i32, %c0_i32_0, %c0_i32_1 : i32, i32, i32
  }
  func.func @transform_7(%arg0: i32) -> (i32, i32) {
    %c0_i32 = arith.constant 0 : i32
    %c0_i32_0 = arith.constant 0 : i32
    %c0_i32_1 = arith.constant 0 : i32
    return %c0_i32, %c0_i32_0 : i32, i32
  }
  func.func @transform_8(%arg0: i32) -> (i32, i32) {
    %c0_i32 = arith.constant 0 : i32
    %c0_i32_0 = arith.constant 0 : i32
    %c0_i32_1 = arith.constant 0 : i32
    return %c0_i32, %c0_i32_0 : i32, i32
  }
  func.func @transform_9(%arg0: i32) -> (i32, i32, i32) {
    %c0_i32 = arith.constant 0 : i32
    %c0_i32_0 = arith.constant 0 : i32
    %c0_i32_1 = arith.constant 0 : i32
    %c0_i32_2 = arith.constant 0 : i32
    return %c0_i32, %c0_i32_0, %c0_i32_1 : i32, i32, i32
  }
  func.func @transform_10(%arg0: i32) -> (i32, i32) {
    %c0_i32 = arith.constant 0 : i32
    %c0_i32_0 = arith.constant 0 : i32
    %c0_i32_1 = arith.constant 0 : i32
    return %c0_i32, %c0_i32_0 : i32, i32
  }
  func.func @transform_11(%arg0: i32) -> (i32, i32) {
    %c0_i32 = arith.constant 0 : i32
    %c0_i32_0 = arith.constant 0 : i32
    %c0_i32_1 = arith.constant 0 : i32
    return %c0_i32, %c0_i32_0 : i32, i32
  }
  func.func @transform_12(%arg0: i32) -> (i32, i32) {
    %c0_i32 = arith.constant 0 : i32
    %c0_i32_0 = arith.constant 0 : i32
    %c0_i32_1 = arith.constant 0 : i32
    return %c0_i32, %c0_i32_0 : i32, i32
  }
  func.func @transform_13(%arg0: i32) -> (i32, i32) {
    %c0_i32 = arith.constant 0 : i32
    %c0_i32_0 = arith.constant 0 : i32
    %c0_i32_1 = arith.constant 0 : i32
    return %c0_i32, %c0_i32_0 : i32, i32
  }
  func.func @transform_14(%arg0: i32) -> (i32, i32, i32) {
    %c0_i32 = arith.constant 0 : i32
    %c0_i32_0 = arith.constant 0 : i32
    %c0_i32_1 = arith.constant 0 : i32
    return %arg0, %c0_i32, %c0_i32_0 : i32, i32, i32
  }
}

</mosaic_0001>

<bundles_post_ra>
// kernel: tpu_custom_call.1
= control target key start
LH: loop header
LB: loop body
LE: loop exit
PB: predicated region body
PF: predicated region fallthrough
CT: control target
= control target key end

     0   :  { %s8564_s29 = smov 0   ;;  %s10955_s0 = inlined_call_operand.vmem [shape: f32[2,272,3], index: 0, kind: input, shape index: {}]   ;;  %s10956_s1 = inlined_call_operand.vmem [shape: f32[232,1], index: 1, kind: input, shape index: {}]   ;;  %s10957_s2 = inlined_call_operand.vmem [shape: f32[56,208], index: 2, kind: input, shape index: {}]   ;;  %s10958_s3 = inlined_call_operand.vmem [shape: f32[9,3,10], index: 3, kind: input, shape index: {}]   ;;  %s10959_s4 = inlined_call_operand.vmem [shape: f32[1,10], index: 4, kind: input, shape index: {}]   ;;  %s10960_s5 = inlined_call_operand.vmem [shape: f32[1,10], index: 5, kind: input, shape index: {}]   ;;  %s10961_s6 = inlined_call_operand.vmem [shape: f32[9,10,16], index: 6, kind: input, shape index: {}]   ;;  %s10962_s7 = inlined_call_operand.vmem [shape: f32[1,16], index: 7, kind: input, shape index: {}]   ;;  %s10963_s8 = inlined_call_operand.vmem [shape: f32[1,16], index: 8, kind: input, shape index: {}]   ;;  %s10964_s9 = inlined_call_operand.vmem [shape: f32[9,16,32], index: 9, kind: input, shape index: {}]   ;;  %s10965_s10 = inlined_call_operand.vmem [shape: f32[1,32], index: 10, kind: input, shape index: {}]   ;;  %s10966_s11 = inlined_call_operand.vmem [shape: f32[1,32], index: 11, kind: input, shape index: {}]   ;;  %s10967_s12 = inlined_call_operand.vmem [shape: f32[32,8], index: 12, kind: input, shape index: {}]   ;;  %s10968_s13 = inlined_call_operand.vmem [shape: f32[1,8], index: 13, kind: input, shape index: {}]   ;;  %s10969_s14 = inlined_call_operand.vmem [shape: f32[2,24,8], index: 14, kind: output, shape index: {}]  }
   0x1 LB: > { %s5831_s30 = sadd.s32 4294967295, %s8482_s29   ;;  %p5835_p0 = scmp.ge.s32.totalorder %s8482_s29, 1  ;;  %s8482_s29 = sphi %s8564_s29, %s24_s29  }
   0x2   : > { %p412_p1 = scmp.lt.s32.totalorder %s8482_s29, 3 }
   0x4   : > { %p413_p2 = pnand %p5835_p0, %p412_p1 }
   0x6   : > { %416 = sbr.rel (%p413_p2) target bundleno = 2382 (0x94e), region = 76 }
   0xd   : > { %v5840_v0 = vld [vmem:[%s10958_s3 + $0xc] sm:$0x7]  ;;  %vm724_vm0 = vcmask 1042432   ;;  %p458_p3 = scmp.lt.s32.totalorder %s5831_s30, 1  ;;  %v8484_v1 = vmov 0.0   ;;  %vm8485_vm1 = vmmov 0  }
   0xe   : > { %6900 = vmatprep.subr.mxu0 %v8484_v1  ;;  %6902 = vmatprep.mubr.msk.f32.mxu0 %vm8485_vm1, %v8484_v1  ;;  %v516_v2 = vld [vmem:[%s10958_s3] sm:$0x7]  ;;  %vm636_vm2 = vcmask 23552   ;;  %v5841_v3 = vld [vmem:[%s10958_s3 + $0x10] sm:$0x7]  ;;  %vm968_vm3 = vcmask 1046528  }
   0xf   : > { %6901 = vmatpush3.msk.msra.mxu0 %vm724_vm0, %v5840_v0  ;;  %s11045_s30 = smov (!%p458_p3, %s5831_s30), 1  ;;  %6633 = vmatprep.subr.mxu1 %v8484_v1  ;;  %v5838_v37 = vld [vmem:[%s10958_s3 + $0x4] sm:$0x7]  ;;  %vm1328_vm4 = vcmask 1045504   ;;  %v5842_v47 = vld [vmem:[%s10958_s3 + $0x14] sm:$0x7] }
  0x10   : > { %6989 = vmatprep.subr.mxu0 %v8484_v1  ;;  %6634 = vmatpush3.msk.msra.mxu1 %vm724_vm0, %v516_v2  ;;  %s8447_s19 = smul.u32 272, %s11045_s30  ;;  %vm3643_vm5 = vcmask 654336  }
  0x11   : > { %6635 = vmatprep.mubr.msk.f32.mxu1 %vm8485_vm1, %v8484_v1  ;;  %6722 = vmatprep.subr.mxu1 %v8484_v1  ;;  %s8448_s26 = smul.u32 24, %s11045_s30 }
  0x12   : > { %s8594_s22 = scalar_lea.vmem %s10955_s0, %s8447_s19 }
  0x13   : > { %v8600_v4 = vld [vmem:[%s8594_s22 + $0x10] sm:$0xff]  ;;  %v8603_v5 = vld [vmem:[%s8594_s22 + $0x18] sm:$0xff]  ;;  %v8625_v9 = vld [vmem:[%s8594_s22 + $0x20] sm:$0xff]  ;;  %s467_s15 = scalar_lea.vmem %s10969_s14, %s8448_s26 }
  0x14   : > { %v972_v6 = vrot.slane %v8600_v4, 1  ;;  %6903 = vmatmul.mubr.msk.f32.vlgmr.msra.gmra.mrb[0].mxu0 %vm636_vm2, %v8600_v4  ;;  %v974_v7 = vrot.slane %v8603_v5, 1  ;;  %v8632_v10 = vld [vmem:[%s8594_s22 + $0x28] sm:$0xff]  ;;  %v8635_v11 = vld [vmem:[%s8594_s22] sm:$0xff]  ;;  %v8649_v13 = vld [vmem:[%s8594_s22 + $0x30] sm:$0xff]  ;;  %v10971_v38 = vrot.slane %v8600_v4, 2 }
  0x15   : > { %6905 = vmatprep.mubr.msk.f32.mxu0 %vm8485_vm1, %v8484_v1  ;;  %6990 = vmatpush3.msk.msra.mxu0 %vm724_vm0, %v5841_v3  ;;  %v8642_v12 = vld [vmem:[%s8594_s22 + $0x8] sm:$0xff]  ;;  %v8660_v14 = vld [vmem:[%s8594_s22 + $0x38] sm:$0xff]  ;;  %v8671_v15 = vld [vmem:[%s8594_s22 + $0x40] sm:$0xff]  ;;  %v969_v34 = vrot.slane %v8635_v11, 1  ;;  %v10970_v39 = vrot.slane %v8603_v5, 2  ;;  %v976_v46 = vrot.slane %v8625_v9, 1 }
  0x16   : > { %v8617_v8 = vsel %vm968_vm3, %v972_v6, %v974_v7  ;;  %7078 = vmatprep.subr.mxu0 %v8484_v1  ;;  %6636 = vmatmul.mubr.msk.f32.vlgmr.msra.gmra.mrb[0].mxu1 %vm636_vm2, %v8635_v11  ;;  %v8682_v16 = vld [vmem:[%s8594_s22 + $0x48] sm:$0xff]  ;;  %v8693_v17 = vld [vmem:[%s8594_s22 + $0x50] sm:$0xff]  ;;  %v8704_v18 = vld [vmem:[%s8594_s22 + $0x58] sm:$0xff]  ;;  %v970_v35 = vrot.slane %v8642_v12, 1  ;;  %v978_v49 = vrot.slane %v8632_v10, 1  ;;  %v980_v51 = vrot.slane %v8649_v13, 1 }
  0x17   : > { %6638 = vmatprep.mubr.msk.f32.mxu1 %vm8485_vm1, %v8484_v1  ;;  %v8715_v19 = vld [vmem:[%s8594_s22 + $0x60] sm:$0xff]  ;;  %v8726_v20 = vld [vmem:[%s8594_s22 + $0x68] sm:$0xff]  ;;  %v8737_v21 = vld [vmem:[%s8594_s22 + $0x70] sm:$0xff]  ;;  %6723 = vmatpush3.msk.msra.mxu1 %vm724_vm0, %v5838_v37  ;;  %v8910_v42 = vsel %vm1328_vm4, %v10971_v38, %v10970_v39  ;;  %v977_v48 = vsel %vm968_vm3, %v974_v7, %v976_v46  ;;  %v982_v53 = vrot.slane %v8660_v14, 1  ;;  %v984_v55 = vrot.slane %v8671_v15, 1 }
  0x18   : > { %6906 = vmatmul.mubr.msk.f32.gmra.mrb[2].mxu0 %vm636_vm2, %v8603_v5  ;;  %v8748_v22 = vld [vmem:[%s8594_s22 + $0x78] sm:$0xff]  ;;  %v8759_v23 = vld [vmem:[%s8594_s22 + $0x80] sm:$0xff]  ;;  %v8770_v24 = vld [vmem:[%s8594_s22 + $0x88] sm:$0xff]  ;;  %v971_v40 = vsel %vm968_vm3, %v969_v34, %v970_v35  ;;  %6811 = vmatprep.subr.mxu1 %v8484_v1  ;;  %v973_v43 = vsel %vm968_vm3, %v970_v35, %v972_v6  ;;  %v8969_v50 = vsel %vm968_vm3, %v976_v46, %v978_v49  ;;  %v986_v57 = vrot.slane %v8682_v16, 1 }
  0x19   : > { %6908 = vmatprep.mubr.msk.f32.mxu0 %vm8485_vm1, %v8484_v1  ;;  %v8781_v25 = vld [vmem:[%s8594_s22 + $0x90] sm:$0xff]  ;;  %v8792_v26 = vld [vmem:[%s8594_s22 + $0x98] sm:$0xff]  ;;  %v8803_v27 = vld [vmem:[%s8594_s22 + $0xa0] sm:$0xff]  ;;  %v8981_v52 = vsel %vm968_vm3, %v978_v49, %v980_v51  ;;  %v8992_v54 = vsel %vm968_vm3, %v980_v51, %v982_v53  ;;  %v9003_v56 = vsel %vm968_vm3, %v982_v53, %v984_v55  ;;  %v988_v59 = vrot.slane %v8693_v17, 1 }
  0x1a   : > { %6639 = vmatmul.mubr.msk.f32.gmra.mrb[2].mxu1 %vm636_vm2, %v8642_v12  ;;  %v8814_v28 = vld [vmem:[%s8594_s22 + $0xa8] sm:$0xff]  ;;  %v8825_v29 = vld [vmem:[%s8594_s22 + $0xb0] sm:$0xff]  ;;  %v8836_v30 = vld [vmem:[%s8594_s22 + $0xb8] sm:$0xff]  ;;  %v9015_v58 = vsel %vm968_vm3, %v984_v55, %v986_v57  ;;  %v990_v61 = vrot.slane %v8704_v18, 1  ;;  %v992_v63 = vrot.slane %v8715_v19, 1  ;;  %v994_v2 = vrot.slane %v8726_v20, 1 }
  0x1b   : > { %6641 = vmatprep.mubr.msk.f32.mxu1 %vm8485_vm1, %v8484_v1  ;;  %v8847_v31 = vld [vmem:[%s8594_s22 + $0xc0] sm:$0xff]  ;;  %v8858_v32 = vld [vmem:[%s8594_s22 + $0xc8] sm:$0xff]  ;;  %v8869_v33 = vld [vmem:[%s8594_s22 + $0xd0] sm:$0xff]  ;;  %v9026_v60 = vsel %vm968_vm3, %v986_v57, %v988_v59  ;;  %v996_v6 = vrot.slane %v8737_v21, 1  ;;  %v1000_v35 = vrot.slane %v8759_v23, 1  ;;  %v1004_v46 = vrot.slane %v8781_v25, 1 }
  0x1c   : > { %6909 = vmatmul.mubr.msk.f32.gmra.mrb[4].mxu0 %vm636_vm2, %v8625_v9  ;;  %v8882_v36 = vld [vmem:[%s8594_s22 + $0xd8] sm:$0xff]  ;;  %v8901_v41 = vld [vmem:[%s8594_s22 + $0xe0] sm:$0xff]  ;;  %v8922_v44 = vld [vmem:[%s8594_s22 + $0xe8] sm:$0xff]  ;;  %v9038_v62 = vsel %vm968_vm3, %v988_v59, %v990_v61  ;;  %v9050_v0 = vsel %vm968_vm3, %v990_v61, %v992_v63  ;;  %v9062_v3 = vsel %vm968_vm3, %v992_v63, %v994_v2  ;;  %v1008_v51 = vrot.slane %v8803_v27, 1 }
  0x1d   : > { %6911 = vmatprep.mubr.msk.f32.mxu0 %vm8485_vm1, %v8484_v1  ;;  %v8933_v45 = vld [vmem:[%s8594_s22 + $0xf0] sm:$0xff]  ;;  %v9074_v7 = vsel %vm968_vm3, %v994_v2, %v996_v6  ;;  %v1010_v55 = vrot.slane %v8814_v28, 1  ;;  %v1012_v59 = vrot.slane %v8825_v29, 1  ;;  %v1014_v63 = vrot.slane %v8836_v30, 1  ;;  %v5839_v39 = vld [vmem:[%s10958_s3 + $0x8] sm:$0x7] }
  0x1e   : > { %6642 = vmatmul.mubr.msk.f32.gmra.mrb[4].mxu1 %vm636_vm2, %v8600_v4  ;;  %v9265_v38 = vld [vmem:[%s8594_s22 + $0xf8] sm:$0xff] }
  0x1f   : > { %6644 = vmatprep.mubr.msk.f32.mxu1 %vm8485_vm1, %v8484_v1  ;;  %v9158_v57 = vsel %vm968_vm3, %v1008_v51, %v1010_v55  ;;  %v9170_v61 = vsel %vm968_vm3, %v1010_v55, %v1012_v59  ;;  %v9182_v2 = vsel %vm968_vm3, %v1012_v59, %v1014_v63  ;;  %v1024_v59 = vrot.slane %v8901_v41, 1 }
  0x20   : > { %6912 = vmatmul.mubr.msk.f32.gmra.mrb[6].mxu0 %vm636_vm2, %v8632_v10  ;;  %10995 = vst [vmem:[#allocation2_spill] sm:$0xff] %v9182_v2 }
  0x21   : > { %6914 = vmatprep.mubr.msk.f32.mxu0 %vm8485_vm1, %v8484_v1 }
  0x22   : > { %6645 = vmatmul.mubr.msk.f32.gmra.mrb[6].mxu1 %vm636_vm2, %v8603_v5 }
  0x23   : > { %6647 = vmatprep.mubr.msk.f32.mxu1 %vm8485_vm1, %v8484_v1 }
  0x24   : > { %6915 = vmatmul.mubr.msk.f32.gmra.mrb[8].mxu0 %vm636_vm2, %v8649_v13 }
  0x25   : > { %6917 = vmatprep.mubr.msk.f32.mxu0 %vm8485_vm1, %v8484_v1 }
  0x26   : > { %6648 = vmatmul.mubr.msk.f32.gmra.mrb[8].mxu1 %vm636_vm2, %v8625_v9 }
  0x27   : > { %6650 = vmatprep.mubr.msk.f32.mxu1 %vm8485_vm1, %v8484_v1 }
  0x28   : > { %6918 = vmatmul.mubr.msk.f32.gmra.mrb[10].mxu0 %vm636_vm2, %v8660_v14 }
  0x29   : > { %6920 = vmatprep.mubr.msk.f32.mxu0 %vm8485_vm1, %v8484_v1 }
  0x2a   : > { %6651 = vmatmul.mubr.msk.f32.gmra.mrb[10].mxu1 %vm636_vm2, %v8632_v10 }
  0x2b   : > { %6653 = vmatprep.mubr.msk.f32.mxu1 %vm8485_vm1, %v8484_v1 }
  0x2c   : > { %6921 = vmatmul.mubr.msk.f32.gmra.mrb[12].mxu0 %vm636_vm2, %v8671_v15 }
  0x2d   : > { %6923 = vmatprep.mubr.msk.f32.mxu0 %vm8485_vm1, %v8484_v1 }
  0x2e   : > { %6654 = vmatmul.mubr.msk.f32.gmra.mrb[12].mxu1 %vm636_vm2, %v8649_v13 }
  0x2f   : > { %6656 = vmatprep.mubr.msk.f32.mxu1 %vm8485_vm1, %v8484_v1 }
  0x30   : > { %6924 = vmatmul.mubr.msk.f32.gmra.mrb[14].mxu0 %vm636_vm2, %v8682_v16 }
  0x31   : > { %6926 = vmatprep.mubr.msk.f32.mxu0 %vm8485_vm1, %v8484_v1 }
  0x32   : > { %6657 = vmatmul.mubr.msk.f32.gmra.mrb[14].mxu1 %vm636_vm2, %v8660_v14 }
  0x33   : > { %6659 = vmatprep.mubr.msk.f32.mxu1 %vm8485_vm1, %v8484_v1 }
  0x34   : > { %6927 = vmatmul.mubr.msk.f32.gmra.mrb[16].mxu0 %vm636_vm2, %v8693_v17 }
  0x35   : > { %6929 = vmatprep.mubr.msk.f32.mxu0 %vm8485_vm1, %v8484_v1 }
  0x36   : > { %6660 = vmatmul.mubr.msk.f32.gmra.mrb[16].mxu1 %vm636_vm2, %v8671_v15 }
  0x37   : > { %6662 = vmatprep.mubr.msk.f32.mxu1 %vm8485_vm1, %v8484_v1 }
  0x38   : > { %6930 = vmatmul.mubr.msk.f32.gmra.mrb[18].mxu0 %vm636_vm2, %v8704_v18 }
  0x39   : > { %6932 = vmatprep.mubr.msk.f32.mxu0 %vm8485_vm1, %v8484_v1 }
  0x3a   : > { %6663 = vmatmul.mubr.msk.f32.gmra.mrb[18].mxu1 %vm636_vm2, %v8682_v16 }
  0x3b   : > { %6665 = vmatprep.mubr.msk.f32.mxu1 %vm8485_vm1, %v8484_v1 }
  0x3c   : > { %6933 = vmatmul.mubr.msk.f32.gmra.mrb[20].mxu0 %vm636_vm2, %v8715_v19 }
  0x3d   : > { %6935 = vmatprep.mubr.msk.f32.mxu0 %vm8485_vm1, %v8484_v1 }
  0x3e   : > { %6666 = vmatmul.mubr.msk.f32.gmra.mrb[20].mxu1 %vm636_vm2, %v8693_v17 }
  0x3f   : > { %6668 = vmatprep.mubr.msk.f32.mxu1 %vm8485_vm1, %v8484_v1 }
  0x40   : > { %6936 = vmatmul.mubr.msk.f32.gmra.mrb[22].mxu0 %vm636_vm2, %v8726_v20 }
  0x41   : > { %6938 = vmatprep.mubr.msk.f32.mxu0 %vm8485_vm1, %v8484_v1 }
  0x42   : > { %6669 = vmatmul.mubr.msk.f32.gmra.mrb[22].mxu1 %vm636_vm2, %v8704_v18 }
  0x43   : > { %6671 = vmatprep.mubr.msk.f32.mxu1 %vm8485_vm1, %v8484_v1 }
  0x44   : > { %6939 = vmatmul.mubr.msk.f32.gmra.mrb[24].mxu0 %vm636_vm2, %v8737_v21 }
  0x45   : > { %6941 = vmatprep.mubr.msk.f32.mxu0 %vm8485_vm1, %v8484_v1 }
  0x46   : > { %6672 = vmatmul.mubr.msk.f32.gmra.mrb[24].mxu1 %vm636_vm2, %v8715_v19 }
  0x47   : > { %6674 = vmatprep.mubr.msk.f32.mxu1 %vm8485_vm1, %v8484_v1 }
  0x48   : > { %6942 = vmatmul.mubr.msk.f32.gmra.mrb[26].mxu0 %vm636_vm2, %v8748_v22 }
  0x49   : > { %6944 = vmatprep.mubr.msk.f32.mxu0 %vm8485_vm1, %v8484_v1 }
  0x4a   : > { %6675 = vmatmul.mubr.msk.f32.gmra.mrb[26].mxu1 %vm636_vm2, %v8726_v20 }
  0x4b   : > { %6677 = vmatprep.mubr.msk.f32.mxu1 %vm8485_vm1, %v8484_v1 }
  0x4c   : > { %6945 = vmatmul.mubr.msk.f32.gmra.mrb[28].mxu0 %vm636_vm2, %v8759_v23 }
  0x4d   : > { %6947 = vmatprep.mubr.msk.f32.mxu0 %vm8485_vm1, %v8484_v1 }
  0x4e   : > { %6678 = vmatmul.mubr.msk.f32.gmra.mrb[28].mxu1 %vm636_vm2, %v8737_v21 }
  0x4f   : > { %6680 = vmatprep.mubr.msk.f32.mxu1 %vm8485_vm1, %v8484_v1 }
  0x50   : > { %6948 = vmatmul.mubr.msk.f32.gmra.mrb[30].mxu0 %vm636_vm2, %v8770_v24 }
  0x51   : > { %6950 = vmatprep.mubr.msk.f32.mxu0 %vm8485_vm1, %v8484_v1 }
  0x52   : > { %6681 = vmatmul.mubr.msk.f32.gmra.mrb[30].mxu1 %vm636_vm2, %v8748_v22 }
  0x53   : > { %6683 = vmatprep.mubr.msk.f32.mxu1 %vm8485_vm1, %v8484_v1 }
  0x54   : > { %6951 = vmatmul.mubr.msk.f32.gmra.mrb[32].mxu0 %vm636_vm2, %v8781_v25 }
  0x55   : > { %6953 = vmatprep.mubr.msk.f32.mxu0 %vm8485_vm1, %v8484_v1 }
  0x56   : > { %6684 = vmatmul.mubr.msk.f32.gmra.mrb[32].mxu1 %vm636_vm2, %v8759_v23 }
  0x57   : > { %6686 = vmatprep.mubr.msk.f32.mxu1 %vm8485_vm1, %v8484_v1 }
  0x58   : > { %6954 = vmatmul.mubr.msk.f32.gmra.mrb[34].mxu0 %vm636_vm2, %v8792_v26 }
  0x59   : > { %6956 = vmatprep.mubr.msk.f32.mxu0 %vm8485_vm1, %v8484_v1 }
  0x5a   : > { %6687 = vmatmul.mubr.msk.f32.gmra.mrb[34].mxu1 %vm636_vm2, %v8770_v24 }
  0x5b   : > { %6689 = vmatprep.mubr.msk.f32.mxu1 %vm8485_vm1, %v8484_v1 }
  0x5c   : > { %6957 = vmatmul.mubr.msk.f32.gmra.mrb[36].mxu0 %vm636_vm2, %v8803_v27 }
  0x5d   : > { %6959 = vmatprep.mubr.msk.f32.mxu0 %vm8485_vm1, %v8484_v1 }
  0x5e   : > { %6690 = vmatmul.mubr.msk.f32.gmra.mrb[36].mxu1 %vm636_vm2, %v8781_v25 }
  0x5f   : > { %6692 = vmatprep.mubr.msk.f32.mxu1 %vm8485_vm1, %v8484_v1 }
  0x60   : > { %6960 = vmatmul.mubr.msk.f32.gmra.mrb[38].mxu0 %vm636_vm2, %v8814_v28 }
  0x61   : > { %6962 = vmatprep.mubr.msk.f32.mxu0 %vm8485_vm1, %v8484_v1 }
  0x62   : > { %6693 = vmatmul.mubr.msk.f32.gmra.mrb[38].mxu1 %vm636_vm2, %v8792_v26 }
  0x63   : > { %6695 = vmatprep.mubr.msk.f32.mxu1 %vm8485_vm1, %v8484_v1 }
  0x64   : > { %6963 = vmatmul.mubr.msk.f32.gmra.mrb[40].mxu0 %vm636_vm2, %v8825_v29 }
  0x65   : > { %6965 = vmatprep.mubr.msk.f32.mxu0 %vm8485_vm1, %v8484_v1 }
  0x66   : > { %6696 = vmatmul.mubr.msk.f32.gmra.mrb[40].mxu1 %vm636_vm2, %v8803_v27 }
  0x67   : > { %6698 = vmatprep.mubr.msk.f32.mxu1 %vm8485_vm1, %v8484_v1 }
  0x68   : > { %6966 = vmatmul.mubr.msk.f32.gmra.mrb[42].mxu0 %vm636_vm2, %v8836_v30 }
  0x69   : > { %6968 = vmatprep.mubr.msk.f32.mxu0 %vm8485_vm1, %v8484_v1 }
  0x6a   : > { %6699 = vmatmul.mubr.msk.f32.gmra.mrb[42].mxu1 %vm636_vm2, %v8814_v28 }
  0x6b   : > { %6701 = vmatprep.mubr.msk.f32.mxu1 %vm8485_vm1, %v8484_v1 }
  0x6c   : > { %6969 = vmatmul.mubr.msk.f32.gmra.mrb[44].mxu0 %vm636_vm2, %v8847_v31 }
  0x6d   : > { %6971 = vmatprep.mubr.msk.f32.mxu0 %vm8485_vm1, %v8484_v1 }
  0x6e   : > { %6702 = vmatmul.mubr.msk.f32.gmra.mrb[44].mxu1 %vm636_vm2, %v8825_v29 }
  0x6f   : > { %6704 = vmatprep.mubr.msk.f32.mxu1 %vm8485_vm1, %v8484_v1 }
  0x70   : > { %6972 = vmatmul.mubr.msk.f32.gmra.mrb[46].mxu0 %vm636_vm2, %v8858_v32 }
  0x71   : > { %6974 = vmatprep.mubr.msk.f32.mxu0 %vm8485_vm1, %v8484_v1 }
  0x72   : > { %6705 = vmatmul.mubr.msk.f32.gmra.mrb[46].mxu1 %vm636_vm2, %v8836_v30 }
  0x73   : > { %6707 = vmatprep.mubr.msk.f32.mxu1 %vm8485_vm1, %v8484_v1 }
  0x74   : > { %6975 = vmatmul.mubr.msk.f32.gmra.mrb[48].mxu0 %vm636_vm2, %v8869_v33 }
  0x75   : > { %6977 = vmatprep.mubr.msk.f32.mxu0 %vm8485_vm1, %v8484_v1 }
  0x76   : > { %6708 = vmatmul.mubr.msk.f32.gmra.mrb[48].mxu1 %vm636_vm2, %v8847_v31 }
  0x77   : > { %6710 = vmatprep.mubr.msk.f32.mxu1 %vm8485_vm1, %v8484_v1 }
  0x78   : > { %6978 = vmatmul.mubr.msk.f32.gmra.mrb[50].mxu0 %vm636_vm2, %v8882_v36 }
  0x79   : > { %6980 = vmatprep.mubr.msk.f32.mxu0 %vm8485_vm1, %v8484_v1 }
  0x7a   : > { %6711 = vmatmul.mubr.msk.f32.gmra.mrb[50].mxu1 %vm636_vm2, %v8858_v32 }
  0x7b   : > { %6713 = vmatprep.mubr.msk.f32.mxu1 %vm8485_vm1, %v8484_v1 }
  0x7c   : > { %6981 = vmatmul.mubr.msk.f32.gmra.mrb[52].mxu0 %vm636_vm2, %v8901_v41 }
  0x7d   : > { %6983 = vmatprep.mubr.msk.f32.mxu0 %vm8485_vm1, %v8484_v1 }
  0x7e   : > { %6714 = vmatmul.mubr.msk.f32.gmra.mrb[52].mxu1 %vm636_vm2, %v8869_v33 }
  0x7f   : > { %6716 = vmatprep.mubr.msk.f32.mxu1 %vm8485_vm1, %v8484_v1 }
  0x80   : > { %6984 = vmatmul.mubr.msk.f32.gmra.mrb[54].mxu0 %vm636_vm2, %v8922_v44 }
  0x81   : > { %6986 = vmatprep.mubr.msk.f32.mxu0 %vm8485_vm1, %v8484_v1 }
  0x82   : > { %6717 = vmatmul.mubr.msk.f32.gmra.mrb[54].mxu1 %vm636_vm2, %v8882_v36 }
  0x83   : > { %6719 = vmatprep.mubr.msk.f32.mxu1 %vm8485_vm1, %v8484_v1 }
  0x84   : > { %6987 = vmatmul.mubr.msk.f32.gmra.mrb[56].mxu0 %vm636_vm2, %v8933_v45 }
  0x85   : > { %6991 = vmatprep.mubr.msk.f32.mxu0 %vm8485_vm1, %v8484_v1 }
  0x86   : > { %6720 = vmatmul.mubr.msk.f32.gmra.mrb[56].mxu1 %vm636_vm2, %v8901_v41 }
  0x87   : > { %6724 = vmatprep.mubr.msk.f32.mxu1 %vm8485_vm1, %v8484_v1 }
  0x88   : > { %6992 = vmatmul.mubr.msk.f32.vlgmr.msra.gmra.mrb[0].mxu0 %vm636_vm2, %v8617_v8 }
  0x89   : > { %6994 = vmatprep.mubr.msk.f32.mxu0 %vm8485_vm1, %v8484_v1  ;;  %7079 = vmatpush3.msk.msra.mxu0 %vm724_vm0, %v5842_v47 }
  0x8a   : > { %7167 = vmatprep.subr.mxu0 %v8484_v1  ;;  %6725 = vmatmul.mubr.msk.f32.vlgmr.msra.gmra.mrb[0].mxu1 %vm636_vm2, %v971_v40  ;;  %v1002_v40 = vrot.slane %v8770_v24, 1 }
  0x8b   : > { %6727 = vmatprep.mubr.msk.f32.mxu1 %vm8485_vm1, %v8484_v1  ;;  %6812 = vmatpush3.msk.msra.mxu1 %vm724_vm0, %v5839_v39  ;;  %v10996_v39 = vrot.slane %v8600_v4, 2 }
  0x8c   : > { %6995 = vmatmul.mubr.msk.f32.gmra.mrb[2].mxu0 %vm636_vm2, %v977_v48  ;;  %v9122_v47 = vsel %vm968_vm3, %v1002_v40, %v1004_v46 }
  0x8d   : > { %6997 = vmatprep.mubr.msk.f32.mxu0 %vm8485_vm1, %v8484_v1 }
  0x8e   : > { %6728 = vmatmul.mubr.msk.f32.gmra.mrb[2].mxu1 %vm636_vm2, %v973_v43  ;;  %v9110_v43 = vsel %vm968_vm3, %v1000_v35, %v1002_v40 }
  0x8f   : > { %6730 = vmatprep.mubr.msk.f32.mxu1 %vm8485_vm1, %v8484_v1 }
  0x90   : > { %6998 = vmatmul.mubr.msk.f32.gmra.mrb[4].mxu0 %vm636_vm2, %v8969_v50 }
  0x91   : > { %7000 = vmatprep.mubr.msk.f32.mxu0 %vm8485_vm1, %v8484_v1 }
  0x92   : > { %6731 = vmatmul.mubr.msk.f32.gmra.mrb[4].mxu1 %vm636_vm2, %v8617_v8  ;;  %v998_v8 = vrot.slane %v8748_v22, 1 }
  0x93   : > { %6733 = vmatprep.mubr.msk.f32.mxu1 %vm8485_vm1, %v8484_v1 }
  0x94   : > { %7001 = vmatmul.mubr.msk.f32.gmra.mrb[6].mxu0 %vm636_vm2, %v8981_v52  ;;  %v9086_v34 = vsel %vm968_vm3, %v996_v6, %v998_v8  ;;  %v9098_v37 = vsel %vm968_vm3, %v998_v8, %v1000_v35  ;;  %v1016_v6 = vrot.slane %v8847_v31, 1  ;;  %v1018_v35 = vrot.slane %v8858_v32, 1 }
  0x95   : > { %7003 = vmatprep.mubr.msk.f32.mxu0 %vm8485_vm1, %v8484_v1 }
  0x96   : > { %6734 = vmatmul.mubr.msk.f32.gmra.mrb[6].mxu1 %vm636_vm2, %v977_v48  ;;  %v1006_v48 = vrot.slane %v8792_v26, 1  ;;  %v9194_v8 = vsel %vm968_vm3, %v1014_v63, %v1016_v6  ;;  %v9206_v40 = vsel %vm968_vm3, %v1016_v6, %v1018_v35  ;;  %v1329_v63 = vrot.slane %v8635_v11, 2 }
  0x97   : > { %6736 = vmatprep.mubr.msk.f32.mxu1 %vm8485_vm1, %v8484_v1  ;;  %v1330_v6 = vrot.slane %v8642_v12, 2  ;;  %v1936_v12 = vrot.slane %v8933_v45, 1 }
  0x98   : > { %7004 = vmatmul.mubr.msk.f32.gmra.mrb[8].mxu0 %vm636_vm2, %v8992_v54  ;;  %v9134_v49 = vsel %vm968_vm3, %v1004_v46, %v1006_v48  ;;  %v9146_v53 = vsel %vm968_vm3, %v1006_v48, %v1008_v51  ;;  %v1020_v46 = vrot.slane %v8869_v33, 1  ;;  %v1022_v51 = vrot.slane %v8882_v36, 1 }
  0x99   : > { %7006 = vmatprep.mubr.msk.f32.mxu0 %vm8485_vm1, %v8484_v1  ;;  %v1331_v11 = vsel %vm1328_vm4, %v1329_v63, %v1330_v6  ;;  %v1333_v63 = vsel %vm1328_vm4, %v1330_v6, %v10996_v39  ;;  %v1336_v6 = vrot.slane %v8625_v9, 2 }
  0x9a   : > { %6737 = vmatmul.mubr.msk.f32.gmra.mrb[8].mxu1 %vm636_vm2, %v8969_v50  ;;  %v9218_v48 = vsel %vm968_vm3, %v1018_v35, %v1020_v46  ;;  %v9230_v55 = vsel %vm968_vm3, %v1020_v46, %v1022_v51  ;;  %v1026_v35 = vrot.slane %v8922_v44, 1  ;;  %v9245_v46 = vsel %vm968_vm3, %v1022_v51, %v1024_v59 }
  0x9b   : > { %6739 = vmatprep.mubr.msk.f32.mxu1 %vm8485_vm1, %v8484_v1 }
  0x9c   : > { %7007 = vmatmul.mubr.msk.f32.gmra.mrb[10].mxu0 %vm636_vm2, %v9003_v56  ;;  %v9262_v51 = vsel %vm968_vm3, %v1024_v59, %v1026_v35  ;;  %v9279_v59 = vsel %vm968_vm3, %v1026_v35, %v1936_v12  ;;  %v5843_v35 = vld [vmem:[%s10958_s3 + $0x18] sm:$0x7] }
  0x9d   : > { %7009 = vmatprep.mubr.msk.f32.mxu0 %vm8485_vm1, %v8484_v1  ;;  %10997 = vst [vmem:[#allocation3_spill] sm:$0xff] %v9279_v59 }
  0x9e   : > { %6740 = vmatmul.mubr.msk.f32.gmra.mrb[10].mxu1 %vm636_vm2, %v8981_v52 }
  0x9f   : > { %6742 = vmatprep.mubr.msk.f32.mxu1 %vm8485_vm1, %v8484_v1 }
  0xa0   : > { %7010 = vmatmul.mubr.msk.f32.gmra.mrb[12].mxu0 %vm636_vm2, %v9015_v58 }
  0xa1   : > { %7012 = vmatprep.mubr.msk.f32.mxu0 %vm8485_vm1, %v8484_v1 }
  0xa2   : > { %6743 = vmatmul.mubr.msk.f32.gmra.mrb[12].mxu1 %vm636_vm2, %v8992_v54 }
  0xa3   : > { %6745 = vmatprep.mubr.msk.f32.mxu1 %vm8485_vm1, %v8484_v1 }
  0xa4   : > { %7013 = vmatmul.mubr.msk.f32.gmra.mrb[14].mxu0 %vm636_vm2, %v9026_v60 }
  0xa5   : > { %7015 = vmatprep.mubr.msk.f32.mxu0 %vm8485_vm1, %v8484_v1 }
  0xa6   : > { %6746 = vmatmul.mubr.msk.f32.gmra.mrb[14].mxu1 %vm636_vm2, %v9003_v56 }
  0xa7   : > { %6748 = vmatprep.mubr.msk.f32.mxu1 %vm8485_vm1, %v8484_v1 }
  0xa8   : > { %7016 = vmatmul.mubr.msk.f32.gmra.mrb[16].mxu0 %vm636_vm2, %v9038_v62 }
  0xa9   : > { %7018 = vmatprep.mubr.msk.f32.mxu0 %vm8485_vm1, %v8484_v1 }
  0xaa   : > { %6749 = vmatmul.mubr.msk.f32.gmra.mrb[16].mxu1 %vm636_vm2, %v9015_v58 }
  0xab   : > { %6751 = vmatprep.mubr.msk.f32.mxu1 %vm8485_vm1, %v8484_v1 }
  0xac   : > { %7019 = vmatmul.mubr.msk.f32.gmra.mrb[18].mxu0 %vm636_vm2, %v9050_v0 }
  0xad   : > { %7021 = vmatprep.mubr.msk.f32.mxu0 %vm8485_vm1, %v8484_v1 }
  0xae   : > { %6752 = vmatmul.mubr.msk.f32.gmra.mrb[18].mxu1 %vm636_vm2, %v9026_v60 }
  0xaf   : > { %6754 = vmatprep.mubr.msk.f32.mxu1 %vm8485_vm1, %v8484_v1 }
  0xb0   : > { %7022 = vmatmul.mubr.msk.f32.gmra.mrb[20].mxu0 %vm636_vm2, %v9062_v3 }
  0xb1   : > { %7024 = vmatprep.mubr.msk.f32.mxu0 %vm8485_vm1, %v8484_v1 }
  0xb2   : > { %6755 = vmatmul.mubr.msk.f32.gmra.mrb[20].mxu1 %vm636_vm2, %v9038_v62 }
  0xb3   : > { %6757 = vmatprep.mubr.msk.f32.mxu1 %vm8485_vm1, %v8484_v1 }
  0xb4   : > { %7025 = vmatmul.mubr.msk.f32.gmra.mrb[22].mxu0 %vm636_vm2, %v9074_v7 }
  0xb5   : > { %7027 = vmatprep.mubr.msk.f32.mxu0 %vm8485_vm1, %v8484_v1 }
  0xb6   : > { %6758 = vmatmul.mubr.msk.f32.gmra.mrb[22].mxu1 %vm636_vm2, %v9050_v0 }
  0xb7   : > { %6760 = vmatprep.mubr.msk.f32.mxu1 %vm8485_vm1, %v8484_v1 }
  0xb8   : > { %7028 = vmatmul.mubr.msk.f32.gmra.mrb[24].mxu0 %vm636_vm2, %v9086_v34 }
  0xb9   : > { %7030 = vmatprep.mubr.msk.f32.mxu0 %vm8485_vm1, %v8484_v1 }
  0xba   : > { %6761 = vmatmul.mubr.msk.f32.gmra.mrb[24].mxu1 %vm636_vm2, %v9062_v3 }
  0xbb   : > { %6763 = vmatprep.mubr.msk.f32.mxu1 %vm8485_vm1, %v8484_v1 }
  0xbc   : > { %7031 = vmatmul.mubr.msk.f32.gmra.mrb[26].mxu0 %vm636_vm2, %v9098_v37 }
  0xbd   : > { %7033 = vmatprep.mubr.msk.f32.mxu0 %vm8485_vm1, %v8484_v1 }
  0xbe   : > { %6764 = vmatmul.mubr.msk.f32.gmra.mrb[26].mxu1 %vm636_vm2, %v9074_v7 }
  0xbf   : > { %6766 = vmatprep.mubr.msk.f32.mxu1 %vm8485_vm1, %v8484_v1 }
  0xc0   : > { %7034 = vmatmul.mubr.msk.f32.gmra.mrb[28].mxu0 %vm636_vm2, %v9110_v43 }
  0xc1   : > { %7036 = vmatprep.mubr.msk.f32.mxu0 %vm8485_vm1, %v8484_v1 }
  0xc2   : > { %6767 = vmatmul.mubr.msk.f32.gmra.mrb[28].mxu1 %vm636_vm2, %v9086_v34 }
  0xc3   : > { %6769 = vmatprep.mubr.msk.f32.mxu1 %vm8485_vm1, %v8484_v1 }
  0xc4   : > { %7037 = vmatmul.mubr.msk.f32.gmra.mrb[30].mxu0 %vm636_vm2, %v9122_v47 }
  0xc5   : > { %7039 = vmatprep.mubr.msk.f32.mxu0 %vm8485_vm1, %v8484_v1 }
  0xc6   : > { %6770 = vmatmul.mubr.msk.f32.gmra.mrb[30].mxu1 %vm636_vm2, %v9098_v37 }
  0xc7   : > { %6772 = vmatprep.mubr.msk.f32.mxu1 %vm8485_vm1, %v8484_v1 }
  0xc8   : > { %7040 = vmatmul.mubr.msk.f32.gmra.mrb[32].mxu0 %vm636_vm2, %v9134_v49 }
  0xc9   : > { %7042 = vmatprep.mubr.msk.f32.mxu0 %vm8485_vm1, %v8484_v1 }
  0xca   : > { %6773 = vmatmul.mubr.msk.f32.gmra.mrb[32].mxu1 %vm636_vm2, %v9110_v43 }
  0xcb   : > { %6775 = vmatprep.mubr.msk.f32.mxu1 %vm8485_vm1, %v8484_v1 }
  0xcc   : > { %7043 = vmatmul.mubr.msk.f32.gmra.mrb[34].mxu0 %vm636_vm2, %v9146_v53 }
  0xcd   : > { %7045 = vmatprep.mubr.msk.f32.mxu0 %vm8485_vm1, %v8484_v1 }
  0xce   : > { %6776 = vmatmul.mubr.msk.f32.gmra.mrb[34].mxu1 %vm636_vm2, %v9122_v47 }
  0xcf   : > { %6778 = vmatprep.mubr.msk.f32.mxu1 %vm8485_vm1, %v8484_v1 }
  0xd0   : > { %7046 = vmatmul.mubr.msk.f32.gmra.mrb[36].mxu0 %vm636_vm2, %v9158_v57 }
  0xd1   : > { %7048 = vmatprep.mubr.msk.f32.mxu0 %vm8485_vm1, %v8484_v1 }
  0xd2   : > { %6779 = vmatmul.mubr.msk.f32.gmra.mrb[36].mxu1 %vm636_vm2, %v9134_v49 }
  0xd3   : > { %6781 = vmatprep.mubr.msk.f32.mxu1 %vm8485_vm1, %v8484_v1 }
  0xd4   : > { %7049 = vmatmul.mubr.msk.f32.gmra.mrb[38].mxu0 %vm636_vm2, %v9170_v61 }
  0xd5   : > { %7051 = vmatprep.mubr.msk.f32.mxu0 %vm8485_vm1, %v8484_v1 }
  0xd6   : > { %6782 = vmatmul.mubr.msk.f32.gmra.mrb[38].mxu1 %vm636_vm2, %v9146_v53 }
  0xd7   : > { %6784 = vmatprep.mubr.msk.f32.mxu1 %vm8485_vm1, %v8484_v1 }
  0xd8   : > { %7052 = vmatmul.mubr.msk.f32.gmra.mrb[40].mxu0 %vm636_vm2, %v9182_v2 }
  0xd9   : > { %7054 = vmatprep.mubr.msk.f32.mxu0 %vm8485_vm1, %v8484_v1 }
  0xda   : > { %6785 = vmatmul.mubr.msk.f32.gmra.mrb[40].mxu1 %vm636_vm2, %v9158_v57 }
  0xdb   : > { %6787 = vmatprep.mubr.msk.f32.mxu1 %vm8485_vm1, %v8484_v1 }
  0xdc   : > { %7055 = vmatmul.mubr.msk.f32.gmra.mrb[42].mxu0 %vm636_vm2, %v9194_v8 }
  0xdd   : > { %7057 = vmatprep.mubr.msk.f32.mxu0 %vm8485_vm1, %v8484_v1 }
  0xde   : > { %6788 = vmatmul.mubr.msk.f32.gmra.mrb[42].mxu1 %vm636_vm2, %v9170_v61 }
  0xdf   : > { %6790 = vmatprep.mubr.msk.f32.mxu1 %vm8485_vm1, %v8484_v1 }
  0xe0   : > { %7058 = vmatmul.mubr.msk.f32.gmra.mrb[44].mxu0 %vm636_vm2, %v9206_v40 }
  0xe1   : > { %7060 = vmatprep.mubr.msk.f32.mxu0 %vm8485_vm1, %v8484_v1 }
  0xe2   : > { %6791 = vmatmul.mubr.msk.f32.gmra.mrb[44].mxu1 %vm636_vm2, %v9182_v2  ;;  %v10973_v2 = vrot.slane %v9265_v38, 1 }
  0xe3   : > { %6793 = vmatprep.mubr.msk.f32.mxu1 %vm8485_vm1, %v8484_v1 }
  0xe4   : > { %7061 = vmatmul.mubr.msk.f32.gmra.mrb[46].mxu0 %vm636_vm2, %v9218_v48  ;;  %v9293_v4 = vsel %vm968_vm3, %v1936_v12, %v10973_v2  ;;  %v10999_v12 = vrot.slane %v8603_v5, 2  ;;  %v1338_v2 = vrot.slane %v8632_v10, 2 }
  0xe5   : > { %7063 = vmatprep.mubr.msk.f32.mxu0 %vm8485_vm1, %v8484_v1  ;;  %10998 = vst [vmem:[#allocation4_spill] sm:$0xff] %v9293_v4 }
  0xe6   : > { %6794 = vmatmul.mubr.msk.f32.gmra.mrb[46].mxu1 %vm636_vm2, %v9194_v8  ;;  %v1337_v39 = vsel %vm1328_vm4, %v10999_v12, %v1336_v6  ;;  %v9329_v5 = vsel %vm1328_vm4, %v1336_v6, %v1338_v2  ;;  %v1340_v12 = vrot.slane %v8649_v13, 2  ;;  %v1342_v6 = vrot.slane %v8660_v14, 2 }
  0xe7   : > { %6796 = vmatprep.mubr.msk.f32.mxu1 %vm8485_vm1, %v8484_v1  ;;  %11000 = vst [vmem:[#allocation5_spill] sm:$0xff] %v9329_v5 }
  0xe8   : > { %7064 = vmatmul.mubr.msk.f32.gmra.mrb[48].mxu0 %vm636_vm2, %v9230_v55 }
  0xe9   : > { %7066 = vmatprep.mubr.msk.f32.mxu0 %vm8485_vm1, %v8484_v1 }
  0xea   : > { %6797 = vmatmul.mubr.msk.f32.gmra.mrb[48].mxu1 %vm636_vm2, %v9206_v40 }
  0xeb   : > { %6799 = vmatprep.mubr.msk.f32.mxu1 %vm8485_vm1, %v8484_v1 }
  0xec   : > { %7067 = vmatmul.mubr.msk.f32.gmra.mrb[50].mxu0 %vm636_vm2, %v9245_v46 }
  0xed   : > { %7069 = vmatprep.mubr.msk.f32.mxu0 %vm8485_vm1, %v8484_v1 }
  0xee   : > { %6800 = vmatmul.mubr.msk.f32.gmra.mrb[50].mxu1 %vm636_vm2, %v9218_v48 }
  0xef   : > { %6802 = vmatprep.mubr.msk.f32.mxu1 %vm8485_vm1, %v8484_v1 }
  0xf0   : > { %7070 = vmatmul.mubr.msk.f32.gmra.mrb[52].mxu0 %vm636_vm2, %v9262_v51 }
  0xf1   : > { %7072 = vmatprep.mubr.msk.f32.mxu0 %vm8485_vm1, %v8484_v1 }
  0xf2   : > { %6803 = vmatmul.mubr.msk.f32.gmra.mrb[52].mxu1 %vm636_vm2, %v9230_v55 }
  0xf3   : > { %6805 = vmatprep.mubr.msk.f32.mxu1 %vm8485_vm1, %v8484_v1 }
  0xf4   : > { %7073 = vmatmul.mubr.msk.f32.gmra.mrb[54].mxu0 %vm636_vm2, %v9279_v59  ;;  %v1344_v59 = vrot.slane %v8671_v15, 2 }
  0xf5   : > { %7075 = vmatprep.mubr.msk.f32.mxu0 %vm8485_vm1, %v8484_v1 }
  0xf6   : > { %6806 = vmatmul.mubr.msk.f32.gmra.mrb[54].mxu1 %vm636_vm2, %v9245_v46 }
  0xf7   : > { %6808 = vmatprep.mubr.msk.f32.mxu1 %vm8485_vm1, %v8484_v1 }
  0xf8   : > { %7076 = vmatmul.mubr.msk.f32.gmra.mrb[56].mxu0 %vm636_vm2, %v9293_v4  ;;  %v9352_v4 = vsel %vm1328_vm4, %v1340_v12, %v1342_v6 }
  0xf9   : > { %7080 = vmatprep.mubr.msk.f32.mxu0 %vm8485_vm1, %v8484_v1  ;;  %11002 = vst [vmem:[#allocation7_spill] sm:$0xff] %v9352_v4 }
  0xfa   : > { %6809 = vmatmul.mubr.msk.f32.gmra.mrb[56].mxu1 %vm636_vm2, %v9262_v51 }
  0xfb   : > { %6813 = vmatprep.mubr.msk.f32.mxu1 %vm8485_vm1, %v8484_v1 }
  0xfc   : > { %7081 = vmatmul.mubr.msk.f32.vlgmr.msra.gmra.mrb[0].mxu0 %vm636_vm2, %v8910_v42 }
  0xfd   : > { %7083 = vmatprep.mubr.msk.f32.mxu0 %vm8485_vm1, %v8484_v1  ;;  %7168 = vmatpush3.msk.msra.mxu0 %vm724_vm0, %v5843_v35  ;;  %v9341_v35 = vsel %vm1328_vm4, %v1338_v2, %v1340_v12  ;;  %v9363_v2 = vsel %vm1328_vm4, %v1342_v6, %v1344_v59  ;;  %v1348_v12 = vrot.slane %v8693_v17, 2  ;;  %v1350_v6 = vrot.slane %v8704_v18, 2 }
  0xfe   : > { %7256 = vmatprep.subr.mxu0 %v8484_v1  ;;  %11001 = vst [vmem:[#allocation6_spill] sm:$0xff] %v9341_v35  ;;  %6814 = vmatmul.mubr.msk.f32.vlgmr.msra.gmra.mrb[0].mxu1 %vm636_vm2, %v1331_v11  ;;  %11003 = vst [vmem:[#allocation8_spill] sm:$0xff] %v9363_v2  ;;  %v1346_v11 = vrot.slane %v8682_v16, 2 }
  0xff   : > { %6816 = vmatprep.mubr.msk.f32.mxu1 %vm8485_vm1, %v8484_v1 }
 0x100   : > { %7084 = vmatmul.mubr.msk.f32.gmra.mrb[2].mxu0 %vm636_vm2, %v1337_v39 }
 0x101   : > { %7086 = vmatprep.mubr.msk.f32.mxu0 %vm8485_vm1, %v8484_v1 }
 0x102   : > { %6817 = vmatmul.mubr.msk.f32.gmra.mrb[2].mxu1 %vm636_vm2, %v1333_v63  ;;  %v9375_v63 = vsel %vm1328_vm4, %v1344_v59, %v1346_v11  ;;  %v9398_v59 = vsel %vm1328_vm4, %v1348_v12, %v1350_v6 }
 0x103   : > { %6819 = vmatprep.mubr.msk.f32.mxu1 %vm8485_vm1, %v8484_v1  ;;  %11004 = vst [vmem:[#allocation9_spill] sm:$0xff] %v9375_v63  ;;  %11006 = vst [vmem:[#allocation11_spill] sm:$0xff] %v9398_v59 }
 0x104   : > { %7087 = vmatmul.mubr.msk.f32.gmra.mrb[4].mxu0 %vm636_vm2, %v9329_v5 }
 0x105   : > { %7089 = vmatprep.mubr.msk.f32.mxu0 %vm8485_vm1, %v8484_v1 }
 0x106   : > { %6820 = vmatmul.mubr.msk.f32.gmra.mrb[4].mxu1 %vm636_vm2, %v8910_v42  ;;  %v9386_v42 = vsel %vm1328_vm4, %v1346_v11, %v1348_v12  ;;  %v1354_v12 = vrot.slane %v8726_v20, 2 }
 0x107   : > { %6822 = vmatprep.mubr.msk.f32.mxu1 %vm8485_vm1, %v8484_v1  ;;  %11005 = vst [vmem:[#allocation10_spill] sm:$0xff] %v9386_v42 }
 0x108   : > { %7090 = vmatmul.mubr.msk.f32.gmra.mrb[6].mxu0 %vm636_vm2, %v9341_v35 }
 0x109   : > { %7092 = vmatprep.mubr.msk.f32.mxu0 %vm8485_vm1, %v8484_v1 }
 0x10a   : > { %6823 = vmatmul.mubr.msk.f32.gmra.mrb[6].mxu1 %vm636_vm2, %v1337_v39  ;;  %v1352_v39 = vrot.slane %v8715_v19, 2 }
 0x10b   : > { %6825 = vmatprep.mubr.msk.f32.mxu1 %vm8485_vm1, %v8484_v1 }
 0x10c   : > { %7093 = vmatmul.mubr.msk.f32.gmra.mrb[8].mxu0 %vm636_vm2, %v9352_v4  ;;  %v9410_v11 = vsel %vm1328_vm4, %v1350_v6, %v1352_v39  ;;  %v1356_v6 = vrot.slane %v8737_v21, 2 }
 0x10d   : > { %7095 = vmatprep.mubr.msk.f32.mxu0 %vm8485_vm1, %v8484_v1  ;;  %11007 = vst [vmem:[#allocation12_spill] sm:$0xff] %v9410_v11 }
 0x10e   : > { %6826 = vmatmul.mubr.msk.f32.gmra.mrb[8].mxu1 %vm636_vm2, %v9329_v5 }
 0x10f   : > { %6828 = vmatprep.mubr.msk.f32.mxu1 %vm8485_vm1, %v8484_v1 }
 0x110   : > { %7096 = vmatmul.mubr.msk.f32.gmra.mrb[10].mxu0 %vm636_vm2, %v9363_v2 }
 0x111   : > { %7098 = vmatprep.mubr.msk.f32.mxu0 %vm8485_vm1, %v8484_v1 }
 0x112   : > { %6829 = vmatmul.mubr.msk.f32.gmra.mrb[10].mxu1 %vm636_vm2, %v9341_v35  ;;  %v9422_v35 = vsel %vm1328_vm4, %v1352_v39, %v1354_v12  ;;  %v1358_v39 = vrot.slane %v8748_v22, 2 }
 0x113   : > { %6831 = vmatprep.mubr.msk.f32.mxu1 %vm8485_vm1, %v8484_v1  ;;  %11008 = vst [vmem:[#allocation13_spill] sm:$0xff] %v9422_v35 }
 0x114   : > { %7099 = vmatmul.mubr.msk.f32.gmra.mrb[12].mxu0 %vm636_vm2, %v9375_v63 }
 0x115   : > { %7101 = vmatprep.mubr.msk.f32.mxu0 %vm8485_vm1, %v8484_v1 }
 0x116   : > { %6832 = vmatmul.mubr.msk.f32.gmra.mrb[12].mxu1 %vm636_vm2, %v9352_v4  ;;  %v9434_v4 = vsel %vm1328_vm4, %v1354_v12, %v1356_v6  ;;  %v1360_v12 = vrot.slane %v8759_v23, 2 }
 0x117   : > { %6834 = vmatprep.mubr.msk.f32.mxu1 %vm8485_vm1, %v8484_v1  ;;  %11009 = vst [vmem:[#allocation14_spill] sm:$0xff] %v9434_v4 }
 0x118   : > { %7102 = vmatmul.mubr.msk.f32.gmra.mrb[14].mxu0 %vm636_vm2, %v9386_v42 }
 0x119   : > { %7104 = vmatprep.mubr.msk.f32.mxu0 %vm8485_vm1, %v8484_v1 }
 0x11a   : > { %6835 = vmatmul.mubr.msk.f32.gmra.mrb[14].mxu1 %vm636_vm2, %v9363_v2  ;;  %v9446_v2 = vsel %vm1328_vm4, %v1356_v6, %v1358_v39  ;;  %v1362_v6 = vrot.slane %v8770_v24, 2 }
 0x11b   : > { %6837 = vmatprep.mubr.msk.f32.mxu1 %vm8485_vm1, %v8484_v1  ;;  %11010 = vst [vmem:[#allocation15_spill] sm:$0xff] %v9446_v2 }
 0x11c   : > { %7105 = vmatmul.mubr.msk.f32.gmra.mrb[16].mxu0 %vm636_vm2, %v9398_v59 }
 0x11d   : > { %7107 = vmatprep.mubr.msk.f32.mxu0 %vm8485_vm1, %v8484_v1 }
 0x11e   : > { %6838 = vmatmul.mubr.msk.f32.gmra.mrb[16].mxu1 %vm636_vm2, %v9375_v63  ;;  %v9458_v63 = vsel %vm1328_vm4, %v1358_v39, %v1360_v12  ;;  %v1364_v39 = vrot.slane %v8781_v25, 2 }
 0x11f   : > { %6840 = vmatprep.mubr.msk.f32.mxu1 %vm8485_vm1, %v8484_v1  ;;  %11011 = vst [vmem:[#allocation16_spill] sm:$0xff] %v9458_v63 }
 0x120   : > { %7108 = vmatmul.mubr.msk.f32.gmra.mrb[18].mxu0 %vm636_vm2, %v9410_v11 }
 0x121   : > { %7110 = vmatprep.mubr.msk.f32.mxu0 %vm8485_vm1, %v8484_v1 }
 0x122   : > { %6841 = vmatmul.mubr.msk.f32.gmra.mrb[18].mxu1 %vm636_vm2, %v9386_v42  ;;  %v9470_v42 = vsel %vm1328_vm4, %v1360_v12, %v1362_v6  ;;  %v1366_v12 = vrot.slane %v8792_v26, 2 }
 0x123   : > { %6843 = vmatprep.mubr.msk.f32.mxu1 %vm8485_vm1, %v8484_v1  ;;  %11012 = vst [vmem:[#allocation17_spill] sm:$0xff] %v9470_v42 }
 0x124   : > { %7111 = vmatmul.mubr.msk.f32.gmra.mrb[20].mxu0 %vm636_vm2, %v9422_v35 }
 0x125   : > { %7113 = vmatprep.mubr.msk.f32.mxu0 %vm8485_vm1, %v8484_v1 }
 0x126   : > { %6844 = vmatmul.mubr.msk.f32.gmra.mrb[20].mxu1 %vm636_vm2, %v9398_v59  ;;  %v9482_v59 = vsel %vm1328_vm4, %v1362_v6, %v1364_v39  ;;  %v1368_v6 = vrot.slane %v8803_v27, 2 }
 0x127   : > { %6846 = vmatprep.mubr.msk.f32.mxu1 %vm8485_vm1, %v8484_v1  ;;  %11013 = vst [vmem:[#allocation18_spill] sm:$0xff] %v9482_v59 }
 0x128   : > { %7114 = vmatmul.mubr.msk.f32.gmra.mrb[22].mxu0 %vm636_vm2, %v9434_v4 }
 0x129   : > { %7116 = vmatprep.mubr.msk.f32.mxu0 %vm8485_vm1, %v8484_v1 }
 0x12a   : > { %6847 = vmatmul.mubr.msk.f32.gmra.mrb[22].mxu1 %vm636_vm2, %v9410_v11  ;;  %v9494_v11 = vsel %vm1328_vm4, %v1364_v39, %v1366_v12  ;;  %v1370_v39 = vrot.slane %v8814_v28, 2 }
 0x12b   : > { %6849 = vmatprep.mubr.msk.f32.mxu1 %vm8485_vm1, %v8484_v1  ;;  %11014 = vst [vmem:[#allocation19_spill] sm:$0xff] %v9494_v11 }
 0x12c   : > { %7117 = vmatmul.mubr.msk.f32.gmra.mrb[24].mxu0 %vm636_vm2, %v9446_v2 }
 0x12d   : > { %7119 = vmatprep.mubr.msk.f32.mxu0 %vm8485_vm1, %v8484_v1 }
 0x12e   : > { %6850 = vmatmul.mubr.msk.f32.gmra.mrb[24].mxu1 %vm636_vm2, %v9422_v35  ;;  %v9506_v35 = vsel %vm1328_vm4, %v1366_v12, %v1368_v6  ;;  %v1372_v12 = vrot.slane %v8825_v29, 2 }
 0x12f   : > { %6852 = vmatprep.mubr.msk.f32.mxu1 %vm8485_vm1, %v8484_v1  ;;  %11015 = vst [vmem:[#allocation20_spill] sm:$0xff] %v9506_v35 }
 0x130   : > { %7120 = vmatmul.mubr.msk.f32.gmra.mrb[26].mxu0 %vm636_vm2, %v9458_v63 }
 0x131   : > { %7122 = vmatprep.mubr.msk.f32.mxu0 %vm8485_vm1, %v8484_v1 }
 0x132   : > { %6853 = vmatmul.mubr.msk.f32.gmra.mrb[26].mxu1 %vm636_vm2, %v9434_v4  ;;  %v9518_v4 = vsel %vm1328_vm4, %v1368_v6, %v1370_v39  ;;  %v1374_v6 = vrot.slane %v8836_v30, 2 }
 0x133   : > { %6855 = vmatprep.mubr.msk.f32.mxu1 %vm8485_vm1, %v8484_v1  ;;  %11016 = vst [vmem:[#allocation21_spill] sm:$0xff] %v9518_v4 }
 0x134   : > { %7123 = vmatmul.mubr.msk.f32.gmra.mrb[28].mxu0 %vm636_vm2, %v9470_v42 }
 0x135   : > { %7125 = vmatprep.mubr.msk.f32.mxu0 %vm8485_vm1, %v8484_v1 }
 0x136   : > { %6856 = vmatmul.mubr.msk.f32.gmra.mrb[28].mxu1 %vm636_vm2, %v9446_v2  ;;  %v9530_v2 = vsel %vm1328_vm4, %v1370_v39, %v1372_v12  ;;  %v1376_v39 = vrot.slane %v8847_v31, 2 }
 0x137   : > { %6858 = vmatprep.mubr.msk.f32.mxu1 %vm8485_vm1, %v8484_v1  ;;  %11017 = vst [vmem:[#allocation22_spill] sm:$0xff] %v9530_v2 }
 0x138   : > { %7126 = vmatmul.mubr.msk.f32.gmra.mrb[30].mxu0 %vm636_vm2, %v9482_v59 }
 0x139   : > { %7128 = vmatprep.mubr.msk.f32.mxu0 %vm8485_vm1, %v8484_v1 }
 0x13a   : > { %6859 = vmatmul.mubr.msk.f32.gmra.mrb[30].mxu1 %vm636_vm2, %v9458_v63  ;;  %v9542_v63 = vsel %vm1328_vm4, %v1372_v12, %v1374_v6  ;;  %v1378_v12 = vrot.slane %v8858_v32, 2 }
 0x13b   : > { %6861 = vmatprep.mubr.msk.f32.mxu1 %vm8485_vm1, %v8484_v1  ;;  %11018 = vst [vmem:[#allocation23_spill] sm:$0xff] %v9542_v63 }
 0x13c   : > { %7129 = vmatmul.mubr.msk.f32.gmra.mrb[32].mxu0 %vm636_vm2, %v9494_v11 }
 0x13d   : > { %7131 = vmatprep.mubr.msk.f32.mxu0 %vm8485_vm1, %v8484_v1 }
 0x13e   : > { %6862 = vmatmul.mubr.msk.f32.gmra.mrb[32].mxu1 %vm636_vm2, %v9470_v42  ;;  %v9554_v42 = vsel %vm1328_vm4, %v1374_v6, %v1376_v39  ;;  %v1380_v6 = vrot.slane %v8869_v33, 2 }
 0x13f   : > { %6864 = vmatprep.mubr.msk.f32.mxu1 %vm8485_vm1, %v8484_v1 }
 0x140   : > { %7132 = vmatmul.mubr.msk.f32.gmra.mrb[34].mxu0 %vm636_vm2, %v9506_v35 }
 0x141   : > { %7134 = vmatprep.mubr.msk.f32.mxu0 %vm8485_vm1, %v8484_v1 }
 0x142   : > { %6865 = vmatmul.mubr.msk.f32.gmra.mrb[34].mxu1 %vm636_vm2, %v9482_v59  ;;  %v9566_v59 = vsel %vm1328_vm4, %v1376_v39, %v1378_v12  ;;  %v1382_v39 = vrot.slane %v8882_v36, 2 }
 0x143   : > { %6867 = vmatprep.mubr.msk.f32.mxu1 %vm8485_vm1, %v8484_v1 }
 0x144   : > { %7135 = vmatmul.mubr.msk.f32.gmra.mrb[36].mxu0 %vm636_vm2, %v9518_v4 }
 0x145   : > { %7137 = vmatprep.mubr.msk.f32.mxu0 %vm8485_vm1, %v8484_v1 }
 0x146   : > { %6868 = vmatmul.mubr.msk.f32.gmra.mrb[36].mxu1 %vm636_vm2, %v9494_v11  ;;  %v9578_v11 = vsel %vm1328_vm4, %v1378_v12, %v1380_v6  ;;  %v1384_v12 = vrot.slane %v8901_v41, 2 }
 0x147   : > { %6870 = vmatprep.mubr.msk.f32.mxu1 %vm8485_vm1, %v8484_v1 }
 0x148   : > { %7138 = vmatmul.mubr.msk.f32.gmra.mrb[38].mxu0 %vm636_vm2, %v9530_v2  ;;  %v9603_v5 = vsel %vm1328_vm4, %v1382_v39, %v1384_v12 }
 0x149   : > { %7140 = vmatprep.mubr.msk.f32.mxu0 %vm8485_vm1, %v8484_v1 }
 0x14a   : > { %6871 = vmatmul.mubr.msk.f32.gmra.mrb[38].mxu1 %vm636_vm2, %v9506_v35  ;;  %v9590_v35 = vsel %vm1328_vm4, %v1380_v6, %v1382_v39  ;;  %v2186_v6 = vrot.slane %v8933_v45, 2 }
 0x14b   : > { %6873 = vmatprep.mubr.msk.f32.mxu1 %vm8485_vm1, %v8484_v1 }
 0x14c   : > { %7141 = vmatmul.mubr.msk.f32.gmra.mrb[40].mxu0 %vm636_vm2, %v9542_v63 }
 0x14d   : > { %7143 = vmatprep.mubr.msk.f32.mxu0 %vm8485_vm1, %v8484_v1 }
 0x14e   : > { %6874 = vmatmul.mubr.msk.f32.gmra.mrb[40].mxu1 %vm636_vm2, %v9518_v4  ;;  %v1386_v4 = vrot.slane %v8922_v44, 2 }
 0x14f   : > { %6876 = vmatprep.mubr.msk.f32.mxu1 %vm8485_vm1, %v8484_v1 }
 0x150   : > { %7144 = vmatmul.mubr.msk.f32.gmra.mrb[42].mxu0 %vm636_vm2, %v9554_v42  ;;  %v9626_v39 = vsel %vm1328_vm4, %v1386_v4, %v2186_v6 }
 0x151   : > { %7146 = vmatprep.mubr.msk.f32.mxu0 %vm8485_vm1, %v8484_v1 }
 0x152   : > { %6877 = vmatmul.mubr.msk.f32.gmra.mrb[42].mxu1 %vm636_vm2, %v9530_v2  ;;  %v9615_v2 = vsel %vm1328_vm4, %v1384_v12, %v1386_v4  ;;  %v5844_v4 = vld [vmem:[%s10958_s3 + $0x1c] sm:$0x7] }
 0x153   : > { %6879 = vmatprep.mubr.msk.f32.mxu1 %vm8485_vm1, %v8484_v1 }
 0x154   : > { %7147 = vmatmul.mubr.msk.f32.gmra.mrb[44].mxu0 %vm636_vm2, %v9566_v59 }
 0x155   : > { %7149 = vmatprep.mubr.msk.f32.mxu0 %vm8485_vm1, %v8484_v1 }
 0x156   : > { %6880 = vmatmul.mubr.msk.f32.gmra.mrb[44].mxu1 %vm636_vm2, %v9542_v63  ;;  %v2188_v63 = vrot.slane %v9265_v38, 2 }
 0x157   : > { %6882 = vmatprep.mubr.msk.f32.mxu1 %vm8485_vm1, %v8484_v1 }
 0x158   : > { %7150 = vmatmul.mubr.msk.f32.gmra.mrb[46].mxu0 %vm636_vm2, %v9578_v11  ;;  %v9640_v12 = vsel %vm1328_vm4, %v2186_v6, %v2188_v63  ;;  %v476_v6 = vld [vmem:[%s10956_s1 + $0x40] sm:$0xff] }
 0x159   : > { %7152 = vmatprep.mubr.msk.f32.mxu0 %vm8485_vm1, %v8484_v1 }
 0x15a   : > { %6883 = vmatmul.mubr.msk.f32.gmra.mrb[46].mxu1 %vm636_vm2, %v9554_v42 }
 0x15b   : > { %6885 = vmatprep.mubr.msk.f32.mxu1 %vm8485_vm1, %v8484_v1 }
 0x15c   : > { %7153 = vmatmul.mubr.msk.f32.gmra.mrb[48].mxu0 %vm636_vm2, %v9590_v35 }
 0x15d   : > { %7155 = vmatprep.mubr.msk.f32.mxu0 %vm8485_vm1, %v8484_v1 }
 0x15e   : > { %6886 = vmatmul.mubr.msk.f32.gmra.mrb[48].mxu1 %vm636_vm2, %v9566_v59 }
 0x15f   : > { %6888 = vmatprep.mubr.msk.f32.mxu1 %vm8485_vm1, %v8484_v1 }
 0x160   : > { %7156 = vmatmul.mubr.msk.f32.gmra.mrb[50].mxu0 %vm636_vm2, %v9603_v5 }
 0x161   : > { %7158 = vmatprep.mubr.msk.f32.mxu0 %vm8485_vm1, %v8484_v1 }
 0x162   : > { %6889 = vmatmul.mubr.msk.f32.gmra.mrb[50].mxu1 %vm636_vm2, %v9578_v11 }
 0x163   : > { %6891 = vmatprep.mubr.msk.f32.mxu1 %vm8485_vm1, %v8484_v1 }
 0x164   : > { %7159 = vmatmul.mubr.msk.f32.gmra.mrb[52].mxu0 %vm636_vm2, %v9615_v2 }
 0x165   : > { %7161 = vmatprep.mubr.msk.f32.mxu0 %vm8485_vm1, %v8484_v1 }
 0x166   : > { %6892 = vmatmul.mubr.msk.f32.gmra.mrb[52].mxu1 %vm636_vm2, %v9590_v35 }
 0x167   : > { %6894 = vmatprep.mubr.msk.f32.mxu1 %vm8485_vm1, %v8484_v1 }
 0x168   : > { %7162 = vmatmul.mubr.msk.f32.gmra.mrb[54].mxu0 %vm636_vm2, %v9626_v39 }
 0x169   : > { %7164 = vmatprep.mubr.msk.f32.mxu0 %vm8485_vm1, %v8484_v1 }
 0x16a   : > { %6895 = vmatmul.mubr.msk.f32.gmra.mrb[54].mxu1 %vm636_vm2, %v9603_v5 }
 0x16b   : > { %6897 = vmatprep.mubr.msk.f32.mxu1 %vm8485_vm1, %v8484_v1 }
 0x16c   : > { %7165 = vmatmul.mubr.msk.f32.gmra.mrb[56].mxu0 %vm636_vm2, %v9640_v12 }
 0x16d   : > { %7169 = vmatprep.mubr.msk.f32.mxu0 %vm8485_vm1, %v8484_v1 }
 0x16e   : > { %6898 = vmatmul.mubr.msk.f32.gmra.mrb[56].mxu1 %vm636_vm2, %v9615_v2 }
 0x170   : > { %7170 = vmatmul.mubr.msk.f32.vlgmr.msra.gmra.mrb[0].mxu0 %vm636_vm2, %v8625_v9 }
 0x171   : > { %7172 = vmatprep.mubr.msk.f32.mxu0 %vm8485_vm1, %v8484_v1  ;;  %7257 = vmatpush3.msk.msra.mxu0 %vm724_vm0, %v5844_v4 }
 0x172   : > { %7345 = vmatprep.subr.mxu0 %v8484_v1 }
 0x174   : > { %7173 = vmatmul.mubr.msk.f32.gmra.mrb[2].mxu0 %vm636_vm2, %v8632_v10 }
 0x175   : > { %7175 = vmatprep.mubr.msk.f32.mxu0 %vm8485_vm1, %v8484_v1 }
 0x178   : > { %7176 = vmatmul.mubr.msk.f32.gmra.mrb[4].mxu0 %vm636_vm2, %v8649_v13  ;;  %v9780_v13 = vld [vmem:[%s8594_s22 + $0x100] sm:$0xff] }
 0x179   : > { %7178 = vmatprep.mubr.msk.f32.mxu0 %vm8485_vm1, %v8484_v1 }
 0x17c   : > { %7179 = vmatmul.mubr.msk.f32.gmra.mrb[6].mxu0 %vm636_vm2, %v8660_v14 }
 0x17d   : > { %7181 = vmatprep.mubr.msk.f32.mxu0 %vm8485_vm1, %v8484_v1 }
 0x180   : > { %7182 = vmatmul.mubr.msk.f32.gmra.mrb[8].mxu0 %vm636_vm2, %v8671_v15 }
 0x181   : > { %7184 = vmatprep.mubr.msk.f32.mxu0 %vm8485_vm1, %v8484_v1 }
 0x184   : > { %7185 = vmatmul.mubr.msk.f32.gmra.mrb[10].mxu0 %vm636_vm2, %v8682_v16 }
 0x185   : > { %7187 = vmatprep.mubr.msk.f32.mxu0 %vm8485_vm1, %v8484_v1 }
 0x188   : > { %7188 = vmatmul.mubr.msk.f32.gmra.mrb[12].mxu0 %vm636_vm2, %v8693_v17  ;;  %v5845_v17 = vld [vmem:[%s10958_s3 + $0x20] sm:$0x7] }
 0x189   : > { %7190 = vmatprep.mubr.msk.f32.mxu0 %vm8485_vm1, %v8484_v1 }
 0x18c   : > { %7191 = vmatmul.mubr.msk.f32.gmra.mrb[14].mxu0 %vm636_vm2, %v8704_v18 }
 0x18d   : > { %7193 = vmatprep.mubr.msk.f32.mxu0 %vm8485_vm1, %v8484_v1 }
 0x190   : > { %7194 = vmatmul.mubr.msk.f32.gmra.mrb[16].mxu0 %vm636_vm2, %v8715_v19 }
 0x191   : > { %7196 = vmatprep.mubr.msk.f32.mxu0 %vm8485_vm1, %v8484_v1 }
 0x194   : > { %7197 = vmatmul.mubr.msk.f32.gmra.mrb[18].mxu0 %vm636_vm2, %v8726_v20 }
 0x195   : > { %7199 = vmatprep.mubr.msk.f32.mxu0 %vm8485_vm1, %v8484_v1 }
 0x198   : > { %7200 = vmatmul.mubr.msk.f32.gmra.mrb[20].mxu0 %vm636_vm2, %v8737_v21 }
 0x199   : > { %7202 = vmatprep.mubr.msk.f32.mxu0 %vm8485_vm1, %v8484_v1 }
 0x19c   : > { %7203 = vmatmul.mubr.msk.f32.gmra.mrb[22].mxu0 %vm636_vm2, %v8748_v22 }
 0x19d   : > { %7205 = vmatprep.mubr.msk.f32.mxu0 %vm8485_vm1, %v8484_v1 }
 0x1a0   : > { %7206 = vmatmul.mubr.msk.f32.gmra.mrb[24].mxu0 %vm636_vm2, %v8759_v23 }
 0x1a1   : > { %7208 = vmatprep.mubr.msk.f32.mxu0 %vm8485_vm1, %v8484_v1 }
 0x1a4   : > { %7209 = vmatmul.mubr.msk.f32.gmra.mrb[26].mxu0 %vm636_vm2, %v8770_v24 }
 0x1a5   : > { %7211 = vmatprep.mubr.msk.f32.mxu0 %vm8485_vm1, %v8484_v1 }
 0x1a8   : > { %7212 = vmatmul.mubr.msk.f32.gmra.mrb[28].mxu0 %vm636_vm2, %v8781_v25 }
 0x1a9   : > { %7214 = vmatprep.mubr.msk.f32.mxu0 %vm8485_vm1, %v8484_v1 }
 0x1ac   : > { %7215 = vmatmul.mubr.msk.f32.gmra.mrb[30].mxu0 %vm636_vm2, %v8792_v26 }
 0x1ad   : > { %7217 = vmatprep.mubr.msk.f32.mxu0 %vm8485_vm1, %v8484_v1 }
 0x1b0   : > { %7218 = vmatmul.mubr.msk.f32.gmra.mrb[32].mxu0 %vm636_vm2, %v8803_v27 }
 0x1b1   : > { %7220 = vmatprep.mubr.msk.f32.mxu0 %vm8485_vm1, %v8484_v1 }
 0x1b4   : > { %7221 = vmatmul.mubr.msk.f32.gmra.mrb[34].mxu0 %vm636_vm2, %v8814_v28 }
 0x1b5   : > { %7223 = vmatprep.mubr.msk.f32.mxu0 %vm8485_vm1, %v8484_v1 }
 0x1b8   : > { %7224 = vmatmul.mubr.msk.f32.gmra.mrb[36].mxu0 %vm636_vm2, %v8825_v29 }
 0x1b9   : > { %7226 = vmatprep.mubr.msk.f32.mxu0 %vm8485_vm1, %v8484_v1 }
 0x1bc   : > { %7227 = vmatmul.mubr.msk.f32.gmra.mrb[38].mxu0 %vm636_vm2, %v8836_v30 }
 0x1bd   : > { %7229 = vmatprep.mubr.msk.f32.mxu0 %vm8485_vm1, %v8484_v1 }
 0x1c0   : > { %7230 = vmatmul.mubr.msk.f32.gmra.mrb[40].mxu0 %vm636_vm2, %v8847_v31 }
 0x1c1   : > { %7232 = vmatprep.mubr.msk.f32.mxu0 %vm8485_vm1, %v8484_v1 }
 0x1c4   : > { %7233 = vmatmul.mubr.msk.f32.gmra.mrb[42].mxu0 %vm636_vm2, %v8858_v32 }
 0x1c5   : > { %7235 = vmatprep.mubr.msk.f32.mxu0 %vm8485_vm1, %v8484_v1 }
 0x1c8   : > { %7236 = vmatmul.mubr.msk.f32.gmra.mrb[44].mxu0 %vm636_vm2, %v8869_v33  ;;  %v8486_v33 = vmov 0  }
 0x1c9   : > { %7238 = vmatprep.mubr.msk.f32.mxu0 %vm8485_vm1, %v8484_v1  ;;  %8462 = vset.pattern.permute.xlu0 %v8486_v33 }
 0x1ca   : > { %8463 = vset.pattern.permute.xlu1 %v8486_v33 }
 0x1cc   : > { %7239 = vmatmul.mubr.msk.f32.gmra.mrb[46].mxu0 %vm636_vm2, %v8882_v36  ;;  %v468_v36 = vld [vmem:[%s10956_s1] sm:$0xff] }
 0x1cd   : > { %7241 = vmatprep.mubr.msk.f32.mxu0 %vm8485_vm1, %v8484_v1  ;;  %3279 = vperm.xlu0 %8462, %v468_v36  }
 0x1d0   : > { %7242 = vmatmul.mubr.msk.f32.gmra.mrb[48].mxu0 %vm636_vm2, %v8901_v41 }
 0x1d1   : > { %7244 = vmatprep.mubr.msk.f32.mxu0 %vm8485_vm1, %v8484_v1  ;;  %v9773_v9 = vpop.f32.mrb[0].mxu1 }
 0x1d2   : > { %v6815_v10 = vpop.f32.mrb[1].mxu1 }
 0x1d4   : > { %7245 = vmatmul.mubr.msk.f32.gmra.mrb[50].mxu0 %vm636_vm2, %v8922_v44 }
 0x1d5   : > { %7247 = vmatprep.mubr.msk.f32.mxu0 %vm8485_vm1, %v8484_v1  ;;  %v9782_v14 = vpop.f32.mrb[2].mxu1 }
 0x1d6   : > { %v6818_v15 = vpop.f32.mrb[3].mxu1 }
 0x1d7   : > { %v478_v15 = vld [vmem:[%s10956_s1 + $0x50] sm:$0xff] }
 0x1d8   : > { %7248 = vmatmul.mubr.msk.f32.gmra.mrb[52].mxu0 %vm636_vm2, %v8933_v45  ;;  %v469_v45 = vld [vmem:[%s10956_s1 + $0x8] sm:$0xff] }
 0x1d9   : > { %7250 = vmatprep.mubr.msk.f32.mxu0 %vm8485_vm1, %v8484_v1  ;;  %v9788_v16 = vpop.f32.mrb[4].mxu1  ;;  %3284 = vperm.xlu0 %8462, %v469_v45  }
 0x1da   : > { %v6821_v18 = vpop.f32.mrb[5].mxu1 }
 0x1dc   : > { %7251 = vmatmul.mubr.msk.f32.gmra.mrb[54].mxu0 %vm636_vm2, %v9265_v38 }
 0x1dd   : > { %7253 = vmatprep.mubr.msk.f32.mxu0 %vm8485_vm1, %v8484_v1  ;;  %v9798_v19 = vpop.f32.mrb[6].mxu1 }
 0x1de   : > { %v6824_v20 = vpop.f32.mrb[7].mxu1 }
 0x1df   : > { %v480_v20 = vld [vmem:[%s10956_s1 + $0x60] sm:$0xff] }
 0x1e0   : > { %7254 = vmatmul.mubr.msk.f32.gmra.mrb[56].mxu0 %vm636_vm2, %v9780_v13 }
 0x1e1   : > { %7258 = vmatprep.mubr.msk.f32.mxu0 %vm8485_vm1, %v8484_v1  ;;  %v9804_v21 = vpop.f32.mrb[8].mxu1 }
 0x1e2   : > { %v6827_v22 = vpop.f32.mrb[9].mxu1 }
 0x1e4   : > { %7259 = vmatmul.mubr.msk.f32.vlgmr.msra.gmra.mrb[0].mxu0 %vm636_vm2, %v8969_v50 }
 0x1e5   : > { %7261 = vmatprep.mubr.msk.f32.mxu0 %vm8485_vm1, %v8484_v1  ;;  %7346 = vmatpush3.msk.msra.mxu0 %vm724_vm0, %v5845_v17  ;;  %v9810_v23 = vpop.f32.mrb[10].mxu1 }
 0x1e6   : > { %v6830_v24 = vpop.f32.mrb[11].mxu1 }
 0x1e8   : > { %7262 = vmatmul.mubr.msk.f32.gmra.mrb[2].mxu0 %vm636_vm2, %v8981_v52 }
 0x1e9   : > { %7264 = vmatprep.mubr.msk.f32.mxu0 %vm8485_vm1, %v8484_v1  ;;  %v9816_v25 = vpop.f32.mrb[12].mxu1 }
 0x1ea   : > { %v6833_v26 = vpop.f32.mrb[13].mxu1 }
 0x1eb   : > { %v482_v26 = vld [vmem:[%s10956_s1 + $0x70] sm:$0xff] }
 0x1ec   : > { %7265 = vmatmul.mubr.msk.f32.gmra.mrb[4].mxu0 %vm636_vm2, %v8992_v54  ;;  %v470_v54 = vld [vmem:[%s10956_s1 + $0x10] sm:$0xff] }
 0x1ed   : > { %7267 = vmatprep.mubr.msk.f32.mxu0 %vm8485_vm1, %v8484_v1  ;;  %v9822_v27 = vpop.f32.mrb[14].mxu1  ;;  %3289 = vperm.xlu1 %8463, %v470_v54   ;;  %v488_v54 = vld [vmem:[%s10956_s1 + $0xa0] sm:$0xff] }
 0x1ee   : > { %v6836_v28 = vpop.f32.mrb[15].mxu1 }
 0x1f0   : > { %7268 = vmatmul.mubr.msk.f32.gmra.mrb[6].mxu0 %vm636_vm2, %v9003_v56  ;;  %v472_v56 = vld [vmem:[%s10956_s1 + $0x20] sm:$0xff] }
 0x1f1   : > { %7270 = vmatprep.mubr.msk.f32.mxu0 %vm8485_vm1, %v8484_v1  ;;  %v9828_v29 = vpop.f32.mrb[16].mxu1  ;;  %3299 = vperm.xlu0 %8462, %v472_v56  }
 0x1f2   : > { %v6839_v30 = vpop.f32.mrb[17].mxu1 }
 0x1f4   : > { %7271 = vmatmul.mubr.msk.f32.gmra.mrb[8].mxu0 %vm636_vm2, %v9015_v58 }
 0x1f5   : > { %7273 = vmatprep.mubr.msk.f32.mxu0 %vm8485_vm1, %v8484_v1  ;;  %v9834_v31 = vpop.f32.mrb[18].mxu1 }
 0x1f6   : > { %v6842_v32 = vpop.f32.mrb[19].mxu1 }
 0x1f7   : > { %v484_v32 = vld [vmem:[%s10956_s1 + $0x80] sm:$0xff] }
 0x1f8   : > { %7274 = vmatmul.mubr.msk.f32.gmra.mrb[10].mxu0 %vm636_vm2, %v9026_v60 }
 0x1f9   : > { %7276 = vmatprep.mubr.msk.f32.mxu0 %vm8485_vm1, %v8484_v1  ;;  %v9843_v41 = vpop.f32.mrb[20].mxu1 }
 0x1fa   : > { %v6845_v44 = vpop.f32.mrb[21].mxu1 }
 0x1fb   : > { %v486_v44 = vld [vmem:[%s10956_s1 + $0x90] sm:$0xff] }
 0x1fc   : > { %7277 = vmatmul.mubr.msk.f32.gmra.mrb[12].mxu0 %vm636_vm2, %v9038_v62  ;;  %v471_v62 = vld [vmem:[%s10956_s1 + $0x18] sm:$0xff] }
 0x1fd   : > { %7279 = vmatprep.mubr.msk.f32.mxu0 %vm8485_vm1, %v8484_v1  ;;  %v9852_v50 = vpop.f32.mrb[22].mxu1  ;;  %3294 = vperm.xlu1 %8463, %v471_v62   ;;  %v11019_v62 = vld [vmem:[#allocation2_spill] sm:$0xff] }
 0x1fe   : > { %v6848_v52 = vpop.f32.mrb[23].mxu1 }
 0x200   : > { %7280 = vmatmul.mubr.msk.f32.gmra.mrb[14].mxu0 %vm636_vm2, %v9050_v0  ;;  %v474_v0 = vld [vmem:[%s10956_s1 + $0x30] sm:$0xff] }
 0x201   : > { %7282 = vmatprep.mubr.msk.f32.mxu0 %vm8485_vm1, %v8484_v1  ;;  %v9864_v58 = vpop.f32.mrb[24].mxu1  ;;  %3309 = vperm.xlu0 %8462, %v474_v0   ;;  %v490_v0 = vld [vmem:[%s10956_s1 + $0xb0] sm:$0xff] }
 0x202   : > { %v6851_v60 = vpop.f32.mrb[25].mxu1 }
 0x204   : > { %7283 = vmatmul.mubr.msk.f32.gmra.mrb[16].mxu0 %vm636_vm2, %v9062_v3 }
 0x205   : > { %7285 = vmatprep.mubr.msk.f32.mxu0 %vm8485_vm1, %v8484_v1  ;;  %v9876_v3 = vpop.f32.mrb[26].mxu1  ;;  %3319 = vperm.xlu0 %8462, %v476_v6   ;;  %v489_v6 = vld [vmem:[%s10956_s1 + $0xa8] sm:$0xff] }
 0x208   : > { %7286 = vmatmul.mubr.msk.f32.gmra.mrb[18].mxu0 %vm636_vm2, %v9074_v7  ;;  %v6854_v7 = vpop.f32.mrb[27].mxu1 }
 0x209   : > { %7288 = vmatprep.mubr.msk.f32.mxu0 %vm8485_vm1, %v8484_v1  ;;  %v9888_v4 = vpop.f32.mrb[28].mxu1  ;;  %3329 = vperm.xlu0 %8462, %v478_v15  }
 0x20a   : > { %v6857_v10 = vpop.f32.mrb[29].mxu1 }
 0x20b   : > { %v492_v10 = vld [vmem:[%s10956_s1 + $0xc0] sm:$0xff] }
 0x20c   : > { %7289 = vmatmul.mubr.msk.f32.gmra.mrb[20].mxu0 %vm636_vm2, %v9086_v34  ;;  %v473_v34 = vld [vmem:[%s10956_s1 + $0x28] sm:$0xff] }
 0x20d   : > { %7291 = vmatprep.mubr.msk.f32.mxu0 %vm8485_vm1, %v8484_v1  ;;  %3304 = vperm.xlu1 %8463, %v473_v34   ;;  %v9900_v17 = vpop.f32.mrb[30].mxu1 }
 0x20e   : > { %v6860_v18 = vpop.f32.mrb[31].mxu1  ;;  %3339 = vperm.xlu0 %8462, %v480_v20  }
 0x20f   : > { %v494_v18 = vld [vmem:[%s10956_s1 + $0xd0] sm:$0xff] }
 0x210   : > { %7292 = vmatmul.mubr.msk.f32.gmra.mrb[22].mxu0 %vm636_vm2, %v9098_v37  ;;  %v475_v37 = vld [vmem:[%s10956_s1 + $0x38] sm:$0xff] }
 0x211   : > { %7294 = vmatprep.mubr.msk.f32.mxu0 %vm8485_vm1, %v8484_v1  ;;  %3314 = vperm.xlu1 %8463, %v475_v37   ;;  %v9912_v22 = vpop.f32.mrb[32].mxu1 }
 0x212   : > { %v6863_v24 = vpop.f32.mrb[33].mxu1  ;;  %3349 = vperm.xlu0 %8462, %v482_v26  }
 0x213   : > { %v496_v24 = vld [vmem:[%s10956_s1 + $0xe0] sm:$0xff] }
 0x214   : > { %7295 = vmatmul.mubr.msk.f32.gmra.mrb[24].mxu0 %vm636_vm2, %v9110_v43  ;;  %v477_v43 = vld [vmem:[%s10956_s1 + $0x48] sm:$0xff] }
 0x215   : > { %7297 = vmatprep.mubr.msk.f32.mxu0 %vm8485_vm1, %v8484_v1  ;;  %3324 = vperm.xlu1 %8463, %v477_v43   ;;  %v9924_v28 = vpop.f32.mrb[34].mxu1 }
 0x216   : > { %v6866_v30 = vpop.f32.mrb[35].mxu1  ;;  %3359 = vperm.xlu0 %8462, %v484_v32  }
 0x218   : > { %7298 = vmatmul.mubr.msk.f32.gmra.mrb[26].mxu0 %vm636_vm2, %v9122_v47  ;;  %v479_v47 = vld [vmem:[%s10956_s1 + $0x58] sm:$0xff] }
 0x219   : > { %7300 = vmatprep.mubr.msk.f32.mxu0 %vm8485_vm1, %v8484_v1  ;;  %3334 = vperm.xlu1 %8463, %v479_v47   ;;  %v9936_v33 = vpop.f32.mrb[36].mxu1 }
 0x21a   : > { %v6869_v36 = vpop.f32.mrb[37].mxu1  ;;  %3369 = vperm.xlu0 %8462, %v486_v44   ;;  %v11020_v44 = vld [vmem:[#allocation3_spill] sm:$0xff] }
 0x21c   : > { %7301 = vmatmul.mubr.msk.f32.gmra.mrb[28].mxu0 %vm636_vm2, %v9134_v49  ;;  %v481_v49 = vld [vmem:[%s10956_s1 + $0x68] sm:$0xff] }
 0x21d   : > { %7303 = vmatprep.mubr.msk.f32.mxu0 %vm8485_vm1, %v8484_v1  ;;  %3344 = vperm.xlu1 %8463, %v481_v49   ;;  %v9948_v45 = vpop.f32.mrb[38].mxu1 }
 0x21e   : > { %v6872_v52 = vpop.f32.mrb[39].mxu1  ;;  %3379 = vperm.xlu0 %8462, %v488_v54  }
 0x220   : > { %7304 = vmatmul.mubr.msk.f32.gmra.mrb[30].mxu0 %vm636_vm2, %v9146_v53  ;;  %v483_v53 = vld [vmem:[%s10956_s1 + $0x78] sm:$0xff] }
 0x221   : > { %7306 = vmatprep.mubr.msk.f32.mxu0 %vm8485_vm1, %v8484_v1  ;;  %3354 = vperm.xlu1 %8463, %v483_v53   ;;  %v9960_v56 = vpop.f32.mrb[40].mxu1 }
 0x222   : > { %v6875_v60 = vpop.f32.mrb[41].mxu1  ;;  %3389 = vperm.xlu0 %8462, %v490_v0  }
 0x223   : > { %v11022_v60 = vrot.slane %v9265_v38, 1  ;;  %v10178_v38 = vld [vmem:[%s10959_s4] ss:$0 sm:$0xff] }
 0x224   : > { %7307 = vmatmul.mubr.msk.f32.gmra.mrb[32].mxu0 %vm636_vm2, %v9158_v57  ;;  %v485_v57 = vld [vmem:[%s10956_s1 + $0x88] sm:$0xff] }
 0x225   : > { %7309 = vmatprep.mubr.msk.f32.mxu0 %vm8485_vm1, %v8484_v1  ;;  %3364 = vperm.xlu1 %8463, %v485_v57   ;;  %v9972_v7 = vpop.f32.mrb[42].mxu1  ;;  %v10039_v57 = vld [vmem:[%s8594_s22 + $0x108] sm:$0xff] }
 0x226   : > { %v6878_v34 = vpop.f32.mrb[43].mxu1  ;;  %3399 = vperm.xlu0 %8462, %v492_v10   ;;  %v11025_v10 = vld [vmem:[#allocation7_spill] sm:$0xff] }
 0x227   : > { %v11023_v34 = vld [vmem:[#allocation5_spill] sm:$0xff] }
 0x228   : > { %7310 = vmatmul.mubr.msk.f32.gmra.mrb[34].mxu0 %vm636_vm2, %v9170_v61  ;;  %v487_v61 = vld [vmem:[%s10956_s1 + $0x98] sm:$0xff] }
 0x229   : > { %7312 = vmatprep.mubr.msk.f32.mxu0 %vm8485_vm1, %v8484_v1  ;;  %3374 = vperm.xlu1 %8463, %v487_v61   ;;  %v9984_v37 = vpop.f32.mrb[44].mxu1  ;;  %v2686_v61 = vrot.slane %v10039_v57, 1 }
 0x22a   : > { %v6881_v15 = vpop.f32.mrb[45].mxu1  ;;  %3409 = vperm.xlu0 %8462, %v494_v18   ;;  %v11028_v18 = vld [vmem:[#allocation10_spill] sm:$0xff] }
 0x22b   : > { %v11026_v15 = vld [vmem:[#allocation8_spill] sm:$0xff] }
 0x22c   : > { %7313 = vmatmul.mubr.msk.f32.gmra.mrb[36].mxu0 %vm636_vm2, %v11019_v62 }
 0x22d   : > { %7315 = vmatprep.mubr.msk.f32.mxu0 %vm8485_vm1, %v8484_v1  ;;  %3384 = vperm.xlu1 %8463, %v489_v6   ;;  %v9996_v43 = vpop.f32.mrb[46].mxu1  ;;  %v11024_v6 = vld [vmem:[#allocation6_spill] sm:$0xff] }
 0x22e   : > { %v6884_v20 = vpop.f32.mrb[47].mxu1  ;;  %3419 = vperm.xlu0 %8462, %v496_v24   ;;  %v11031_v24 = vld [vmem:[#allocation13_spill] sm:$0xff] }
 0x22f   : > { %v11029_v20 = vld [vmem:[#allocation11_spill] sm:$0xff] }
 0x230   : > { %7316 = vmatmul.mubr.msk.f32.gmra.mrb[38].mxu0 %vm636_vm2, %v9194_v8  ;;  %v491_v8 = vld [vmem:[%s10956_s1 + $0xb8] sm:$0xff] }
 0x231   : > { %7318 = vmatprep.mubr.msk.f32.mxu0 %vm8485_vm1, %v8484_v1  ;;  %3394 = vperm.xlu1 %8463, %v491_v8   ;;  %v10008_v47 = vpop.f32.mrb[48].mxu1  ;;  %v11027_v8 = vld [vmem:[#allocation9_spill] sm:$0xff] }
 0x232   : > { %v6887_v26 = vpop.f32.mrb[49].mxu1 }
 0x233   : > { %v11032_v26 = vld [vmem:[#allocation14_spill] sm:$0xff] }
 0x234   : > { %7319 = vmatmul.mubr.msk.f32.gmra.mrb[40].mxu0 %vm636_vm2, %v9206_v40  ;;  %v493_v40 = vld [vmem:[%s10956_s1 + $0xc8] sm:$0xff] }
 0x235   : > { %7321 = vmatprep.mubr.msk.f32.mxu0 %vm8485_vm1, %v8484_v1  ;;  %3404 = vperm.xlu1 %8463, %v493_v40   ;;  %v10017_v30 = vpop.f32.mrb[50].mxu1  ;;  %v11030_v40 = vld [vmem:[#allocation12_spill] sm:$0xff] }
 0x236   : > { %v6890_v49 = vpop.f32.mrb[51].mxu1 }
 0x237   : > { %v11034_v49 = vld [vmem:[#allocation16_spill] sm:$0xff] }
 0x238   : > { %7322 = vmatmul.mubr.msk.f32.gmra.mrb[42].mxu0 %vm636_vm2, %v9218_v48  ;;  %v495_v48 = vld [vmem:[%s10956_s1 + $0xd8] sm:$0xff] }
 0x239   : > { %7324 = vmatprep.mubr.msk.f32.mxu0 %vm8485_vm1, %v8484_v1  ;;  %3414 = vperm.xlu1 %8463, %v495_v48   ;;  %v10023_v32 = vpop.f32.mrb[52].mxu1  ;;  %v11033_v48 = vld [vmem:[#allocation15_spill] sm:$0xff] }
 0x23c   : > { %7325 = vmatmul.mubr.msk.f32.gmra.mrb[44].mxu0 %vm636_vm2, %v9230_v55  ;;  %v6893_v55 = vpop.f32.mrb[53].mxu1 }
 0x23d   : > { %7327 = vmatprep.mubr.msk.f32.mxu0 %vm8485_vm1, %v8484_v1  ;;  %v10029_v36 = vpop.f32.mrb[54].mxu1  ;;  %v11035_v55 = vld [vmem:[#allocation17_spill] sm:$0xff] }
 0x23e   : > { %v6896_v53 = vpop.f32.mrb[55].mxu1 }
 0x23f   : > { %v11036_v53 = vld [vmem:[#allocation18_spill] sm:$0xff] }
 0x240   : > { %7328 = vmatmul.mubr.msk.f32.gmra.mrb[46].mxu0 %vm636_vm2, %v9245_v46  ;;  %v2684_v46 = vrot.slane %v9780_v13, 1 }
 0x241   : > { %7330 = vmatprep.mubr.msk.f32.mxu0 %vm8485_vm1, %v8484_v1  ;;  %v10036_v52 = vpop.f32.mrb[56].mxu1 }
 0x242   : > { %v6899_v54 = vpop.f32.mrb[57].mxu1  ;;  %v2685_v62 = vsel %vm968_vm3, %v11022_v60, %v2684_v46  ;;  %v2687_v0 = vsel %vm968_vm3, %v2684_v46, %v2686_v61  ;;  %v11038_v46 = vld [vmem:[#allocation20_spill] sm:$0xff]  ;;  %v11041_v60 = vld [vmem:[#allocation23_spill] sm:$0xff]  ;;  %v7849_v61 = vadd.f32 %v10178_v38, %v9782_v14 }
 0x243   : > { %v11039_v54 = vld [vmem:[#allocation21_spill] sm:$0xff] }
 0x244   : > { %7331 = vmatmul.mubr.msk.f32.gmra.mrb[48].mxu0 %vm636_vm2, %v9262_v51  ;;  %v11021_v51 = vld [vmem:[#allocation4_spill] sm:$0xff] }
 0x245   : > { %7333 = vmatprep.mubr.msk.f32.mxu0 %vm8485_vm1, %v8484_v1 }
 0x248   : > { %7334 = vmatmul.mubr.msk.f32.gmra.mrb[50].mxu0 %vm636_vm2, %v11020_v44  ;;  %v11037_v44 = vld [vmem:[#allocation19_spill] sm:$0xff] }
 0x249   : > { %7336 = vmatprep.mubr.msk.f32.mxu0 %vm8485_vm1, %v8484_v1 }
 0x24c   : > { %7337 = vmatmul.mubr.msk.f32.gmra.mrb[52].mxu0 %vm636_vm2, %v11021_v51  ;;  %v11040_v51 = vld [vmem:[#allocation22_spill] sm:$0xff] }
 0x24d   : > { %7339 = vmatprep.mubr.msk.f32.mxu0 %vm8485_vm1, %v8484_v1 }
 0x250   : > { %7340 = vmatmul.mubr.msk.f32.gmra.mrb[54].mxu0 %vm636_vm2, %v2685_v62 }
 0x251   : > { %7342 = vmatprep.mubr.msk.f32.mxu0 %vm8485_vm1, %v8484_v1 }
 0x254   : > { %7343 = vmatmul.mubr.msk.f32.gmra.mrb[56].mxu0 %vm636_vm2, %v2687_v0 }
 0x255   : > { %7347 = vmatprep.mubr.msk.f32.mxu0 %vm8485_vm1, %v8484_v1 }
 0x258   : > { %7348 = vmatmul.mubr.msk.f32.vlgmr.msra.gmra.mrb[0].mxu0 %vm636_vm2, %v11023_v34 }
 0x259   : > { %7350 = vmatprep.mubr.msk.f32.mxu0 %vm8485_vm1, %v8484_v1 }
 0x25c   : > { %7351 = vmatmul.mubr.msk.f32.gmra.mrb[2].mxu0 %vm636_vm2, %v11024_v6 }
 0x25d   : > { %7353 = vmatprep.mubr.msk.f32.mxu0 %vm8485_vm1, %v8484_v1 }
 0x260   : > { %7354 = vmatmul.mubr.msk.f32.gmra.mrb[4].mxu0 %vm636_vm2, %v11025_v10 }
 0x261   : > { %7356 = vmatprep.mubr.msk.f32.mxu0 %vm8485_vm1, %v8484_v1 }
 0x264   : > { %7357 = vmatmul.mubr.msk.f32.gmra.mrb[6].mxu0 %vm636_vm2, %v11026_v15  ;;  %v7851_v15 = vadd.f32 %v10178_v38, %v9788_v16 }
 0x265   : > { %7359 = vmatprep.mubr.msk.f32.mxu0 %vm8485_vm1, %v8484_v1 }
 0x268   : > { %7360 = vmatmul.mubr.msk.f32.gmra.mrb[8].mxu0 %vm636_vm2, %v11027_v8 }
 0x269   : > { %7362 = vmatprep.mubr.msk.f32.mxu0 %vm8485_vm1, %v8484_v1 }
 0x26c   : > { %7363 = vmatmul.mubr.msk.f32.gmra.mrb[10].mxu0 %vm636_vm2, %v11028_v18 }
 0x26d   : > { %7365 = vmatprep.mubr.msk.f32.mxu0 %vm8485_vm1, %v8484_v1 }
 0x270   : > { %7366 = vmatmul.mubr.msk.f32.gmra.mrb[12].mxu0 %vm636_vm2, %v11029_v20 }
 0x271   : > { %7368 = vmatprep.mubr.msk.f32.mxu0 %vm8485_vm1, %v8484_v1 }
 0x274   : > { %7369 = vmatmul.mubr.msk.f32.gmra.mrb[14].mxu0 %vm636_vm2, %v11030_v40 }
 0x275   : > { %7371 = vmatprep.mubr.msk.f32.mxu0 %vm8485_vm1, %v8484_v1 }
 0x278   : > { %7372 = vmatmul.mubr.msk.f32.gmra.mrb[16].mxu0 %vm636_vm2, %v11031_v24  ;;  %v3290_v24 = vpop.permute.xlu1 %3289 }
 0x279   : > { %7374 = vmatprep.mubr.msk.f32.mxu0 %vm8485_vm1, %v8484_v1 }
 0x27c   : > { %7375 = vmatmul.mubr.msk.f32.gmra.mrb[18].mxu0 %vm636_vm2, %v11032_v26 }
 0x27d   : > { %7377 = vmatprep.mubr.msk.f32.mxu0 %vm8485_vm1, %v8484_v1 }
 0x280   : > { %7378 = vmatmul.mubr.msk.f32.gmra.mrb[20].mxu0 %vm636_vm2, %v11033_v48 }
 0x281   : > { %7380 = vmatprep.mubr.msk.f32.mxu0 %vm8485_vm1, %v8484_v1 }
 0x284   : > { %7381 = vmatmul.mubr.msk.f32.gmra.mrb[22].mxu0 %vm636_vm2, %v11034_v49 }
 0x285   : > { %7383 = vmatprep.mubr.msk.f32.mxu0 %vm8485_vm1, %v8484_v1 }
 0x288   : > { %7384 = vmatmul.mubr.msk.f32.gmra.mrb[24].mxu0 %vm636_vm2, %v11035_v55  ;;  %v7853_v55 = vadd.f32 %v10178_v38, %v9798_v19 }
 0x289   : > { %7386 = vmatprep.mubr.msk.f32.mxu0 %vm8485_vm1, %v8484_v1 }
 0x28c   : > { %7387 = vmatmul.mubr.msk.f32.gmra.mrb[26].mxu0 %vm636_vm2, %v11036_v53 }
 0x28d   : > { %7389 = vmatprep.mubr.msk.f32.mxu0 %vm8485_vm1, %v8484_v1 }
 0x290   : > { %7390 = vmatmul.mubr.msk.f32.gmra.mrb[28].mxu0 %vm636_vm2, %v11037_v44 }
 0x291   : > { %7392 = vmatprep.mubr.msk.f32.mxu0 %vm8485_vm1, %v8484_v1 }
 0x294   : > { %7393 = vmatmul.mubr.msk.f32.gmra.mrb[30].mxu0 %vm636_vm2, %v11038_v46 }
 0x295   : > { %7395 = vmatprep.mubr.msk.f32.mxu0 %vm8485_vm1, %v8484_v1 }
 0x298   : > { %7396 = vmatmul.mubr.msk.f32.gmra.mrb[32].mxu0 %vm636_vm2, %v11039_v54 }
 0x299   : > { %7398 = vmatprep.mubr.msk.f32.mxu0 %vm8485_vm1, %v8484_v1 }
 0x29c   : > { %7399 = vmatmul.mubr.msk.f32.gmra.mrb[34].mxu0 %vm636_vm2, %v11040_v51 }
 0x29d   : > { %7401 = vmatprep.mubr.msk.f32.mxu0 %vm8485_vm1, %v8484_v1 }
 0x2a0   : > { %7402 = vmatmul.mubr.msk.f32.gmra.mrb[36].mxu0 %vm636_vm2, %v11041_v60 }
 0x2a1   : > { %7404 = vmatprep.mubr.msk.f32.mxu0 %vm8485_vm1, %v8484_v1 }
 0x2a4   : > { %7405 = vmatmul.mubr.msk.f32.gmra.mrb[38].mxu0 %vm636_vm2, %v9554_v42 }
 0x2a5   : > { %7407 = vmatprep.mubr.msk.f32.mxu0 %vm8485_vm1, %v8484_v1 }
 0x2a8   : > { %7408 = vmatmul.mubr.msk.f32.gmra.mrb[40].mxu0 %vm636_vm2, %v9566_v59  ;;  %v8487_v59 = vmov 0.0|0.0  }
 0x2a9   : > { %7410 = vmatprep.mubr.msk.f32.mxu0 %vm8485_vm1, %v8484_v1  ;;  %7739 = vmatprep.subr.bf16.mxu1 %v8487_v59 }
 0x2ac   : > { %7411 = vmatmul.mubr.msk.f32.gmra.mrb[42].mxu0 %vm636_vm2, %v9578_v11  ;;  %v498_v11 = vld [vmem:[%s10957_s2 + $0x8] sm:$0xff] }
 0x2ad   : > { %7413 = vmatprep.mubr.msk.f32.mxu0 %vm8485_vm1, %v8484_v1  ;;  %6150 = vmatprep.mubr.msk.f32.mxu1 %vm3643_vm5, %v498_v11 }
 0x2b0   : > { %7414 = vmatmul.mubr.msk.f32.gmra.mrb[44].mxu0 %vm636_vm2, %v9590_v35  ;;  %v2934_v35 = vrot.slane %v9780_v13, 2  ;;  %v3280_v13 = vpop.permute.xlu0 %3279 }
 0x2b1   : > { %7416 = vmatprep.mubr.msk.f32.mxu0 %vm8485_vm1, %v8484_v1 }
 0x2b4   : > { %7417 = vmatmul.mubr.msk.f32.gmra.mrb[46].mxu0 %vm636_vm2, %v9603_v5  ;;  %v2935_v5 = vsel %vm1328_vm4, %v2188_v63, %v2934_v35  ;;  %v7847_v63 = vadd.f32 %v10178_v38, %v9773_v9  ;;  %v3285_v8 = vpop.permute.xlu0 %3284 }
 0x2b5   : > { %7419 = vmatprep.mubr.msk.f32.mxu0 %vm8485_vm1, %v8484_v1 }
 0x2b8   : > { %7420 = vmatmul.mubr.msk.f32.gmra.mrb[48].mxu0 %vm636_vm2, %v9615_v2  ;;  %v2936_v2 = vrot.slane %v10039_v57, 2 }
 0x2b9   : > { %7422 = vmatprep.mubr.msk.f32.mxu0 %vm8485_vm1, %v8484_v1 }
 0x2ba   : > { %v2937_v42 = vsel %vm1328_vm4, %v2934_v35, %v2936_v2  ;;  %v7855_v2 = vadd.f32 %v10178_v38, %v9804_v21 }
 0x2bc   : > { %7423 = vmatmul.mubr.msk.f32.gmra.mrb[50].mxu0 %vm636_vm2, %v9626_v39  ;;  %v10188_v39 = vld [vmem:[%s10960_s5] ss:$0 sm:$0xff] }
 0x2bd   : > { %7425 = vmatprep.mubr.msk.f32.mxu0 %vm8485_vm1, %v8484_v1 }
 0x2c0   : > { %7426 = vmatmul.mubr.msk.f32.gmra.mrb[52].mxu0 %vm636_vm2, %v9640_v12 }
 0x2c1   : > { %7428 = vmatprep.mubr.msk.f32.mxu0 %vm8485_vm1, %v8484_v1 }
 0x2c4   : > { %7429 = vmatmul.mubr.msk.f32.gmra.mrb[54].mxu0 %vm636_vm2, %v2935_v5 }
 0x2c5   : > { %7431 = vmatprep.mubr.msk.f32.mxu0 %vm8485_vm1, %v8484_v1 }
 0x2c8   : > { %7432 = vmatmul.mubr.msk.f32.gmra.mrb[56].mxu0 %vm636_vm2, %v2937_v42  ;;  %v3295_v42 = vpop.permute.xlu1 %3294 }
 0x32b   : > { %v3011_v12 = vpop.f32.mrb[0].mxu0 }
 0x32c   : > { %v7848_v57 = vadd.f32 %v7847_v63, %v3011_v12  ;;  %v7349_v62 = vpop.f32.mrb[1].mxu0 }
 0x32e   : > { %vm3184_vm6 = vcmp.ge.f32.partialorder %v7848_v57, 0.0  ;;  %v3219_v9 = vmul.f32 %v7848_v57, %v10188_v39 }
 0x32f   : > { %v3016_v0 = vpop.f32.mrb[2].mxu0 }
 0x330   : > { %v3248_v34 = vsel %vm3184_vm6, %v7848_v57, %v3219_v9  ;;  %v7850_v6 = vadd.f32 %v7849_v61, %v3016_v0  ;;  %v7352_v10 = vpop.f32.mrb[3].mxu0 }
 0x331   : > { %v3422_v20 = vadd.f32 %v3280_v13, %v3248_v34  ;;  %v7857_v34 = vadd.f32 %v10178_v38, %v9810_v23 }
 0x332   : > { %vm3185_vm7 = vcmp.ge.f32.partialorder %v7850_v6, 0.0  ;;  %v3220_v18 = vmul.f32 %v7850_v6, %v10188_v39 }
 0x333   : > { %v3021_v40 = vpop.f32.mrb[4].mxu0  ;;  %v3478_v44 = vrot.slane %v3422_v20, 1 }
 0x334   : > { %v3249_v26 = vsel %vm3185_vm7, %v7850_v6, %v3220_v18  ;;  %v7852_v48 = vadd.f32 %v7851_v15, %v3021_v40  ;;  %v7355_v14 = vpop.f32.mrb[5].mxu0 }
 0x335   : > { %v3423_v49 = vadd.f32 %v3285_v8, %v3249_v26  ;;  %v3300_v8 = vpop.permute.xlu0 %3299  ;;  %v7859_v26 = vadd.f32 %v10178_v38, %v9816_v25 }
 0x336   : > { %vm3186_vm8 = vcmp.ge.f32.partialorder %v7852_v48, 0.0  ;;  %v3221_v53 = vmul.f32 %v7852_v48, %v10188_v39 }
 0x337   : > { %v3479_v46 = vrot.slane %v3423_v49, 1  ;;  %v3026_v16 = vpop.f32.mrb[6].mxu0 }
 0x338   : > { %v3250_v54 = vsel %vm3186_vm8, %v7852_v48, %v3221_v53  ;;  %v7854_v51 = vadd.f32 %v7853_v55, %v3026_v16  ;;  %v7358_v60 = vpop.f32.mrb[7].mxu0 }
 0x339   : > { %v3480_v35 = vsel %vm968_vm3, %v3478_v44, %v3479_v46  ;;  %v3424_v5 = vadd.f32 %v3290_v24, %v3250_v54 }
 0x33a   : > { %v3557_v63 = vmax.f32 %v3422_v20, %v3480_v35  ;;  %vm3187_vm9 = vcmp.ge.f32.partialorder %v7854_v51, 0.0  ;;  %v3222_v19 = vmul.f32 %v7854_v51, %v10188_v39  ;;  %v7861_v35 = vadd.f32 %v10178_v38, %v9822_v27 }
 0x33b   : > { %v3481_v11 = vrot.slane %v3424_v5, 1  ;;  %v3031_v12 = vpop.f32.mrb[8].mxu0 }
 0x33c   : > { %v3583_v13 = vmax.f32 %v3557_v63, %v3424_v5  ;;  %v3251_v57 = vsel %vm3187_vm9, %v7854_v51, %v3222_v19  ;;  %v7856_v62 = vadd.f32 %v7855_v2, %v3031_v12  ;;  %v7361_v61 = vpop.f32.mrb[9].mxu0  ;;  %v3310_v12 = vpop.permute.xlu0 %3309 }
 0x33d   : > { %v3425_v9 = vadd.f32 %v3295_v42, %v3251_v57  ;;  %v3482_v0 = vsel %vm968_vm3, %v3479_v46, %v3481_v11  ;;  %v3305_v46 = vpop.permute.xlu1 %3304 }
 0x33e   : > { %v3558_v6 = vmax.f32 %v3423_v49, %v3482_v0  ;;  %vm3188_vm10 = vcmp.ge.f32.partialorder %v7856_v62, 0.0  ;;  %v3223_v21 = vmul.f32 %v7856_v62, %v10188_v39 }
 0x33f   : > { %v3483_v10 = vrot.slane %v3425_v9, 1  ;;  %v3036_v15 = vpop.f32.mrb[10].mxu0 }
 0x340   : > { %v3584_v18 = vmax.f32 %v3558_v6, %v3425_v9  ;;  %v3252_v20 = vsel %vm3188_vm10, %v7856_v62, %v3223_v21  ;;  %v7858_v40 = vadd.f32 %v7857_v34, %v3036_v15  ;;  %v7364_v24 = vpop.f32.mrb[11].mxu0  ;;  %v7863_v34 = vadd.f32 %v10178_v38, %v9828_v29 }
 0x341   : > { %v3426_v48 = vadd.f32 %v3300_v8, %v3252_v20  ;;  %v3484_v14 = vsel %vm968_vm3, %v3481_v11, %v3483_v10  ;;  %v7865_v29 = vadd.f32 %v10178_v38, %v9834_v31 }
 0x342   : > { %v3559_v55 = vmax.f32 %v3424_v5, %v3484_v14  ;;  %vm3189_vm11 = vcmp.ge.f32.partialorder %v7858_v40, 0.0  ;;  %v3224_v23 = vmul.f32 %v7858_v40, %v10188_v39  ;;  %v3617_v49 = vmax.f32 %v3583_v13, %v3484_v14 }
 0x343   : > { %v3485_v53 = vrot.slane %v3426_v48, 1  ;;  %v3041_v44 = vpop.f32.mrb[12].mxu0 }
 0x344   : > { %v3585_v16 = vmax.f32 %v3559_v55, %v3426_v48  ;;  %v3253_v54 = vsel %vm3189_vm11, %v7858_v40, %v3224_v23  ;;  %v7860_v51 = vadd.f32 %v7859_v26, %v3041_v44  ;;  %v7367_v60 = vpop.f32.mrb[13].mxu0 }
 0x345   : > { %v3427_v2 = vadd.f32 %v3305_v46, %v3253_v54  ;;  %v3486_v25 = vsel %vm968_vm3, %v3483_v10, %v3485_v53  ;;  %v3320_v46 = vpop.permute.xlu0 %3319 }
 0x346   : > { %v3560_v42 = vmax.f32 %v3425_v9, %v3486_v25  ;;  %vm3190_vm12 = vcmp.ge.f32.partialorder %v7860_v51, 0.0  ;;  %v3225_v5 = vmul.f32 %v7860_v51, %v10188_v39  ;;  %v3618_v63 = vmax.f32 %v3584_v18, %v3486_v25  ;;  %v3315_v18 = vpop.permute.xlu1 %3314 }
 0x347   : > { %v3487_v19 = vrot.slane %v3427_v2, 1  ;;  %v3046_v11 = vpop.f32.mrb[14].mxu0  ;;  %v7867_v25 = vadd.f32 %v10178_v38, %v9843_v41  ;;  %v7869_v41 = vadd.f32 %v10178_v38, %v9852_v50 }
 0x348   : > { %v3586_v13 = vmax.f32 %v3560_v42, %v3427_v2  ;;  %v3254_v57 = vsel %vm3190_vm12, %v7860_v51, %v3225_v5  ;;  %v7862_v62 = vadd.f32 %v7861_v35, %v3046_v11  ;;  %v7370_v61 = vpop.f32.mrb[15].mxu0  ;;  %v7740_v0 = vpack.c.bf16 %v3618_v63, %v3617_v49 }
 0x349   : > { %v3428_v27 = vadd.f32 %v3310_v12, %v3254_v57  ;;  %v3488_v6 = vsel %vm968_vm3, %v3485_v53, %v3487_v19 }
 0x34a   : > { %v3561_v21 = vmax.f32 %v3426_v48, %v3488_v6  ;;  %vm3191_vm13 = vcmp.ge.f32.partialorder %v7862_v62, 0.0  ;;  %v3226_v9 = vmul.f32 %v7862_v62, %v10188_v39  ;;  %7741 = vmatpush1.bf16.msra.mxu1 %v7740_v0  ;;  %v3619_v10 = vmax.f32 %v3585_v16, %v3488_v6  ;;  %v3325_v12 = vpop.permute.xlu1 %3324 }
 0x34b   : > { %v3489_v15 = vrot.slane %v3428_v27, 1  ;;  %v3051_v8 = vpop.f32.mrb[16].mxu0  ;;  %7742 = vmatprep.subr.bf16.mxu1 %v8487_v59 }
 0x34c   : > { %v3587_v20 = vmax.f32 %v3561_v21, %v3428_v27  ;;  %v3255_v40 = vsel %vm3191_vm13, %v7862_v62, %v3226_v9  ;;  %v7864_v24 = vadd.f32 %v7863_v34, %v3051_v8  ;;  %v7373_v26 = vpop.f32.mrb[17].mxu0 }
 0x34d   : > { %v3429_v14 = vadd.f32 %v3315_v18, %v3255_v40  ;;  %v3490_v48 = vsel %vm968_vm3, %v3487_v19, %v3489_v15  ;;  %v7871_v26 = vadd.f32 %v10178_v38, %v9864_v58  ;;  %v7873_v58 = vadd.f32 %v10178_v38, %v9876_v3 }
 0x34e   : > { %v3562_v55 = vmax.f32 %v3427_v2, %v3490_v48  ;;  %vm3192_vm14 = vcmp.ge.f32.partialorder %v7864_v24, 0.0  ;;  %v3227_v23 = vmul.f32 %v7864_v24, %v10188_v39  ;;  %v3620_v49 = vmax.f32 %v3586_v13, %v3490_v48 }
 0x34f   : > { %v3491_v53 = vrot.slane %v3429_v14, 1  ;;  %v3056_v44 = vpop.f32.mrb[18].mxu0 }
 0x350   : > { %v3588_v16 = vmax.f32 %v3562_v55, %v3429_v14  ;;  %v3256_v54 = vsel %vm3192_vm14, %v7864_v24, %v3227_v23  ;;  %v7866_v51 = vadd.f32 %v7865_v29, %v3056_v44  ;;  %v7376_v60 = vpop.f32.mrb[19].mxu0  ;;  %v7743_v35 = vpack.c.bf16 %v3620_v49, %v3619_v10 }
 0x351   : > { %v3430_v31 = vadd.f32 %v3320_v46, %v3256_v54  ;;  %v3492_v42 = vsel %vm968_vm3, %v3489_v15, %v3491_v53  ;;  %v3330_v15 = vpop.permute.xlu0 %3329 }
 0x352   : > { %v3563_v5 = vmax.f32 %v3428_v27, %v3492_v42  ;;  %vm3193_vm15 = vcmp.ge.f32.partialorder %v7866_v51, 0.0  ;;  %v3228_v2 = vmul.f32 %v7866_v51, %v10188_v39  ;;  %7744 = vmatpush1.bf16.msra.mxu1 %v7743_v35  ;;  %v3621_v63 = vmax.f32 %v3587_v20, %v3492_v42 }
 0x353   : > { %v3493_v19 = vrot.slane %v3430_v31, 1  ;;  %v3061_v11 = vpop.f32.mrb[20].mxu0  ;;  %7745 = vmatprep.subr.bf16.mxu1 %v8487_v59 }
 0x354   : > { %v3589_v13 = vmax.f32 %v3563_v5, %v3430_v31  ;;  %v3257_v57 = vsel %vm3193_vm15, %v7866_v51, %v3228_v2  ;;  %v7868_v62 = vadd.f32 %v7867_v25, %v3061_v11  ;;  %v7379_v61 = vpop.f32.mrb[21].mxu0 }
 0x355   : > { %v3431_v0 = vadd.f32 %v3325_v12, %v3257_v57  ;;  %v3494_v34 = vsel %vm968_vm3, %v3491_v53, %v3493_v19  ;;  %v3335_v53 = vpop.permute.xlu1 %3334  ;;  %v3340_v2 = vpop.permute.xlu0 %3339  ;;  %v7875_v57 = vadd.f32 %v10178_v38, %v9888_v4  ;;  %v7877_v4 = vadd.f32 %v10178_v38, %v9900_v17 }
 0x356   : > { %v3564_v27 = vmax.f32 %v3429_v14, %v3494_v34  ;;  %vm3194_vm0 = vcmp.ge.f32.partialorder %v7868_v62, 0.0  ;;  %v3229_v6 = vmul.f32 %v7868_v62, %v10188_v39  ;;  %v3622_v21 = vmax.f32 %v3588_v16, %v3494_v34 }
 0x357   : > { %v3495_v9 = vrot.slane %v3431_v0, 1  ;;  %v3066_v10 = vpop.f32.mrb[22].mxu0 }
 0x358   : > { %v3590_v8 = vmax.f32 %v3564_v27, %v3431_v0  ;;  %v3258_v18 = vsel %vm3194_vm0, %v7868_v62, %v3229_v6  ;;  %v7870_v20 = vadd.f32 %v7869_v41, %v3066_v10  ;;  %v7382_v40 = vpop.f32.mrb[23].mxu0  ;;  %v7746_v24 = vpack.c.bf16 %v3622_v21, %v3621_v63 }
 0x359   : > { %v3432_v50 = vadd.f32 %v3330_v15, %v3258_v18  ;;  %v3496_v29 = vsel %vm968_vm3, %v3493_v19, %v3495_v9  ;;  %v3345_v6 = vpop.permute.xlu1 %3344 }
 0x35a   : > { %v3565_v48 = vmax.f32 %v3430_v31, %v3496_v29  ;;  %vm3195_vm2 = vcmp.ge.f32.partialorder %v7870_v20, 0.0  ;;  %v3230_v14 = vmul.f32 %v7870_v20, %v10188_v39  ;;  %7747 = vmatpush1.bf16.msra.mxu1 %v7746_v24  ;;  %v3623_v55 = vmax.f32 %v3589_v13, %v3496_v29  ;;  %v3350_v29 = vpop.permute.xlu0 %3349 }
 0x35b   : > { %v3497_v23 = vrot.slane %v3432_v50, 1  ;;  %v3071_v49 = vpop.f32.mrb[24].mxu0  ;;  %7748 = vmatprep.subr.bf16.mxu1 %v8487_v59 }
 0x35c   : > { %v3591_v44 = vmax.f32 %v3565_v48, %v3432_v50  ;;  %v3259_v46 = vsel %vm3195_vm2, %v7870_v20, %v3230_v14  ;;  %v7872_v16 = vadd.f32 %v7871_v26, %v3071_v49  ;;  %v7385_v54 = vpop.f32.mrb[25].mxu0 }
 0x35d   : > { %v3433_v51 = vadd.f32 %v3335_v53, %v3259_v46  ;;  %v3498_v60 = vsel %vm968_vm3, %v3495_v9, %v3497_v23  ;;  %v7879_v53 = vadd.f32 %v10178_v38, %v9912_v22  ;;  %v7881_v22 = vadd.f32 %v10178_v38, %v9924_v28 }
 0x35e   : > { %v3566_v35 = vmax.f32 %v3431_v0, %v3498_v60  ;;  %vm3196_vm6 = vcmp.ge.f32.partialorder %v7872_v16, 0.0  ;;  %v3231_v25 = vmul.f32 %v7872_v16, %v10188_v39  ;;  %v3624_v31 = vmax.f32 %v3590_v8, %v3498_v60  ;;  %v3355_v60 = vpop.permute.xlu1 %3354 }
 0x35f   : > { %v3499_v42 = vrot.slane %v3433_v51, 1  ;;  %v3076_v5 = vpop.f32.mrb[26].mxu0 }
 0x360   : > { %v3592_v63 = vmax.f32 %v3566_v35, %v3433_v51  ;;  %v3260_v19 = vsel %vm3196_vm6, %v7872_v16, %v3231_v25  ;;  %v7874_v11 = vadd.f32 %v7873_v58, %v3076_v5  ;;  %v7388_v12 = vpop.f32.mrb[27].mxu0  ;;  %v7749_v13 = vpack.c.bf16 %v3624_v31, %v3623_v55 }
 0x361   : > { %v3434_v3 = vadd.f32 %v3340_v2, %v3260_v19  ;;  %v3500_v62 = vsel %vm968_vm3, %v3497_v23, %v3499_v42 }
 0x362   : > { %v3567_v61 = vmax.f32 %v3432_v50, %v3500_v62  ;;  %vm3197_vm7 = vcmp.ge.f32.partialorder %v7874_v11, 0.0  ;;  %v3232_v41 = vmul.f32 %v7874_v11, %v10188_v39  ;;  %7750 = vmatpush1.bf16.msra.mxu1 %v7749_v13  ;;  %v3625_v0 = vmax.f32 %v3591_v44, %v3500_v62 }
 0x363   : > { %v3501_v34 = vrot.slane %v3434_v3, 1  ;;  %v3081_v27 = vpop.f32.mrb[28].mxu0  ;;  %7751 = vmatprep.subr.bf16.mxu1 %v8487_v59 }
 0x364   : > { %v3593_v21 = vmax.f32 %v3567_v61, %v3434_v3  ;;  %v3261_v9 = vsel %vm3197_vm7, %v7874_v11, %v3232_v41  ;;  %v7876_v10 = vadd.f32 %v7875_v57, %v3081_v27  ;;  %v7391_v15 = vpop.f32.mrb[29].mxu0  ;;  %v3360_v57 = vpop.permute.xlu0 %3359 }
 0x365   : > { %v3435_v8 = vadd.f32 %v3345_v6, %v3261_v9  ;;  %v3502_v18 = vsel %vm968_vm3, %v3499_v42, %v3501_v34 }
 0x366   : > { %v3568_v20 = vmax.f32 %v3433_v51, %v3502_v18  ;;  %vm3198_vm8 = vcmp.ge.f32.partialorder %v7876_v10, 0.0  ;;  %v3233_v40 = vmul.f32 %v7876_v10, %v10188_v39  ;;  %v3626_v24 = vmax.f32 %v3592_v63, %v3502_v18 }
 0x367   : > { %v3503_v26 = vrot.slane %v3435_v8, 1  ;;  %v3086_v50 = vpop.f32.mrb[30].mxu0 }
 0x368   : > { %v3594_v48 = vmax.f32 %v3568_v20, %v3435_v8  ;;  %v3262_v14 = vsel %vm3198_vm8, %v7876_v10, %v3233_v40  ;;  %v7878_v55 = vadd.f32 %v7877_v4, %v3086_v50  ;;  %v7394_v23 = vpop.f32.mrb[31].mxu0  ;;  %v7752_v49 = vpack.c.bf16 %v3626_v24, %v3625_v0  ;;  %v3365_v4 = vpop.permute.xlu1 %3364 }
 0x369   : > { %v3436_v17 = vadd.f32 %v3350_v29, %v3262_v14  ;;  %v3504_v44 = vsel %vm968_vm3, %v3501_v34, %v3503_v26  ;;  %v7883_v34 = vadd.f32 %v10178_v38, %v9936_v33  ;;  %v7885_v33 = vadd.f32 %v10178_v38, %v9948_v45  ;;  %v3370_v23 = vpop.permute.xlu0 %3369 }
 0x36a   : > { %v3569_v46 = vmax.f32 %v3434_v3, %v3504_v44  ;;  %vm3199_vm9 = vcmp.ge.f32.partialorder %v7878_v55, 0.0  ;;  %v3234_v16 = vmul.f32 %v7878_v55, %v10188_v39  ;;  %7753 = vmatpush1.bf16.msra.mxu1 %v7752_v49  ;;  %v3627_v54 = vmax.f32 %v3593_v21, %v3504_v44 }
 0x36b   : > { %v3505_v58 = vrot.slane %v3436_v17, 1  ;;  %v3091_v51 = vpop.f32.mrb[32].mxu0  ;;  %7754 = vmatprep.subr.bf16.mxu1 %v8487_v59 }
 0x36c   : > { %v3595_v35 = vmax.f32 %v3569_v46, %v3436_v17  ;;  %v3263_v25 = vsel %vm3199_vm9, %v7878_v55, %v3234_v16  ;;  %v7880_v31 = vadd.f32 %v7879_v53, %v3091_v51  ;;  %v7397_v42 = vpop.f32.mrb[33].mxu0  ;;  %v7887_v16 = vadd.f32 %v10178_v38, %v9960_v56 }
 0x36d   : > { %v3437_v5 = vadd.f32 %v3355_v60, %v3263_v25  ;;  %v3506_v2 = vsel %vm968_vm3, %v3503_v26, %v3505_v58  ;;  %v7889_v56 = vadd.f32 %v10178_v38, %v9972_v7 }
 0x36e   : > { %v3570_v63 = vmax.f32 %v3435_v8, %v3506_v2  ;;  %vm3200_vm10 = vcmp.ge.f32.partialorder %v7880_v31, 0.0  ;;  %v3235_v19 = vmul.f32 %v7880_v31, %v10188_v39  ;;  %v3628_v11 = vmax.f32 %v3594_v48, %v3506_v2 }
 0x36f   : > { %v3507_v12 = vrot.slane %v3437_v5, 1  ;;  %v3096_v13 = vpop.f32.mrb[34].mxu0 }
 0x370   : > { %v3596_v3 = vmax.f32 %v3570_v63, %v3437_v5  ;;  %v3264_v62 = vsel %vm3200_vm10, %v7880_v31, %v3235_v19  ;;  %v7882_v61 = vadd.f32 %v7881_v22, %v3096_v13  ;;  %v7400_v41 = vpop.f32.mrb[35].mxu0  ;;  %v7755_v0 = vpack.c.bf16 %v3628_v11, %v3627_v54  ;;  %v3375_v31 = vpop.permute.xlu1 %3374 }
 0x371   : > { %v3438_v28 = vadd.f32 %v3360_v57, %v3264_v62  ;;  %v3508_v27 = vsel %vm968_vm3, %v3505_v58, %v3507_v12  ;;  %v3380_v62 = vpop.permute.xlu0 %3379 }
 0x372   : > { %v3571_v6 = vmax.f32 %v3436_v17, %v3508_v27  ;;  %vm3201_vm11 = vcmp.ge.f32.partialorder %v7882_v61, 0.0  ;;  %v3236_v21 = vmul.f32 %v7882_v61, %v10188_v39  ;;  %7756 = vmatpush1.bf16.msra.mxu1 %v7755_v0  ;;  %v3629_v9 = vmax.f32 %v3595_v35, %v3508_v27 }
 0x373   : > { %v3509_v10 = vrot.slane %v3438_v28, 1  ;;  %v3101_v15 = vpop.f32.mrb[36].mxu0  ;;  %7757 = vmatprep.subr.bf16.mxu1 %v8487_v59  ;;  %v7891_v27 = vadd.f32 %v10178_v38, %v9984_v37  ;;  %v7893_v37 = vadd.f32 %v10178_v38, %v9996_v43 }
 0x374   : > { %v3597_v8 = vmax.f32 %v3571_v6, %v3438_v28  ;;  %v3265_v18 = vsel %vm3201_vm11, %v7882_v61, %v3236_v21  ;;  %v7884_v20 = vadd.f32 %v7883_v34, %v3101_v15  ;;  %v7403_v40 = vpop.f32.mrb[37].mxu0  ;;  %vm3788_vm11 = vcmask 1041408  }
 0x375   : > { %v3439_v24 = vadd.f32 %v3365_v4, %v3265_v18  ;;  %v3510_v26 = vsel %vm968_vm3, %v3507_v12, %v3509_v10 }
 0x376   : > { %v3572_v50 = vmax.f32 %v3437_v5, %v3510_v26  ;;  %vm3202_vm12 = vcmp.ge.f32.partialorder %v7884_v20, 0.0  ;;  %v3237_v29 = vmul.f32 %v7884_v20, %v10188_v39  ;;  %v3630_v48 = vmax.f32 %v3596_v3, %v3510_v26 }
 0x377   : > { %v3511_v14 = vrot.slane %v3439_v24, 1  ;;  %v3106_v55 = vpop.f32.mrb[38].mxu0 }
 0x378   : > { %v3598_v49 = vmax.f32 %v3572_v50, %v3439_v24  ;;  %v3266_v53 = vsel %vm3202_vm12, %v7884_v20, %v3237_v29  ;;  %v7886_v17 = vadd.f32 %v7885_v33, %v3106_v55  ;;  %v7406_v44 = vpop.f32.mrb[39].mxu0  ;;  %v7758_v46 = vpack.c.bf16 %v3630_v48, %v3629_v9 }
 0x379   : > { %v3440_v45 = vadd.f32 %v3370_v23, %v3266_v53  ;;  %v3512_v54 = vsel %vm968_vm3, %v3509_v10, %v3511_v14  ;;  %v3390_v23 = vpop.permute.xlu0 %3389  ;;  %vm8488_vm12 = vmmov 1  }
 0x37a   : > { %v3573_v58 = vmax.f32 %v3438_v28, %v3512_v54  ;;  %vm3203_vm13 = vcmp.ge.f32.partialorder %v7886_v17, 0.0  ;;  %v3238_v51 = vmul.f32 %v7886_v17, %v10188_v39  ;;  %7759 = vmatpush1.bf16.msra.mxu1 %v7758_v46  ;;  %v3631_v60 = vmax.f32 %v3597_v8, %v3512_v54  ;;  %v3385_v8 = vpop.permute.xlu1 %3384 }
 0x37b   : > { %v3513_v35 = vrot.slane %v3440_v45, 1  ;;  %v3111_v25 = vpop.f32.mrb[40].mxu0  ;;  %7760 = vmatprep.subr.bf16.mxu1 %v8487_v59 }
 0x37c   : > { %v3599_v42 = vmax.f32 %v3573_v58, %v3440_v45  ;;  %v3267_v22 = vsel %vm3203_vm13, %v7886_v17, %v3238_v51  ;;  %v7888_v5 = vadd.f32 %v7887_v16, %v3111_v25  ;;  %v7409_v2 = vpop.f32.mrb[41].mxu0  ;;  %v7895_v16 = vadd.f32 %v10178_v38, %v10008_v47  ;;  %vm10330_vm13 = vmpackc.low %vm3788_vm11, %vm8488_vm12 }
 0x37d   : > { %v3441_v63 = vadd.f32 %v3375_v31, %v3267_v22  ;;  %v3514_v19 = vsel %vm968_vm3, %v3511_v14, %v3513_v35  ;;  %v7897_v47 = vadd.f32 %v10178_v38, %v10017_v30 }
 0x37e   : > { %v3574_v11 = vmax.f32 %v3439_v24, %v3514_v19  ;;  %vm3204_vm14 = vcmp.ge.f32.partialorder %v7888_v5, 0.0  ;;  %v3239_v12 = vmul.f32 %v7888_v5, %v10188_v39  ;;  %v3632_v13 = vmax.f32 %v3598_v49, %v3514_v19  ;;  %v3395_v25 = vpop.permute.xlu1 %3394 }
 0x37f   : > { %v3515_v57 = vrot.slane %v3441_v63, 1  ;;  %v3116_v3 = vpop.f32.mrb[42].mxu0 }
 0x380   : > { %v3600_v61 = vmax.f32 %v3574_v11, %v3441_v63  ;;  %v3268_v41 = vsel %vm3204_vm14, %v7888_v5, %v3239_v12  ;;  %v7890_v0 = vadd.f32 %v7889_v56, %v3116_v3  ;;  %v7412_v34 = vpop.f32.mrb[43].mxu0  ;;  %v7761_v28 = vpack.c.bf16 %v3632_v13, %v3631_v60 }
 0x381   : > { %v3442_v7 = vadd.f32 %v3380_v62, %v3268_v41  ;;  %v3516_v6 = vsel %vm968_vm3, %v3513_v35, %v3515_v57  ;;  %v7899_v34 = vadd.f32 %v10178_v38, %v10023_v32  ;;  %v7901_v32 = vadd.f32 %v10178_v38, %v10029_v36 }
 0x382   : > { %v3575_v21 = vmax.f32 %v3440_v45, %v3516_v6  ;;  %vm3205_vm15 = vcmp.ge.f32.partialorder %v7890_v0, 0.0  ;;  %v3240_v9 = vmul.f32 %v7890_v0, %v10188_v39  ;;  %7762 = vmatpush1.bf16.msra.mxu1 %v7761_v28  ;;  %v3633_v10 = vmax.f32 %v3599_v42, %v3516_v6 }
 0x383   : > { %v3517_v15 = vrot.slane %v3442_v7, 1  ;;  %v3121_v4 = vpop.f32.mrb[44].mxu0  ;;  %7763 = vmatprep.subr.bf16.mxu1 %v8487_v59  ;;  %vm3772_vm14 = vcmask 80896  }
 0x384   : > { %v3601_v18 = vmax.f32 %v3575_v21, %v3442_v7  ;;  %v3269_v20 = vsel %vm3205_vm15, %v7890_v0, %v3240_v9  ;;  %v7892_v40 = vadd.f32 %v7891_v27, %v3121_v4  ;;  %v7415_v33 = vpop.f32.mrb[45].mxu0 }
 0x385   : > { %v3443_v24 = vadd.f32 %v3385_v8, %v3269_v20  ;;  %v3518_v26 = vsel %vm968_vm3, %v3515_v57, %v3517_v15  ;;  %v3400_v57 = vpop.permute.xlu0 %3399 }
 0x386   : > { %v3576_v50 = vmax.f32 %v3441_v63, %v3518_v26  ;;  %vm3206_vm0 = vcmp.ge.f32.partialorder %v7892_v40, 0.0  ;;  %v3241_v29 = vmul.f32 %v7892_v40, %v10188_v39  ;;  %v3634_v48 = vmax.f32 %v3600_v61, %v3518_v26 }
 0x387   : > { %v3519_v14 = vrot.slane %v3443_v24, 1  ;;  %v3126_v55 = vpop.f32.mrb[46].mxu0 }
 0x388   : > { %v3602_v49 = vmax.f32 %v3576_v50, %v3443_v24  ;;  %v3270_v53 = vsel %vm3206_vm0, %v7892_v40, %v3241_v29  ;;  %v7894_v17 = vadd.f32 %v7893_v37, %v3126_v55  ;;  %v7418_v44 = vpop.f32.mrb[47].mxu0  ;;  %v7764_v46 = vpack.c.bf16 %v3634_v48, %v3633_v10  ;;  %v3405_v10 = vpop.permute.xlu1 %3404 }
 0x389   : > { %v3444_v43 = vadd.f32 %v3390_v23, %v3270_v53  ;;  %v3520_v45 = vsel %vm968_vm3, %v3517_v15, %v3519_v14  ;;  %v3410_v29 = vpop.permute.xlu0 %3409  ;;  %v7903_v53 = vadd.f32 %v10178_v38, %v10036_v52  ;;  %vm4798_vm0 = vcmask 130048  }
 0x38a   : > { %v3577_v54 = vmax.f32 %v3442_v7, %v3520_v45  ;;  %vm3207_vm2 = vcmp.ge.f32.partialorder %v7894_v17, 0.0  ;;  %v3242_v58 = vmul.f32 %v7894_v17, %v10188_v39  ;;  %7765 = vmatpush1.bf16.msra.mxu1 %v7764_v46  ;;  %v3635_v51 = vmax.f32 %v3601_v18, %v3520_v45 }
 0x38b   : > { %v3521_v60 = vrot.slane %v3444_v43, 1  ;;  %v3131_v35 = vpop.f32.mrb[48].mxu0  ;;  %7766 = vmatprep.subr.bf16.mxu1 %v8487_v59 }
 0x38c   : > { %v3603_v31 = vmax.f32 %v3577_v54, %v3444_v43  ;;  %v3271_v42 = vsel %vm3207_vm2, %v7894_v17, %v3242_v58  ;;  %v7896_v22 = vadd.f32 %v7895_v16, %v3131_v35  ;;  %v7421_v5 = vpop.f32.mrb[49].mxu0  ;;  %v3415_v54 = vpop.permute.xlu1 %3414 }
 0x38d   : > { %v3445_v2 = vadd.f32 %v3395_v25, %v3271_v42  ;;  %v3522_v56 = vsel %vm968_vm3, %v3519_v14, %v3521_v60  ;;  %v3420_v5 = vpop.permute.xlu0 %3419 }
 0x38e   : > { %v3578_v63 = vmax.f32 %v3443_v24, %v3522_v56  ;;  %vm3208_vm6 = vcmp.ge.f32.partialorder %v7896_v22, 0.0  ;;  %v3243_v19 = vmul.f32 %v7896_v22, %v10188_v39  ;;  %v3636_v11 = vmax.f32 %v3602_v49, %v3522_v56 }
 0x38f   : > { %v3523_v12 = vrot.slane %v3445_v2, 1  ;;  %v3136_v13 = vpop.f32.mrb[50].mxu0 }
 0x390   : > { %v3604_v3 = vmax.f32 %v3578_v63, %v3445_v2  ;;  %v3272_v62 = vsel %vm3208_vm6, %v7896_v22, %v3243_v19  ;;  %v7898_v61 = vadd.f32 %v7897_v47, %v3136_v13  ;;  %v7424_v41 = vpop.f32.mrb[51].mxu0  ;;  %v7767_v0 = vpack.c.bf16 %v3636_v11, %v3635_v51 }
 0x391   : > { %v3446_v30 = vadd.f32 %v3400_v57, %v3272_v62  ;;  %v3524_v28 = vsel %vm968_vm3, %v3521_v60, %v3523_v12 }
 0x392   : > { %v3579_v27 = vmax.f32 %v3444_v43, %v3524_v28  ;;  %vm3209_vm7 = vcmp.ge.f32.partialorder %v7898_v61, 0.0  ;;  %v3244_v7 = vmul.f32 %v7898_v61, %v10188_v39  ;;  %7768 = vmatpush1.bf16.msra.mxu1 %v7767_v0  ;;  %v3637_v6 = vmax.f32 %v3603_v31, %v3524_v28  ;;  %v500_v0 = vld [vmem:[%s10957_s2 + $0x18] sm:$0xff]  ;;  %v502_v28 = vld [vmem:[%s10957_s2 + $0x28] sm:$0xff] }
 0x393   : > { %v3525_v21 = vrot.slane %v3446_v30, 1  ;;  %v3141_v9 = vpop.f32.mrb[52].mxu0  ;;  %7769 = vmatprep.subr.bf16.mxu1 %v8487_v59 }
 0x394   : > { %v3605_v15 = vmax.f32 %v3579_v27, %v3446_v30  ;;  %v3273_v4 = vsel %vm3209_vm7, %v7898_v61, %v3244_v7  ;;  %v7900_v8 = vadd.f32 %v7899_v34, %v3141_v9  ;;  %v7427_v18 = vpop.f32.mrb[53].mxu0  ;;  %v497_v61 = vld [vmem:[%s10957_s2] sm:$0xff]  ;;  %v504_v7 = vld [vmem:[%s10957_s2 + $0x38] sm:$0xff] }
 0x395   : > { %v3447_v20 = vadd.f32 %v3405_v10, %v3273_v4  ;;  %v3526_v40 = vsel %vm968_vm3, %v3523_v12, %v3525_v21  ;;  %v501_v27 = vld [vmem:[%s10957_s2 + $0x20] sm:$0xff]  ;;  %v508_v10 = vld [vmem:[%s10957_s2 + $0x58] sm:$0xff]  ;;  %v510_v4 = vld [vmem:[%s10957_s2 + $0x68] sm:$0xff] }
 0x396   : > { %v3580_v33 = vmax.f32 %v3445_v2, %v3526_v40  ;;  %vm3210_vm8 = vcmp.ge.f32.partialorder %v7900_v8, 0.0  ;;  %v3245_v37 = vmul.f32 %v7900_v8, %v10188_v39  ;;  %v3638_v24 = vmax.f32 %v3604_v3, %v3526_v40  ;;  %v534_v3 = vld [vmem:[%s10961_s6 + $0x8] sm:$0x3]  ;;  %v505_v9 = vld [vmem:[%s10957_s2 + $0x40] sm:$0xff]  ;;  %v5846_v18 = vld [vmem:[%s10961_s6 + $0x10] sm:$0xff] }
 0x397   : > { %v3527_v26 = vrot.slane %v3447_v20, 1  ;;  %v3146_v50 = vpop.f32.mrb[54].mxu0  ;;  %v559_v34 = vld [vmem:[%s10964_s9] sm:$0xff] }
 0x398   : > { %v3606_v48 = vmax.f32 %v3580_v33, %v3447_v20  ;;  %v3274_v14 = vsel %vm3210_vm8, %v7900_v8, %v3245_v37  ;;  %v7902_v55 = vadd.f32 %v7901_v32, %v3146_v50  ;;  %v7430_v23 = vpop.f32.mrb[55].mxu0  ;;  %v7770_v49 = vpack.c.bf16 %v3638_v24, %v3637_v6  ;;  %v503_v6 = vld [vmem:[%s10957_s2 + $0x30] sm:$0xff]  ;;  %v509_v8 = vld [vmem:[%s10957_s2 + $0x60] sm:$0xff]  ;;  %v5847_v32 = vld [vmem:[%s10961_s6 + $0x18] sm:$0x3] }
 0x399   : > { %v3448_v36 = vadd.f32 %v3410_v29, %v3274_v14  ;;  %v3528_v17 = vsel %vm968_vm3, %v3525_v21, %v3527_v26  ;;  %v506_v21 = vld [vmem:[%s10957_s2 + $0x48] sm:$0xff] }
 0x39a   : > { %v3581_v44 = vmax.f32 %v3446_v30, %v3528_v17  ;;  %vm3211_vm9 = vcmp.ge.f32.partialorder %v7902_v55, 0.0  ;;  %v3246_v46 = vmul.f32 %v7902_v55, %v10188_v39  ;;  %7771 = vmatpush1.bf16.msra.mxu1 %v7770_v49  ;;  %v3639_v16 = vmax.f32 %v3605_v15, %v3528_v17  ;;  %v499_v30 = vld [vmem:[%s10957_s2 + $0x10] sm:$0xff] }
 0x39b   : > { %v3529_v43 = vrot.slane %v3448_v36, 1  ;;  %v3151_v45 = vpop.f32.mrb[56].mxu0  ;;  %7772 = vmatprep.subr.bf16.mxu1 %v8487_v59  ;;  %v507_v15 = vld [vmem:[%s10957_s2 + $0x50] sm:$0xff] }
 0x39c   : > { %v3607_v58 = vmax.f32 %v3581_v44, %v3448_v36  ;;  %v3275_v51 = vsel %vm3211_vm9, %v7902_v55, %v3246_v46  ;;  %v7904_v60 = vadd.f32 %v7903_v53, %v3151_v45  ;;  %v7433_v35 = vpop.f32.mrb[57].mxu0 }
 0x39d   : > { %v3449_v25 = vadd.f32 %v3415_v54, %v3275_v51  ;;  %v3530_v52 = vsel %vm968_vm3, %v3527_v26, %v3529_v43 }
 0x39e   : > { %v3582_v38 = vmax.f32 %v3447_v20, %v3530_v52  ;;  %vm3212_vm10 = vcmp.ge.f32.partialorder %v7904_v60, 0.0  ;;  %v3247_v31 = vmul.f32 %v7904_v60, %v10188_v39  ;;  %v3640_v42 = vmax.f32 %v3606_v48, %v3530_v52  ;;  %v533_v39 = vld [vmem:[%s10961_s6] sm:$0xff] }
 0x39f   : > { %v3611_v22 = vrot.slane %v3449_v25, 1  ;;  %v7779_v41 = vpack.c.bf16 %v534_v3, %v533_v39  ;;  %v7783_v20 = vpack.c.bf16 %v5847_v32, %v5846_v18 }
 0x3a0   : > { %v3608_v47 = vmax.f32 %v3582_v38, %v3449_v25  ;;  %v3276_v2 = vsel %vm3212_vm10, %v7904_v60, %v3247_v31  ;;  %v7773_v56 = vpack.c.bf16 %v3640_v42, %v3639_v16 }
 0x3a1   : > { %v3450_v63 = vadd.f32 %v3420_v5, %v3276_v2  ;;  %v3612_v19 = vsel %vm968_vm3, %v3529_v43, %v3611_v22  ;;  %v5848_v5 = vld [vmem:[%s10961_s6 + $0x20] sm:$0xff] }
 0x3a2   : > { %7774 = vmatpush1.bf16.msra.mxu1 %v7773_v56  ;;  %v3641_v11 = vmax.f32 %v3607_v58, %v3612_v19 }
 0x3a3   : > { %v3613_v12 = vrot.slane %v3450_v63, 1  ;;  %7775 = vmatprep.subr.bf16.mxu1 %v8487_v59 }
 0x3a5   : > { %v3614_v13 = vsel %vm968_vm3, %v3611_v22, %v3613_v12 }
 0x3a6   : > { %v3642_v57 = vmax.f32 %v3608_v47, %v3614_v13  ;;  %v5849_v47 = vld [vmem:[%s10961_s6 + $0x28] sm:$0x3] }
 0x3a7   : > { %v7787_v3 = vpack.c.bf16 %v5849_v47, %v5848_v5 }
 0x3a8   : > { %v7776_v62 = vpack.c.bf16 %v3642_v57, %v3641_v11 }
 0x3aa   : > { %7777 = vmatpush1.bf16.msra.mxu1 %v7776_v62 }
 0x3ab   : > { %7778 = vmatprep.subr.bf16.mxu1 %v8487_v59 }
 0x3ad   : > { %3730 = vmatmul.mubr.f32.vlgmr.msra.gmra.mrb[58].mxu1 %v497_v61 }
 0x3ae   : > { %6151 = vmatprep.mubr.msk.f32.mxu1 %vm3643_vm5, %v500_v0  ;;  %7781 = vmatpush3.bf16.msk.msra.mxu1 %vm10330_vm13, %v7779_v41 }
 0x3af   : > { %7782 = vmatprep.subr.bf16.mxu1 %v8487_v59 }
 0x3b1   : > { %3735 = vmatmul.mubr.f32.gmra.mrb[60].mxu1 %v499_v30 }
 0x3b2   : > { %6152 = vmatprep.mubr.msk.f32.mxu1 %vm3643_vm5, %v502_v28 }
 0x3b5   : > { %3740 = vmatmul.mubr.f32.gmra.mrb[62].mxu1 %v501_v27 }
 0x3b6   : > { %6153 = vmatprep.mubr.msk.f32.mxu1 %vm3643_vm5, %v504_v7 }
 0x3b9   : > { %3745 = vmatmul.mubr.f32.gmra.mrb[64].mxu1 %v503_v6 }
 0x3ba   : > { %6154 = vmatprep.mubr.msk.f32.mxu1 %vm3643_vm5, %v506_v21 }
 0x3bd   : > { %3750 = vmatmul.mubr.f32.gmra.mrb[66].mxu1 %v505_v9 }
 0x3be   : > { %6155 = vmatprep.mubr.msk.f32.mxu1 %vm3643_vm5, %v508_v10 }
 0x3c1   : > { %3755 = vmatmul.mubr.f32.gmra.mrb[68].mxu1 %v507_v15 }
 0x3c2   : > { %6156 = vmatprep.mubr.msk.f32.mxu1 %vm3643_vm5, %v510_v4  ;;  %vm4126_vm5 = vcmask 1040384  }
 0x3c5   : > { %3760 = vmatmul.mubr.f32.gmra.mrb[70].mxu1 %v509_v8 }
 0x3c6   : > { %7438 = vmatprep.mubr.msk.f32.mxu1 %vm8485_vm1, %v8484_v1 }
 0x480   : > { %v3731_v40 = vpop.f32.mrb[58].mxu1 }
 0x481   : > { %7439 = vmatmul.mubr.msk.f32.vlgmr.msra.gmra.mrb[72].mxu1 %vm3772_vm14, %v3731_v40  ;;  %v3733_v33 = vpop.f32.mrb[59].mxu1  ;;  %v3888_v37 = vrot.slane %v3731_v40, 1  ;;  %v4007_v24 = vrot.slane %v3731_v40, 2  ;;  %v4127_v50 = vrot.slane %v3731_v40, 7 }
 0x482   : > { %7441 = vmatprep.mubr.msk.f32.mxu1 %vm8485_vm1, %v8484_v1  ;;  %7785 = vmatpush3.bf16.msk.msra.mxu1 %vm10330_vm13, %v7783_v20 }
 0x483   : > { %7786 = vmatprep.subr.bf16.mxu1 %v8487_v59 }
 0x484   : > { %v10390_v26 = vpop.f32.mrb[60].mxu1 }
 0x485   : > { %v3889_v29 = vrot.slane %v10390_v26, 1  ;;  %v4008_v48 = vrot.slane %v10390_v26, 2  ;;  %v4128_v14 = vrot.slane %v10390_v26, 7  ;;  %7442 = vmatmul.mubr.msk.f32.gmra.mrb[74].mxu1 %vm3772_vm14, %v10390_v26  ;;  %v3738_v55 = vpop.f32.mrb[61].mxu1  ;;  %v4449_v36 = vrot.slane %v10390_v26, 6 }
 0x486   : > { %7444 = vmatprep.mubr.msk.f32.mxu1 %vm8485_vm1, %v8484_v1  ;;  %v5853_v55 = vld [vmem:[%s10961_s6 + $0x48] sm:$0x3] }
 0x487   : > { %v3890_v23 = vsel %vm968_vm3, %v3888_v37, %v3889_v29  ;;  %v10401_v49 = vsel %vm1328_vm4, %v4007_v24, %v4008_v48  ;;  %v10404_v53 = vsel %vm4126_vm5, %v4127_v50, %v4128_v14  ;;  %v5850_v50 = vld [vmem:[%s10961_s6 + $0x30] sm:$0xff] }
 0x488   : > { %v10407_v17 = vpop.f32.mrb[62].mxu1 }
 0x489   : > { %7445 = vmatmul.mubr.msk.f32.gmra.mrb[76].mxu1 %vm3772_vm14, %v10407_v17  ;;  %v3743_v44 = vpop.f32.mrb[63].mxu1  ;;  %v3891_v46 = vrot.slane %v10407_v17, 1  ;;  %v4010_v16 = vrot.slane %v10407_v17, 2  ;;  %v4130_v43 = vrot.slane %v10407_v17, 7  ;;  %v4450_v45 = vrot.slane %v10407_v17, 6 }
 0x48a   : > { %7447 = vmatprep.mubr.msk.f32.mxu1 %vm8485_vm1, %v8484_v1  ;;  %v5857_v44 = vld [vmem:[%s10961_s6 + $0x68] sm:$0x3] }
 0x48b   : > { %v10418_v54 = vsel %vm968_vm3, %v3889_v29, %v3891_v46  ;;  %v10421_v58 = vsel %vm1328_vm4, %v4008_v48, %v4010_v16  ;;  %v10424_v51 = vsel %vm4126_vm5, %v4128_v14, %v4130_v43  ;;  %v10427_v60 = vsel %vm3788_vm11, %v4449_v36, %v4450_v45  ;;  %v5851_v29 = vld [vmem:[%s10961_s6 + $0x38] sm:$0x3]  ;;  %v5852_v14 = vld [vmem:[%s10961_s6 + $0x40] sm:$0xff] }
 0x48c   : > { %v10429_v35 = vpop.f32.mrb[64].mxu1  ;;  %v7791_v48 = vpack.c.bf16 %v5851_v29, %v5850_v50 }
 0x48d   : > { %7448 = vmatmul.mubr.msk.f32.gmra.mrb[78].mxu1 %vm3772_vm14, %v10429_v35  ;;  %v3748_v25 = vpop.f32.mrb[65].mxu1  ;;  %v3893_v52 = vrot.slane %v10429_v35, 1  ;;  %v4012_v38 = vrot.slane %v10429_v35, 2  ;;  %v4132_v31 = vrot.slane %v10429_v35, 7  ;;  %v4452_v42 = vrot.slane %v10429_v35, 6 }
 0x48e   : > { %7450 = vmatprep.mubr.msk.f32.mxu1 %vm8485_vm1, %v8484_v1  ;;  %v6212_v25 = vld [vmem:[%s10963_s8] ss:$0 sm:$0xff] }
 0x48f   : > { %v10440_v22 = vsel %vm968_vm3, %v3891_v46, %v3893_v52  ;;  %v4013_v2 = vsel %vm1328_vm4, %v4010_v16, %v4012_v38  ;;  %v10450_v56 = vsel %vm4126_vm5, %v4130_v43, %v4132_v31  ;;  %v10453_v63 = vsel %vm3788_vm11, %v4450_v45, %v4452_v42  ;;  %v5858_v16 = vld [vmem:[%s10961_s6 + $0x70] sm:$0xff]  ;;  %v5859_v43 = vld [vmem:[%s10961_s6 + $0x78] sm:$0x3] }
 0x490   : > { %v10455_v19 = vpop.f32.mrb[66].mxu1  ;;  %v7807_v45 = vpack.c.bf16 %v5859_v43, %v5858_v16  ;;  %v5869_v16 = vld [vmem:[%s10964_s9 + $0x48] sm:$0xff] }
 0x491   : > { %7451 = vmatmul.mubr.msk.f32.gmra.mrb[80].mxu1 %vm3772_vm14, %v10455_v19  ;;  %v3753_v11 = vpop.f32.mrb[67].mxu1  ;;  %v3895_v12 = vrot.slane %v10455_v19, 1  ;;  %v4014_v13 = vrot.slane %v10455_v19, 2  ;;  %v4134_v57 = vrot.slane %v10455_v19, 7  ;;  %v4454_v39 = vrot.slane %v10455_v19, 6 }
 0x492   : > { %7457 = vmatprep.mubr.msk.f32.mxu1 %vm8485_vm1, %v8484_v1 }
 0x493   : > { %v10466_v62 = vsel %vm968_vm3, %v3893_v52, %v3895_v12  ;;  %v4015_v61 = vsel %vm1328_vm4, %v4012_v38, %v4014_v13  ;;  %v10470_v41 = vsel %vm4126_vm5, %v4132_v31, %v4134_v57  ;;  %v10473_v0 = vsel %vm3788_vm11, %v4452_v42, %v4454_v39  ;;  %v5862_v38 = vld [vmem:[%s10964_s9 + $0x10] sm:$0xff]  ;;  %v5863_v31 = vld [vmem:[%s10964_s9 + $0x18] sm:$0xff] }
 0x494   : > { %v10475_v30 = vpop.f32.mrb[68].mxu1  ;;  %v7818_v47 = vpack.c.bf16 %v5863_v31, %v5862_v38 }
 0x495   : > { %7458 = vmatmul.mubr.msk.f32.vlgmr.msra.gmra.mrb[72].mxu1 %vm3772_vm14, %v3890_v23  ;;  %v3897_v28 = vrot.slane %v10475_v30, 1  ;;  %v3758_v27 = vpop.f32.mrb[69].mxu1  ;;  %v4016_v7 = vrot.slane %v10475_v30, 2  ;;  %v4136_v6 = vrot.slane %v10475_v30, 7  ;;  %v4456_v21 = vrot.slane %v10475_v30, 6 }
 0x496   : > { %7460 = vmatprep.mubr.msk.f32.mxu1 %vm8485_vm1, %v8484_v1  ;;  %7789 = vmatpush3.bf16.msk.msra.mxu1 %vm10330_vm13, %v7787_v3  ;;  %v7795_v23 = vpack.c.bf16 %v5853_v55, %v5852_v14  ;;  %v5866_v55 = vld [vmem:[%s10964_s9 + $0x30] sm:$0xff] }
 0x497   : > { %v10487_v9 = vsel %vm968_vm3, %v3895_v12, %v3897_v28  ;;  %v4017_v10 = vsel %vm1328_vm4, %v4014_v13, %v4016_v7  ;;  %7790 = vmatprep.subr.bf16.mxu1 %v8487_v59  ;;  %v10492_v15 = vsel %vm4126_vm5, %v4134_v57, %v4136_v6  ;;  %v10495_v4 = vsel %vm3788_vm11, %v4454_v39, %v4456_v21 }
 0x498   : > { %v10497_v8 = vpop.f32.mrb[70].mxu1 }
 0x499   : > { %7461 = vmatmul.mubr.msk.f32.gmra.mrb[74].mxu1 %vm3772_vm14, %v10418_v54  ;;  %v4347_v18 = vrot.slane %v10497_v8, 1  ;;  %v4458_v32 = vrot.slane %v10497_v8, 6  ;;  %v4568_v20 = vrot.slane %v10497_v8, 7  ;;  %v3763_v40 = vpop.f32.mrb[71].mxu1 }
 0x49a   : > { %7463 = vmatprep.mubr.msk.f32.mxu1 %vm8485_vm1, %v8484_v1 }
 0x49b   : > { %v10507_v33 = vsel %vm968_vm3, %v3897_v28, %v4347_v18  ;;  %v10510_v37 = vsel %vm3788_vm11, %v4456_v21, %v4458_v32  ;;  %v10513_v24 = vsel %vm4126_vm5, %v4136_v6, %v4568_v20  ;;  %v5864_v6 = vld [vmem:[%s10964_s9 + $0x20] sm:$0xff]  ;;  %v5865_v21 = vld [vmem:[%s10964_s9 + $0x28] sm:$0xff] }
 0x49c   : > { %v7821_v32 = vpack.c.bf16 %v5865_v21, %v5864_v6  ;;  %v6241_v6 = vld [vmem:[%s10966_s11] ss:$0 sm:$0xff] }
 0x49d   : > { %7464 = vmatmul.mubr.msk.f32.gmra.mrb[76].mxu1 %vm3772_vm14, %v10440_v22 }
 0x49e   : > { %7466 = vmatprep.mubr.msk.f32.mxu1 %vm8485_vm1, %v8484_v1 }
 0x4a1   : > { %7467 = vmatmul.mubr.msk.f32.gmra.mrb[78].mxu1 %vm3772_vm14, %v10466_v62 }
 0x4a2   : > { %7469 = vmatprep.mubr.msk.f32.mxu1 %vm8485_vm1, %v8484_v1 }
 0x4a5   : > { %7470 = vmatmul.mubr.msk.f32.gmra.mrb[80].mxu1 %vm3772_vm14, %v10487_v9 }
 0x4a6   : > { %7476 = vmatprep.mubr.msk.f32.mxu1 %vm8485_vm1, %v8484_v1 }
 0x4a9   : > { %7477 = vmatmul.mubr.msk.f32.vlgmr.msra.gmra.mrb[72].mxu1 %vm3772_vm14, %v10401_v49  ;;  %v5854_v49 = vld [vmem:[%s10961_s6 + $0x50] sm:$0xff] }
 0x4aa   : > { %7479 = vmatprep.mubr.msk.f32.mxu1 %vm8485_vm1, %v8484_v1  ;;  %7793 = vmatpush3.bf16.msk.msra.mxu1 %vm10330_vm13, %v7791_v48 }
 0x4ab   : > { %7794 = vmatprep.subr.bf16.mxu1 %v8487_v59 }
 0x4ad   : > { %7480 = vmatmul.mubr.msk.f32.gmra.mrb[74].mxu1 %vm3772_vm14, %v10421_v58  ;;  %v5861_v58 = vld [vmem:[%s10961_s6 + $0x88] sm:$0x3] }
 0x4ae   : > { %7482 = vmatprep.mubr.msk.f32.mxu1 %vm8485_vm1, %v8484_v1 }
 0x4b1   : > { %7483 = vmatmul.mubr.msk.f32.gmra.mrb[76].mxu1 %vm3772_vm14, %v4013_v2 }
 0x4b2   : > { %7485 = vmatprep.mubr.msk.f32.mxu1 %vm8485_vm1, %v8484_v1 }
 0x4b5   : > { %7486 = vmatmul.mubr.msk.f32.gmra.mrb[78].mxu1 %vm3772_vm14, %v4015_v61 }
 0x4b6   : > { %7488 = vmatprep.mubr.msk.f32.mxu1 %vm8485_vm1, %v8484_v1 }
 0x4b9   : > { %7489 = vmatmul.mubr.msk.f32.gmra.mrb[80].mxu1 %vm3772_vm14, %v4017_v10 }
 0x4ba   : > { %7495 = vmatprep.mubr.msk.f32.mxu1 %vm8485_vm1, %v8484_v1 }
 0x4bd   : > { %7496 = vmatmul.mubr.msk.f32.vlgmr.msra.gmra.mrb[72].mxu1 %vm3772_vm14, %v10404_v53  ;;  %v5855_v53 = vld [vmem:[%s10961_s6 + $0x58] sm:$0x3] }
 0x4be   : > { %7498 = vmatprep.mubr.msk.f32.mxu1 %vm8485_vm1, %v8484_v1  ;;  %7797 = vmatpush3.bf16.msk.msra.mxu1 %vm10330_vm13, %v7795_v23  ;;  %v7799_v36 = vpack.c.bf16 %v5855_v53, %v5854_v49  ;;  %v5867_v23 = vld [vmem:[%s10964_s9 + $0x38] sm:$0xff] }
 0x4bf   : > { %7798 = vmatprep.subr.bf16.mxu1 %v8487_v59  ;;  %v7824_v53 = vpack.c.bf16 %v5867_v23, %v5866_v55 }
 0x4c1   : > { %7499 = vmatmul.mubr.msk.f32.gmra.mrb[74].mxu1 %vm3772_vm14, %v10424_v51 }
 0x4c2   : > { %7501 = vmatprep.mubr.msk.f32.mxu1 %vm8485_vm1, %v8484_v1 }
 0x4c5   : > { %7502 = vmatmul.mubr.msk.f32.gmra.mrb[76].mxu1 %vm3772_vm14, %v10450_v56 }
 0x4c6   : > { %7504 = vmatprep.mubr.msk.f32.mxu1 %vm8485_vm1, %v8484_v1 }
 0x4c9   : > { %7505 = vmatmul.mubr.msk.f32.gmra.mrb[78].mxu1 %vm3772_vm14, %v10470_v41 }
 0x4ca   : > { %7507 = vmatprep.mubr.msk.f32.mxu1 %vm8485_vm1, %v8484_v1 }
 0x4cd   : > { %7508 = vmatmul.mubr.msk.f32.gmra.mrb[80].mxu1 %vm3772_vm14, %v10492_v15 }
 0x4ce   : > { %7514 = vmatprep.mubr.msk.f32.mxu1 %vm8485_vm1, %v8484_v1 }
 0x4d1   : > { %7515 = vmatmul.mubr.msk.f32.vlgmr.msra.gmra.mrb[72].mxu1 %vm3772_vm14, %v10390_v26  ;;  %v5856_v26 = vld [vmem:[%s10961_s6 + $0x60] sm:$0xff] }
 0x4d2   : > { %7517 = vmatprep.mubr.msk.f32.mxu1 %vm8485_vm1, %v8484_v1  ;;  %7801 = vmatpush3.bf16.msk.msra.mxu1 %vm10330_vm13, %v7799_v36  ;;  %v7803_v46 = vpack.c.bf16 %v5857_v44, %v5856_v26 }
 0x4d3   : > { %7802 = vmatprep.subr.bf16.mxu1 %v8487_v59 }
 0x4d5   : > { %7518 = vmatmul.mubr.msk.f32.gmra.mrb[74].mxu1 %vm3772_vm14, %v10407_v17 }
 0x4d6   : > { %7520 = vmatprep.mubr.msk.f32.mxu1 %vm8485_vm1, %v8484_v1 }
 0x4d9   : > { %7521 = vmatmul.mubr.msk.f32.gmra.mrb[76].mxu1 %vm3772_vm14, %v10429_v35 }
 0x4da   : > { %7523 = vmatprep.mubr.msk.f32.mxu1 %vm8485_vm1, %v8484_v1 }
 0x4dd   : > { %7524 = vmatmul.mubr.msk.f32.gmra.mrb[78].mxu1 %vm3772_vm14, %v10455_v19 }
 0x4de   : > { %7526 = vmatprep.mubr.msk.f32.mxu1 %vm8485_vm1, %v8484_v1 }
 0x4e1   : > { %7527 = vmatmul.mubr.msk.f32.gmra.mrb[80].mxu1 %vm3772_vm14, %v10475_v30 }
 0x4e2   : > { %7533 = vmatprep.mubr.msk.f32.mxu1 %vm8485_vm1, %v8484_v1 }
 0x4e5   : > { %7534 = vmatmul.mubr.msk.f32.vlgmr.msra.gmra.mrb[72].mxu1 %vm3772_vm14, %v10418_v54  ;;  %v5860_v54 = vld [vmem:[%s10961_s6 + $0x80] sm:$0xff] }
 0x4e6   : > { %7536 = vmatprep.mubr.msk.f32.mxu1 %vm8485_vm1, %v8484_v1  ;;  %7805 = vmatpush3.bf16.msk.msra.mxu1 %vm10330_vm13, %v7803_v46  ;;  %v5868_v46 = vld [vmem:[%s10964_s9 + $0x40] sm:$0xff] }
 0x4e7   : > { %7806 = vmatprep.subr.bf16.mxu1 %v8487_v59 }
 0x4e9   : > { %7537 = vmatmul.mubr.msk.f32.gmra.mrb[74].mxu1 %vm3772_vm14, %v10440_v22 }
 0x4ea   : > { %7539 = vmatprep.mubr.msk.f32.mxu1 %vm8485_vm1, %v8484_v1 }
 0x4ed   : > { %7540 = vmatmul.mubr.msk.f32.gmra.mrb[76].mxu1 %vm3772_vm14, %v10466_v62 }
 0x4ee   : > { %7542 = vmatprep.mubr.msk.f32.mxu1 %vm8485_vm1, %v8484_v1 }
 0x4f1   : > { %7543 = vmatmul.mubr.msk.f32.gmra.mrb[78].mxu1 %vm3772_vm14, %v10487_v9 }
 0x4f2   : > { %7545 = vmatprep.mubr.msk.f32.mxu1 %vm8485_vm1, %v8484_v1 }
 0x4f5   : > { %7546 = vmatmul.mubr.msk.f32.gmra.mrb[80].mxu1 %vm3772_vm14, %v10507_v33 }
 0x4f6   : > { %7552 = vmatprep.mubr.msk.f32.mxu1 %vm8485_vm1, %v8484_v1 }
 0x4f9   : > { %7553 = vmatmul.mubr.msk.f32.vlgmr.msra.gmra.mrb[72].mxu1 %vm3772_vm14, %v10427_v60  ;;  %v7811_v60 = vpack.c.bf16 %v5861_v58, %v5860_v54 }
 0x4fa   : > { %7555 = vmatprep.mubr.msk.f32.mxu1 %vm8485_vm1, %v8484_v1  ;;  %7809 = vmatpush3.bf16.msk.msra.mxu1 %vm10330_vm13, %v7807_v45  ;;  %v7827_v45 = vpack.c.bf16 %v5869_v16, %v5868_v46 }
 0x4fb   : > { %7810 = vmatprep.subr.bf16.mxu1 %v8487_v59 }
 0x4fd   : > { %7556 = vmatmul.mubr.msk.f32.gmra.mrb[74].mxu1 %vm3772_vm14, %v10453_v63 }
 0x4fe   : > { %7558 = vmatprep.mubr.msk.f32.mxu1 %vm8485_vm1, %v8484_v1 }
 0x501   : > { %7559 = vmatmul.mubr.msk.f32.gmra.mrb[76].mxu1 %vm3772_vm14, %v10473_v0 }
 0x502   : > { %7561 = vmatprep.mubr.msk.f32.mxu1 %vm8485_vm1, %v8484_v1 }
 0x505   : > { %7562 = vmatmul.mubr.msk.f32.gmra.mrb[78].mxu1 %vm3772_vm14, %v10495_v4 }
 0x506   : > { %7564 = vmatprep.mubr.msk.f32.mxu1 %vm8485_vm1, %v8484_v1 }
 0x509   : > { %7565 = vmatmul.mubr.msk.f32.gmra.mrb[80].mxu1 %vm3772_vm14, %v10510_v37 }
 0x50a   : > { %7571 = vmatprep.mubr.msk.f32.mxu1 %vm8485_vm1, %v8484_v1 }
 0x50d   : > { %7572 = vmatmul.mubr.msk.f32.vlgmr.msra.gmra.mrb[72].mxu1 %vm3772_vm14, %v10424_v51 }
 0x50e   : > { %7574 = vmatprep.mubr.msk.f32.mxu1 %vm8485_vm1, %v8484_v1  ;;  %7813 = vmatpush3.bf16.msk.msra.mxu1 %vm10330_vm13, %v7811_v60  ;;  %vm5772_vm13 = vcmask 64512  }
 0x50f   : > { %7814 = vmatprep.subr.bf16.mxu1 %v8487_v59 }
 0x511   : > { %7575 = vmatmul.mubr.msk.f32.gmra.mrb[74].mxu1 %vm3772_vm14, %v10450_v56 }
 0x512   : > { %7577 = vmatprep.mubr.msk.f32.mxu1 %vm8485_vm1, %v8484_v1 }
 0x515   : > { %7578 = vmatmul.mubr.msk.f32.gmra.mrb[76].mxu1 %vm3772_vm14, %v10470_v41 }
 0x516   : > { %7580 = vmatprep.mubr.msk.f32.mxu1 %vm8485_vm1, %v8484_v1 }
 0x519   : > { %7581 = vmatmul.mubr.msk.f32.gmra.mrb[78].mxu1 %vm3772_vm14, %v10492_v15 }
 0x51a   : > { %7583 = vmatprep.mubr.msk.f32.mxu1 %vm8485_vm1, %v8484_v1 }
 0x51d   : > { %7584 = vmatmul.mubr.msk.f32.gmra.mrb[80].mxu1 %vm3772_vm14, %v10513_v24 }
 0x51e   : > { %7590 = vmatprep.mubr.msk.f32.mxu1 %vm8485_vm1, %v8484_v1 }
 0x521   : > { %7591 = vmatmul.mubr.msk.f32.vlgmr.msra.gmra.mrb[72].mxu1 %vm3772_vm14, %v10407_v17  ;;  %v560_v17 = vld [vmem:[%s10964_s9 + $0x8] sm:$0xff] }
 0x522   : > { %7593 = vmatprep.mubr.msk.f32.mxu1 %vm8485_vm1, %v8484_v1  ;;  %v7815_v51 = vpack.c.bf16 %v560_v17, %v559_v34  ;;  %v5870_v34 = vld [vmem:[%s10964_s9 + $0x50] sm:$0xff]  ;;  %v5871_v17 = vld [vmem:[%s10964_s9 + $0x58] sm:$0xff] }
 0x524   : > { %7816 = vmatpush3.bf16.msra.mxu1 %v7815_v51 }
 0x525   : > { %7594 = vmatmul.mubr.msk.f32.gmra.mrb[74].mxu1 %vm3772_vm14, %v10429_v35  ;;  %7817 = vmatprep.subr.bf16.mxu1 %v8487_v59  ;;  %v6157_v35 = vld [vmem:[%s10962_s7] ss:$0 sm:$0xff] }
 0x526   : > { %7596 = vmatprep.mubr.msk.f32.mxu1 %vm8485_vm1, %v8484_v1 }
 0x529   : > { %7597 = vmatmul.mubr.msk.f32.gmra.mrb[76].mxu1 %vm3772_vm14, %v10455_v19 }
 0x52a   : > { %7599 = vmatprep.mubr.msk.f32.mxu1 %vm8485_vm1, %v8484_v1 }
 0x52d   : > { %7600 = vmatmul.mubr.msk.f32.gmra.mrb[78].mxu1 %vm3772_vm14, %v10475_v30 }
 0x52e   : > { %7602 = vmatprep.mubr.msk.f32.mxu1 %vm8485_vm1, %v8484_v1 }
 0x531   : > { %7603 = vmatmul.mubr.msk.f32.gmra.mrb[80].mxu1 %vm3772_vm14, %v10497_v8 }
 0x532   : > { %7609 = vmatprep.mubr.msk.f32.mxu1 %vm8485_vm1, %v8484_v1 }
 0x5f4   : > { %v4741_v52 = vpop.f32.mrb[72].mxu1 }
 0x5f5   : > { %v7905_v42 = vadd.f32 %v6157_v35, %v4741_v52  ;;  %v7592_v22 = vpop.f32.mrb[73].mxu1  ;;  %v5873_v52 = vld [vmem:[%s10964_s9 + $0x68] sm:$0xff] }
 0x5f6   : > { %v5875_v22 = vld [vmem:[%s10964_s9 + $0x78] sm:$0xff] }
 0x5f7   : > { %vm4770_vm15 = vcmp.ge.f32.partialorder %v7905_v42, 0.0  ;;  %v4781_v5 = vmul.f32 %v7905_v42, %v6212_v25 }
 0x5f8   : > { %v4746_v2 = vpop.f32.mrb[74].mxu1 }
 0x5f9   : > { %v4786_v56 = vsel %vm4770_vm15, %v7905_v42, %v4781_v5  ;;  %v7906_v63 = vadd.f32 %v6157_v35, %v4746_v2  ;;  %v7595_v19 = vpop.f32.mrb[75].mxu1  ;;  %v5874_v42 = vld [vmem:[%s10964_s9 + $0x70] sm:$0xff] }
 0x5fa   : > { %7610 = vmatmul.mubr.msk.f32.vlgmr.msra.gmra.mrb[82].mxu1 %vm4798_vm0, %v4786_v56  ;;  %v4892_v13 = vrot.slane %v4786_v56, 1  ;;  %v4988_v57 = vrot.slane %v4786_v56, 2  ;;  %v5084_v61 = vrot.slane %v4786_v56, 7  ;;  %v7836_v56 = vpack.c.bf16 %v5875_v22, %v5874_v42 }
 0x5fb   : > { %vm4771_vm2 = vcmp.ge.f32.partialorder %v7906_v63, 0.0  ;;  %v4782_v11 = vmul.f32 %v7906_v63, %v6212_v25  ;;  %7612 = vmatprep.mubr.msk.f32.mxu1 %vm8485_vm1, %v8484_v1  ;;  %7819 = vmatpush3.bf16.msra.mxu1 %v7818_v47 }
 0x5fc   : > { %v4751_v12 = vpop.f32.mrb[76].mxu1  ;;  %7820 = vmatprep.subr.bf16.mxu1 %v8487_v59 }
 0x5fd   : > { %v10741_v39 = vsel %vm4771_vm2, %v7906_v63, %v4782_v11  ;;  %v7907_v3 = vadd.f32 %v6157_v35, %v4751_v12  ;;  %v7598_v62 = vpop.f32.mrb[77].mxu1 }
 0x5fe   : > { %7613 = vmatmul.mubr.msk.f32.gmra.mrb[84].mxu1 %vm4798_vm0, %v10741_v39  ;;  %v4893_v41 = vrot.slane %v10741_v39, 1  ;;  %v4989_v0 = vrot.slane %v10741_v39, 2  ;;  %v5085_v30 = vrot.slane %v10741_v39, 7  ;;  %v5353_v2 = vrot.slane %v10741_v39, 6 }
 0x5ff   : > { %vm4772_vm6 = vcmp.ge.f32.partialorder %v7907_v3, 0.0  ;;  %v4783_v28 = vmul.f32 %v7907_v3, %v6212_v25  ;;  %7615 = vmatprep.mubr.msk.f32.mxu1 %vm8485_vm1, %v8484_v1 }
 0x600   : > { %v4756_v27 = vpop.f32.mrb[78].mxu1  ;;  %v4894_v7 = vsel %vm968_vm3, %v4892_v13, %v4893_v41  ;;  %v4990_v9 = vsel %vm1328_vm4, %v4988_v57, %v4989_v0  ;;  %v5086_v10 = vsel %vm4126_vm5, %v5084_v61, %v5085_v30  ;;  %v5876_v13 = vld [vmem:[%s10964_s9 + $0x80] sm:$0xff]  ;;  %v5877_v57 = vld [vmem:[%s10964_s9 + $0x88] sm:$0xff] }
 0x601   : > { %v10759_v15 = vsel %vm4772_vm6, %v7907_v3, %v4783_v28  ;;  %v7908_v4 = vadd.f32 %v6157_v35, %v4756_v27  ;;  %v7601_v8 = vpop.f32.mrb[79].mxu1  ;;  %v7839_v3 = vpack.c.bf16 %v5877_v57, %v5876_v13  ;;  %v511_v61 = vld [vmem:[%s10967_s12] sm:$0xff]  ;;  %v513_v28 = vld [vmem:[%s10967_s12 + $0x10] sm:$0xff] }
 0x602   : > { %7616 = vmatmul.mubr.msk.f32.gmra.mrb[86].mxu1 %vm4798_vm0, %v10759_v15  ;;  %v4895_v37 = vrot.slane %v10759_v15, 1  ;;  %v4991_v36 = vrot.slane %v10759_v15, 2  ;;  %v5087_v54 = vrot.slane %v10759_v15, 7  ;;  %v5354_v47 = vrot.slane %v10759_v15, 6 }
 0x603   : > { %vm4773_vm7 = vcmp.ge.f32.partialorder %v7908_v4, 0.0  ;;  %v4784_v18 = vmul.f32 %v7908_v4, %v6212_v25  ;;  %7622 = vmatprep.mubr.msk.f32.mxu1 %vm8485_vm1, %v8484_v1 }
 0x604   : > { %v4761_v20 = vpop.f32.mrb[80].mxu1  ;;  %v4896_v48 = vsel %vm968_vm3, %v4893_v41, %v4895_v37  ;;  %v4992_v26 = vsel %vm1328_vm4, %v4989_v0, %v4991_v36  ;;  %v5088_v58 = vsel %vm4126_vm5, %v5085_v30, %v5087_v54  ;;  %v5355_v63 = vsel %vm3788_vm11, %v5353_v2, %v5354_v47  ;;  %v512_v41 = vld [vmem:[%s10967_s12 + $0x8] sm:$0xff] }
 0x605   : > { %v7909_v40 = vadd.f32 %v6157_v35, %v4761_v20  ;;  %v7604_v33 = vpop.f32.mrb[81].mxu1  ;;  %v10766_v24 = vsel %vm4773_vm7, %v7908_v4, %v4784_v18  ;;  %v7830_v35 = vpack.c.bf16 %v5871_v17, %v5870_v34  ;;  %v7842_v30 = vpack.c.bf16 %v512_v41, %v511_v61 }
 0x606   : > { %7623 = vmatmul.mubr.msk.f32.vlgmr.msra.gmra.mrb[82].mxu1 %vm4798_vm0, %v4894_v7  ;;  %v4897_v14 = vrot.slane %v10766_v24, 1  ;;  %v4993_v44 = vrot.slane %v10766_v24, 2  ;;  %v5089_v60 = vrot.slane %v10766_v24, 7  ;;  %v5356_v19 = vrot.slane %v10766_v24, 6  ;;  %v6213_v7 = vld [vmem:[%s10965_s10] ss:$0 sm:$0xff] }
 0x607   : > { %vm4774_vm8 = vcmp.ge.f32.partialorder %v7909_v40, 0.0  ;;  %v4785_v50 = vmul.f32 %v7909_v40, %v6212_v25  ;;  %7625 = vmatprep.mubr.msk.f32.mxu1 %vm8485_vm1, %v8484_v1  ;;  %7822 = vmatpush3.bf16.msra.mxu1 %v7821_v32  ;;  %v5872_v25 = vld [vmem:[%s10964_s9 + $0x60] sm:$0xff]  ;;  %v591_v2 = vlaneseq }
 0x608   : > { %7823 = vmatprep.subr.bf16.mxu1 %v8487_v59  ;;  %v4898_v49 = vsel %vm968_vm3, %v4895_v37, %v4897_v14  ;;  %v4994_v43 = vsel %vm1328_vm4, %v4991_v36, %v4993_v44  ;;  %v5090_v51 = vsel %vm4126_vm5, %v5087_v54, %v5089_v60  ;;  %v7833_v38 = vpack.c.bf16 %v5873_v52, %v5872_v25 }
 0x609   : > { %v10772_v29 = vsel %vm4774_vm8, %v7909_v40, %v4785_v50  ;;  %v5357_v11 = vsel %vm3788_vm11, %v5354_v47, %v5356_v19  ;;  %vm5642_vm4 = vcmask 261120  }
 0x60a   : > { %7626 = vmatmul.mubr.msk.f32.gmra.mrb[84].mxu1 %vm4798_vm0, %v4896_v48  ;;  %v5266_v31 = vrot.slane %v10772_v29, 1  ;;  %v5358_v12 = vrot.slane %v10772_v29, 6  ;;  %v5449_v62 = vrot.slane %v10772_v29, 7 }
 0x60b   : > { %7628 = vmatprep.mubr.msk.f32.mxu1 %vm8485_vm1, %v8484_v1 }
 0x60c   : > { %v5267_v5 = vsel %vm968_vm3, %v4897_v14, %v5266_v31  ;;  %v5450_v0 = vsel %vm4126_vm5, %v5089_v60, %v5449_v62 }
 0x60e   : > { %7629 = vmatmul.mubr.msk.f32.gmra.mrb[86].mxu1 %vm4798_vm0, %v4898_v49 }
 0x60f   : > { %7635 = vmatprep.mubr.msk.f32.mxu1 %vm8485_vm1, %v8484_v1 }
 0x612   : > { %7636 = vmatmul.mubr.msk.f32.vlgmr.msra.gmra.mrb[82].mxu1 %vm4798_vm0, %v4990_v9 }
 0x613   : > { %7638 = vmatprep.mubr.msk.f32.mxu1 %vm8485_vm1, %v8484_v1  ;;  %7825 = vmatpush3.bf16.msra.mxu1 %v7824_v53 }
 0x614   : > { %7826 = vmatprep.subr.bf16.mxu1 %v8487_v59 }
 0x616   : > { %7639 = vmatmul.mubr.msk.f32.gmra.mrb[84].mxu1 %vm4798_vm0, %v4992_v26 }
 0x617   : > { %7641 = vmatprep.mubr.msk.f32.mxu1 %vm8485_vm1, %v8484_v1 }
 0x61a   : > { %7642 = vmatmul.mubr.msk.f32.gmra.mrb[86].mxu1 %vm4798_vm0, %v4994_v43 }
 0x61b   : > { %7648 = vmatprep.mubr.msk.f32.mxu1 %vm8485_vm1, %v8484_v1 }
 0x61e   : > { %7649 = vmatmul.mubr.msk.f32.vlgmr.msra.gmra.mrb[82].mxu1 %vm4798_vm0, %v5086_v10 }
 0x61f   : > { %7651 = vmatprep.mubr.msk.f32.mxu1 %vm8485_vm1, %v8484_v1  ;;  %7828 = vmatpush3.bf16.msra.mxu1 %v7827_v45 }
 0x620   : > { %7829 = vmatprep.subr.bf16.mxu1 %v8487_v59 }
 0x622   : > { %7652 = vmatmul.mubr.msk.f32.gmra.mrb[84].mxu1 %vm4798_vm0, %v5088_v58 }
 0x623   : > { %7654 = vmatprep.mubr.msk.f32.mxu1 %vm8485_vm1, %v8484_v1 }
 0x626   : > { %7655 = vmatmul.mubr.msk.f32.gmra.mrb[86].mxu1 %vm4798_vm0, %v5090_v51 }
 0x627   : > { %7661 = vmatprep.mubr.msk.f32.mxu1 %vm8485_vm1, %v8484_v1 }
 0x62a   : > { %7662 = vmatmul.mubr.msk.f32.vlgmr.msra.gmra.mrb[82].mxu1 %vm4798_vm0, %v10741_v39  ;;  %v5359_v39 = vsel %vm3788_vm11, %v5356_v19, %v5358_v12  ;;  %vm5732_vm11 = vcmask 15360  }
 0x62b   : > { %7664 = vmatprep.mubr.msk.f32.mxu1 %vm8485_vm1, %v8484_v1  ;;  %7831 = vmatpush3.bf16.msra.mxu1 %v7830_v35 }
 0x62c   : > { %7832 = vmatprep.subr.bf16.mxu1 %v8487_v59 }
 0x62e   : > { %7665 = vmatmul.mubr.msk.f32.gmra.mrb[84].mxu1 %vm4798_vm0, %v10759_v15 }
 0x62f   : > { %7667 = vmatprep.mubr.msk.f32.mxu1 %vm8485_vm1, %v8484_v1 }
 0x632   : > { %7668 = vmatmul.mubr.msk.f32.gmra.mrb[86].mxu1 %vm4798_vm0, %v10766_v24 }
 0x633   : > { %7674 = vmatprep.mubr.msk.f32.mxu1 %vm8485_vm1, %v8484_v1 }
 0x636   : > { %7675 = vmatmul.mubr.msk.f32.vlgmr.msra.gmra.mrb[82].mxu1 %vm4798_vm0, %v4896_v48  ;;  %v6242_v48 = vld [vmem:[%s10968_s13] ss:$0 sm:$0xff] }
 0x637   : > { %7677 = vmatprep.mubr.msk.f32.mxu1 %vm8485_vm1, %v8484_v1  ;;  %7834 = vmatpush3.bf16.msra.mxu1 %v7833_v38 }
 0x638   : > { %7835 = vmatprep.subr.bf16.mxu1 %v8487_v59 }
 0x63a   : > { %7678 = vmatmul.mubr.msk.f32.gmra.mrb[84].mxu1 %vm4798_vm0, %v4898_v49 }
 0x63b   : > { %7680 = vmatprep.mubr.msk.f32.mxu1 %vm8485_vm1, %v8484_v1 }
 0x63e   : > { %7681 = vmatmul.mubr.msk.f32.gmra.mrb[86].mxu1 %vm4798_vm0, %v5267_v5 }
 0x63f   : > { %7687 = vmatprep.mubr.msk.f32.mxu1 %vm8485_vm1, %v8484_v1 }
 0x642   : > { %7688 = vmatmul.mubr.msk.f32.vlgmr.msra.gmra.mrb[82].mxu1 %vm4798_vm0, %v5355_v63  ;;  %v592_v63 = vand.u32 127, %v591_v2 }
 0x643   : > { %7690 = vmatprep.mubr.msk.f32.mxu1 %vm8485_vm1, %v8484_v1  ;;  %7837 = vmatpush3.bf16.msra.mxu1 %v7836_v56 }
 0x644   : > { %7838 = vmatprep.subr.bf16.mxu1 %v8487_v59  ;;  %vm594_vm12 = vcmp.lt.s32.totalorder %v592_v63, 6 }
 0x646   : > { %7691 = vmatmul.mubr.msk.f32.gmra.mrb[84].mxu1 %vm4798_vm0, %v5357_v11 }
 0x647   : > { %7693 = vmatprep.mubr.msk.f32.mxu1 %vm8485_vm1, %v8484_v1 }
 0x64a   : > { %7694 = vmatmul.mubr.msk.f32.gmra.mrb[86].mxu1 %vm4798_vm0, %v5359_v39 }
 0x64b   : > { %7700 = vmatprep.mubr.msk.f32.mxu1 %vm8485_vm1, %v8484_v1 }
 0x64e   : > { %7701 = vmatmul.mubr.msk.f32.vlgmr.msra.gmra.mrb[82].mxu1 %vm4798_vm0, %v5088_v58 }
 0x64f   : > { %7703 = vmatprep.mubr.msk.f32.mxu1 %vm8485_vm1, %v8484_v1  ;;  %7840 = vmatpush3.bf16.msra.mxu1 %v7839_v3 }
 0x650   : > { %7841 = vmatprep.subr.bf16.mxu1 %v8487_v59 }
 0x652   : > { %7704 = vmatmul.mubr.msk.f32.gmra.mrb[84].mxu1 %vm4798_vm0, %v5090_v51 }
 0x653   : > { %7706 = vmatprep.mubr.msk.f32.mxu1 %vm8485_vm1, %v8484_v1 }
 0x656   : > { %7707 = vmatmul.mubr.msk.f32.gmra.mrb[86].mxu1 %vm4798_vm0, %v5450_v0 }
 0x657   : > { %7713 = vmatprep.mubr.msk.f32.mxu1 %vm8485_vm1, %v8484_v1 }
 0x65a   : > { %7714 = vmatmul.mubr.msk.f32.vlgmr.msra.gmra.mrb[82].mxu1 %vm4798_vm0, %v10759_v15 }
 0x65b   : > { %7716 = vmatprep.mubr.msk.f32.mxu1 %vm8485_vm1, %v8484_v1  ;;  %7843 = vmatpush3.bf16.msra.mxu1 %v7842_v30 }
 0x65c   : > { %7844 = vmatprep.subr.bf16.mxu1 %v8487_v59  ;;  %v514_v59 = vld [vmem:[%s10967_s12 + $0x18] sm:$0xff] }
 0x65d   : > { %v7845_v27 = vpack.c.bf16 %v514_v59, %v513_v28 }
 0x65e   : > { %7717 = vmatmul.mubr.msk.f32.gmra.mrb[84].mxu1 %vm4798_vm0, %v10766_v24 }
 0x65f   : > { %7719 = vmatprep.mubr.msk.f32.mxu1 %vm8485_vm1, %v8484_v1  ;;  %7846 = vmatpush3.bf16.msra.mxu1 %v7845_v27 }
 0x662   : > { %7720 = vmatmul.mubr.msk.f32.gmra.mrb[86].mxu1 %vm4798_vm0, %v10772_v29 }
 0x663   : > { %7730 = vmatprep.mubr.msk.f32.mxu1 %vm8485_vm1, %v8484_v1 }
 0x72d   : > { %v5604_v21 = vpop.f32.mrb[82].mxu1 }
 0x72e   : > { %v7910_v9 = vadd.f32 %v6213_v7, %v5604_v21  ;;  %v7715_v10 = vpop.f32.mrb[83].mxu1 }
 0x730   : > { %vm5621_vm3 = vcmp.ge.f32.partialorder %v7910_v9, 0.0  ;;  %v5630_v15 = vmul.f32 %v7910_v9, %v6241_v6 }
 0x731   : > { %v5609_v4 = vpop.f32.mrb[84].mxu1 }
 0x732   : > { %v5633_v8 = vsel %vm5621_vm3, %v7910_v9, %v5630_v15  ;;  %v7911_v18 = vadd.f32 %v6213_v7, %v5609_v4  ;;  %v7718_v32 = vpop.f32.mrb[85].mxu1 }
 0x733   : > { %7731 = vmatmul.mubr.msk.f32.vlgmr.msra.gmra.mrb[88].mxu1 %vm5642_vm4, %v5633_v8 }
 0x734   : > { %vm5622_vm9 = vcmp.ge.f32.partialorder %v7911_v18, 0.0  ;;  %v5631_v20 = vmul.f32 %v7911_v18, %v6241_v6  ;;  %7733 = vmatprep.mubr.msk.f32.mxu1 %vm8485_vm1, %v8484_v1 }
 0x735   : > { %v5614_v40 = vpop.f32.mrb[86].mxu1 }
 0x736   : > { %v7912_v33 = vadd.f32 %v6213_v7, %v5614_v40  ;;  %v7721_v37 = vpop.f32.mrb[87].mxu1  ;;  %v5634_v24 = vsel %vm5622_vm9, %v7911_v18, %v5631_v20 }
 0x737   : > { %7734 = vmatmul.mubr.msk.f32.gmra.mrb[90].mxu1 %vm5642_vm4, %v5634_v24 }
 0x738   : > { %vm5623_vm10 = vcmp.ge.f32.partialorder %v7912_v33, 0.0  ;;  %v5632_v50 = vmul.f32 %v7912_v33, %v6241_v6  ;;  %7736 = vmatprep.mubr.msk.f32.mxu1 %vm8485_vm1, %v8484_v1  ;;  %vm593_vm1 = vcmp.lt.s32.totalorder %v592_v63, 2 }
 0x73a   : > { %v5635_v29 = vsel %vm5623_vm10, %v7912_v33, %v5632_v50 }
 0x73b   : > { %7737 = vmatmul.mubr.msk.f32.gmra.mrb[92].mxu1 %vm5642_vm4, %v5635_v29 }
 0x806   : > { %v5718_v14 = vpop.f32.mrb[88].mxu1 }
 0x807   : > { %v5719_v55 = vadd.f32 %v6242_v48, %v5718_v14  ;;  %v7732_v23 = vpop.f32.mrb[89].mxu1 }
 0x809   : > { %v5733_v49 = vsel %vm5732_vm11, %v5719_v55, -inf }
 0x80a   : > { %5734 = vmax.xlane.f32.xlu1 %v5733_v49  ;;  %v5723_v53 = vpop.f32.mrb[90].mxu1 }
 0x80b   : > { %v5724_v36 = vadd.f32 %v6242_v48, %v5723_v53  ;;  %v7735_v26 = vpop.f32.mrb[91].mxu1 }
 0x80d   : > { %v5736_v44 = vsel %vm5732_vm11, %v5724_v36, -inf }
 0x80e   : > { %5737 = vmax.xlane.f32.xlu0 %v5736_v44  ;;  %v5728_v1 = vpop.f32.mrb[92].mxu1 }
 0x80f   : > { %v5729_v46 = vadd.f32 %v6242_v48, %v5728_v1  ;;  %v7738_v16 = vpop.f32.mrb[93].mxu1 }
 0x811   : > { %v5739_v43 = vsel %vm5732_vm11, %v5729_v46, -inf }
 0x812   : > { %5740 = vmax.xlane.f32.xlu0 %v5739_v43 }
 0x897   : > { %v5735_v45 = vpop.xlane.xlu1 %5734 }
 0x898   : > { %v5742_v54 = vsub.f32 %v5719_v55, %v5735_v45 }
 0x89a   : > { %v5745_v58 = vmul.f32 1.442695, %v5742_v54 }
 0x89b   : > { %v5738_v60 = vpop.xlane.xlu0 %5737 }
 0x89c   : > { %8464 = vpow2.f32 %v5745_v58  ;;  %v5743_v34 = vsub.f32 %v5724_v36, %v5738_v60 }
 0x89e   : > { %v5747_v17 = vmul.f32 1.442695, %v5743_v34 }
 0x89f   : > { %v5741_v51 = vpop.xlane.xlu0 %5740 }
 0x8a0   : > { %8466 = vpow2.f32 %v5747_v17  ;;  %v5744_v35 = vsub.f32 %v5729_v46, %v5741_v51 }
 0x8a2   : > { %v5749_v25 = vmul.f32 1.442695, %v5744_v35 }
 0x8a4   : > { %8468 = vpow2.f32 %v5749_v25 }
 0x8a6   : > { %v8465_v52 = vpop.eup %8464 }
 0x8a7   : > { %v5751_v38 = vsel %vm5732_vm11, %v8465_v52, 0.0 }
 0x8a8   : > { %5752 = vadd.xlane.f32.xlu1 %v5751_v38 }
 0x8aa   : > { %v8467_v31 = vpop.eup %8466 }
 0x8ab   : > { %v5754_v42 = vsel %vm5732_vm11, %v8467_v31, 0.0 }
 0x8ac   : > { %5755 = vadd.xlane.f32.xlu0 %v5754_v42 }
 0x8ae   : > { %v8469_v22 = vpop.eup %8468 }
 0x8af   : > { %v5757_v5 = vsel %vm5732_vm11, %v8469_v22, 0.0 }
 0x8b0   : > { %5758 = vadd.xlane.f32.xlu1 %v5757_v5 }
 0x935   : > { %v5753_v47 = vpop.xlane.xlu1 %5752 }
 0x936   : > { %8470 = vrcp.f32 %v5753_v47 }
 0x939   : > { %v5756_v56 = vpop.xlane.xlu0 %5755 }
 0x93a   : > { %8472 = vrcp.f32 %v5756_v56 }
 0x93d   : > { %v5759_v19 = vpop.xlane.xlu1 %5758 }
 0x93e   : > { %8474 = vrcp.f32 %v5759_v19 }
 0x940   : > { %v8471_v11 = vpop.eup %8470 }
 0x941   : > { %v5761_v12 = vmul.f32 %v8471_v11, %v8465_v52 }
 0x943   : > { %v5766_v13 = vsel %vm593_vm1, %v5761_v12, %v5719_v55 }
 0x944   : > { %v8473_v57 = vpop.eup %8472  ;;  %v5769_v39 = vsel %vm594_vm12, %v5766_v13, 0.0 }
 0x945   : > { %5773 = vst.msk [vmem:[%s467_s15] sm:$0xff] %vm5772_vm13, %v5769_v39  ;;  %v5763_v3 = vmul.f32 %v8473_v57, %v8467_v31 }
 0x947   : > { %v5767_v62 = vsel %vm593_vm1, %v5763_v3, %v5724_v36 }
 0x948   : > { %v8475_v61 = vpop.eup %8474  ;;  %v5770_v41 = vsel %vm594_vm12, %v5767_v62, 0.0 }
 0x949   : > { %5774 = vst.msk [vmem:[%s467_s15 + $0x8] sm:$0xff] %vm5772_vm13, %v5770_v41  ;;  %v5765_v0 = vmul.f32 %v8475_v61, %v8469_v22 }
 0x94b   : > { %v5768_v30 = vsel %vm593_vm1, %v5765_v0, %v5729_v46 }
 0x94c   : > { %v5771_v28 = vsel %vm594_vm12, %v5768_v30, 0.0 }
 0x94d   : > { %5775 = vst.msk [vmem:[%s467_s15 + $0x10] sm:$0xff] %vm5772_vm13, %v5771_v28 }
 0x94e PF: > { %s24_s29 = sadd.s32 1, %s8482_s29  }
 0x94f   : > { %p21_p4 = scmp.ge.s32.totalorder %s24_s29, 4  }
 0x951   :  { %23 = sbr.rel (!%p21_p4) target bundleno = 1 (0x1), region = 130 }

</bundles_post_ra>
